<compile_context>
chip_gen: v7x
topology: tpu7x:2x2x1
jax: 0.10.0
libtpu: 0.0.40
codegen_flags: <defaults>
</compile_context>

<pallas_src>
import functools
import math

import jax
import jax.numpy as jnp
import numpy as np
from jax.experimental import pallas as pl
from jax.experimental.pallas import tpu as pltpu


# ----------------------------------------------------------------------------
# Pallas kernel: Wb windows (Wb % nW == 0) per grid step.
# ----------------------------------------------------------------------------
def _window_attn_kernel(x_ref, wqkv_ref, bqkv_ref, bias_ref, wproj_ref, bproj_ref,
                        o_ref, *, num_heads, head_dim, windows_per_block,
                        mask_windows, approx_recip, exp_dtype):
    Wb = windows_per_block
    nW = mask_windows
    N = x_ref.shape[1]
    C = x_ref.shape[2]                 # lane-padded channel count (Cp)
    H = num_heads
    hd = head_dim                      # lane-padded per-head dim (C == H * hd)
    cdt = wqkv_ref.dtype               # dtype fed to the MXU (f32 or bf16)

    # qkv projection for all Wb windows at once: (Wb*N, C) @ (C, 3C); f32 accumulation.
    # (Softmax scale is already folded into the q rows of wqkv/bqkv.)
    x = x_ref[...].reshape(Wb * N, C)
    qkv = jnp.dot(x, wqkv_ref[...], preferred_element_type=jnp.float32)
    qkv = qkv + bqkv_ref[...]                                        # (Wb*N, 3C) f32

    # Split heads once.  Cast to the MXU dtype BEFORE the relayout so the transpose
    # moves half the bytes on the bf16 path.
    # NOTE: these two transposes + the merge-heads transpose below are the only VMEM
    # relayouts left; if a bundle dump shows the kernel ld/st-bound (most likely on
    # v5e's single vst slot), replace the merge with H accumulated (hd, C) proj matmuls.
    def split_heads(t2d):
        return (t2d.reshape(Wb, N, H, hd)
                   .transpose(0, 2, 1, 3)
                   .reshape(Wb * H, N, hd))

    q = split_heads(qkv[:, :C].astype(cdt))
    k = split_heads(qkv[:, C:2 * C].astype(cdt))
    v = split_heads(qkv[:, 2 * C:].astype(cdt))

    # Scores + (relative-position bias + shifted-window mask), f32.  The bias operand
    # is only (nW, H, N, N); broadcast it over the Wb // nW window groups in-kernel.
    attn = jnp.einsum("bqd,bkd->bqk", q, k,
                      preferred_element_type=jnp.float32)            # (Wb*H, N, N)
    bias = bias_ref[...].astype(jnp.float32).reshape(nW * H, N, N)
    attn = (attn.reshape(Wb // nW, nW * H, N, N) + bias[None]).reshape(Wb * H, N, N)

    # Numerically stable softmax with DEFERRED normalization (flash-style).
    m = jnp.max(attn, axis=-1, keepdims=True)
    p = jnp.exp((attn - m).astype(exp_dtype))
    denom = jnp.sum(p, axis=-1, keepdims=True, dtype=jnp.float32)    # (Wb*H, N, 1)

    ctx = jnp.einsum("bqk,bkd->bqd", p.astype(cdt), v,
                     preferred_element_type=jnp.float32)             # (Wb*H, N, hd)
    if approx_recip:
        ctx = ctx * pl.reciprocal(denom, approx=True)                # EUP slot
    else:
        ctx = ctx / denom

    # Merge heads + output projection.
    ctx = (ctx.reshape(Wb, H, N, hd)
              .transpose(0, 2, 1, 3)
              .reshape(Wb * N, C))
    y = jnp.dot(ctx.astype(cdt), wproj_ref[...], preferred_element_type=jnp.float32)
    y = y + bproj_ref[...]
    o_ref[...] = y.reshape(Wb, N, C).astype(o_ref.dtype)


# ----------------------------------------------------------------------------
# Block sizing / VMEM accounting helpers.
# ----------------------------------------------------------------------------
def _round_up(x, m):
    return (x + m - 1) // m * m


def _vmem_capacity_bytes(default=64 << 20):
    """Physical VMEM per TensorCore (v5e/v6e: 128 MiB, v7x: 64 MiB).  Conservative
    64 MiB default if the query is unavailable."""
    try:
        info = pltpu.get_tpu_info()
    except Exception:
        return default
    for name in ("vmem_capacity_bytes", "vmem_bytes", "vmem_size_bytes"):
        v = getattr(info, name, None)
        if v:
            return int(v)
    return default


def _resident_bytes_estimate(Wb, N, Cp, H, nW, cdt_bytes, out_bytes, bias_bytes,
                             single_buffer_consts=True):
    """Upper-bound estimate of per-step VMEM residency: double-buffered x/out blocks,
    (single- or double-buffered) constant operands incl. the (nW,H,N,N) bias, and the
    dominant compute intermediates (qkv, q/k/v, scores x2, ctx, y)."""
    f32 = 4
    io_bufs = 2                                   # pipelined x / out blocks
    cb = 1 if single_buffer_consts else 2         # constant-index operands
    x_blk = Wb * N * Cp * cdt_bytes * io_bufs
    o_blk = Wb * N * Cp * out_bytes * io_bufs
    weights = (Cp * 3 * Cp + Cp * Cp + 4 * Cp) * cdt_bytes * cb
    bias = nW * H * N * N * bias_bytes * cb
    inter = (Wb * N * 3 * Cp * f32                # qkv (f32 accumulation)
             + 3 * Wb * N * Cp * cdt_bytes        # q / k / v in compute dtype
             + 2 * Wb * H * N * N * f32           # scores + exp(scores)
             + 2 * Wb * N * Cp * f32)             # ctx + y
    return x_blk + o_blk + weights + bias + inter + (2 << 20)   # compiler-scratch slack


def _auto_windows_per_block(B_, nW, N, Cp, H, cdt_bytes, out_bytes, bias_bytes,
                            vmem_budget):
    """Largest VMEM-feasible Wb (multiple of nW dividing B_), preferring >= 2 (even)
    grid steps so both v7x TensorCores get work, and an MXU-native M dim
    (Wb*N multiple of 256 for v6e/v7x; a 256-multiple is also the 128-multiple v5e
    wants, with 128 as the secondary criterion)."""
    cands = [w for w in range(nW, B_ + 1, nW) if B_ % w == 0]
    feas = [w for w in cands
            if _resident_bytes_estimate(w, N, Cp, H, nW, cdt_bytes, out_bytes,
                                        bias_bytes) <= vmem_budget]
    if not feas:
        feas = cands[:1]          # smallest legal block; the compiler is the final arbiter

    def rank(w):
        steps = B_ // w
        return (steps >= 2,                    # both cores busy
                (w * N) % 256 == 0,            # v6e/v7x MXU-native M
                (w * N) % 128 == 0,            # v5e MXU-native M
                steps % 2 == 0,                # even split across 2 cores
                w)                             # then amortize per-step overhead
    return max(feas, key=rank)


# ----------------------------------------------------------------------------
# Wrapper.
# ----------------------------------------------------------------------------
def window_attention_pallas(x, wqkv_eff, bqkv, rel_pos_bias, mask, wproj, bproj,
                            *, num_heads, scale, windows_per_block=None,
                            compute_dtype=None, exp_dtype=None, pad_lanes=True,
                            approx_reciprocal=True, single_buffer_constants=True,
                            interpret=False):
    """x: (B_, N, C), window index fastest in B_; mask: (nW, N, N);
    rel_pos_bias: (H, N, N); wqkv_eff: (3C, C) LoRA-merged; wproj: (C, C).

    compute_dtype: dtype fed to the MXU (f32 or bf16; adds/softmax/accumulation stay f32).
    exp_dtype:     dtype for the softmax exp (bf16 is a v6e/v7x-only micro-opt; keep f32
                   on v5e, which has no bf16 VPU/EUP).  Default f32.
    pad_lanes:     zero-pad channels to a 128-lane multiple for dense loads/stores.
    """
    B_, N, C = x.shape
    H = num_heads
    hd = C // H
    nW = mask.shape[0]
    assert C % H == 0
    assert B_ % nW == 0, "B_ must be batch * num_windows (window index fastest)"

    compute_dtype = jnp.dtype(compute_dtype if compute_dtype is not None else x.dtype)
    exp_dtype = jnp.dtype(exp_dtype if exp_dtype is not None else jnp.float32)
    out_dtype = x.dtype

    # ---- lane padding: C -> Cp (multiple of 128), per-head hd -> Cp // H -------------
    Cp = C
    if pad_lanes:
        cand = _round_up(C, 128)
        if cand % H == 0:              # per-head padded width must stay integral
            Cp = cand
    hd_p = Cp // H

    # ---- fold softmax scale into q rows; build padded, per-head-ordered operands -----
    wq = wqkv_eff.at[:C].multiply(scale)                              # (3C, C)
    bq = bqkv.at[:C].multiply(scale)                                  # (3C,)
    w4 = wq.reshape(3, H, hd, C)
    w4 = jnp.pad(w4, ((0, 0), (0, 0), (0, hd_p - hd), (0, Cp - C)))
    wqkv_t = w4.reshape(3 * Cp, Cp).T.astype(compute_dtype)           # (Cp, 3Cp)
    bq3 = jnp.pad(bq.reshape(3, H, hd), ((0, 0), (0, 0), (0, hd_p - hd)))
    bqkv2 = bq3.reshape(1, 3 * Cp).astype(jnp.float32)

    wp3 = wproj.reshape(C, H, hd)                                     # (out, in-head, in-hd)
    wp3 = jnp.pad(wp3, ((0, Cp - C), (0, 0), (0, hd_p - hd)))
    wproj_t = wp3.reshape(Cp, Cp).T.astype(compute_dtype)             # (Cp_in, Cp_out)
    bproj2 = jnp.pad(bproj, (0, Cp - C)).reshape(1, Cp).astype(jnp.float32)

    x_c = jnp.pad(x, ((0, 0), (0, 0), (0, Cp - C))).astype(compute_dtype)

    # Pre-combine relative-position bias + shifted-window mask once, in the compute
    # dtype (halves its DMA/residency on the bf16 path).  Kept at (nW, H, N, N) and
    # broadcast in-kernel -- no tiling to Wb, no per-step mask DMA.
    bias = (rel_pos_bias[None, :, :, :] + mask[:, None, :, :]).astype(compute_dtype)

    # ---- generation-aware VMEM budget & block sizing ---------------------------------
    vmem_cap = _vmem_capacity_bytes()
    vmem_limit = int(min(vmem_cap * 0.8, vmem_cap - (16 << 20)))
    vmem_limit = max(vmem_limit, 16 << 20)
    budget = max(vmem_limit - (4 << 20), 8 << 20)

    cdt_b = compute_dtype.itemsize
    Wb = windows_per_block or _auto_windows_per_block(
        B_, nW, N, Cp, H, cdt_b, jnp.dtype(out_dtype).itemsize, cdt_b, budget)
    assert Wb % nW == 0 and B_ % Wb == 0, \
        "windows_per_block must be a multiple of nW dividing B_"

    kernel = functools.partial(_window_attn_kernel, num_heads=H, head_dim=hd_p,
                               windows_per_block=Wb, mask_windows=nW,
                               approx_recip=approx_reciprocal, exp_dtype=exp_dtype)

    def _call(single_consts):
        def const_spec(shape, idx):
            if single_consts:
                # Constant index_map -> double-buffering is pure wasted VMEM.
                return pl.BlockSpec(shape, idx, pipeline_mode=pl.Buffered(1))
            return pl.BlockSpec(shape, idx)

        return pl.pallas_call(
            kernel,
            out_shape=jax.ShapeDtypeStruct((B_, N, Cp), out_dtype),
            grid_spec=pltpu.PrefetchScalarGridSpec(
                num_scalar_prefetch=0,
                grid=(B_ // Wb,),
                in_specs=[
                    pl.BlockSpec((Wb, N, Cp), lambda b: (b, 0, 0)),        # x (Wb windows)
                    const_spec((Cp, 3 * Cp), lambda b: (0, 0)),            # W_qkv^T (LoRA+scale)
                    const_spec((1, 3 * Cp), lambda b: (0, 0)),             # b_qkv
                    const_spec((nW, H, N, N), lambda b: (0, 0, 0, 0)),     # rpb + mask
                    const_spec((Cp, Cp), lambda b: (0, 0)),                # W_proj^T
                    const_spec((1, Cp), lambda b: (0, 0)),                 # b_proj
                ],
                out_specs=pl.BlockSpec((Wb, N, Cp), lambda b: (b, 0, 0)),
            ),
            compiler_params=pltpu.CompilerParams(
                dimension_semantics=("parallel",),
                vmem_limit_bytes=vmem_limit,
            ),
            interpret=interpret,
        )(x_c, wqkv_t, bqkv2, bias, wproj_t, bproj2)

    if single_buffer_constants:
        try:
            out = _call(True)
        except Exception:
            # Installed Pallas rejected Buffered(1); fall back to default double buffering.
            out = _call(False)
    else:
        out = _call(False)

    return out if Cp == C else out[..., :C]


# ----------------------------------------------------------------------------
# Plain-JAX glue: relative position index, LoRA merge, reference forward.
# ----------------------------------------------------------------------------
def build_relative_position_bias(table, window_size, num_heads):
    Wh, Ww = window_size
    N = Wh * Ww
    coords = np.stack(np.meshgrid(np.arange(Wh), np.arange(Ww), indexing="ij"))  # (2, Wh, Ww)
    coords_flat = coords.reshape(2, -1)                                          # (2, N)
    rel = coords_flat[:, :, None] - coords_flat[:, None, :]                      # (2, N, N)
    rel = rel.transpose(1, 2, 0).astype(np.int32)                                # (N, N, 2)
    rel[:, :, 0] += Wh - 1
    rel[:, :, 1] += Ww - 1
    rel[:, :, 0] *= 2 * Ww - 1
    rel_index = rel.sum(-1)                                                      # (N, N)
    rpb = jnp.take(table, jnp.asarray(rel_index.reshape(-1)), axis=0)            # (N*N, H)
    rpb = rpb.reshape(N, N, num_heads).transpose(2, 0, 1)                        # (H, N, N)
    return rpb


def merge_lora_qkv(w_qkv, lora_A, lora_B, dim, r, lora_alpha=1.0):
    """MergedLinear(dim, 3*dim, r, enable_lora=[True, False, True]):
    W_eff = W + (alpha/r) * zero_pad(B @ A) on the q rows [0:dim] and v rows [2dim:3dim]."""
    scaling = lora_alpha / r
    delta_q = lora_B[:dim] @ lora_A[:r]         # (dim, dim)
    delta_v = lora_B[dim:] @ lora_A[r:]         # (dim, dim)
    w_eff = w_qkv
    w_eff = w_eff.at[:dim].add(scaling * delta_q)
    w_eff = w_eff.at[2 * dim:].add(scaling * delta_v)
    return w_eff


def reference_forward(x, w_eff, bqkv, rpb, mask, wproj, bproj, num_heads, scale):
    """Pure-JAX reference mirroring the PyTorch forward (for correctness checks)."""
    B_, N, C = x.shape
    H, hd = num_heads, C // num_heads
    nW = mask.shape[0]
    qkv = x @ w_eff.T + bqkv                                       # (B_, N, 3C)
    qkv = qkv.reshape(B_, N, 3, H, hd).transpose(2, 0, 3, 1, 4)    # (3, B_, H, N, hd)
    q, k, v = qkv[0] * scale, qkv[1], qkv[2]
    attn = jnp.einsum("bhnd,bhmd->bhnm", q, k)
    attn = attn + rpb[None]
    attn = attn.reshape(B_ // nW, nW, H, N, N) + mask[None, :, None]
    attn = attn.reshape(B_, H, N, N)
    attn = jax.nn.softmax(attn, axis=-1)
    out = jnp.einsum("bhnm,bhmd->bhnd", attn, v).transpose(0, 2, 1, 3).reshape(B_, N, C)
    return out @ wproj.T + bproj


# ----------------------------------------------------------------------------
if __name__ == "__main__":
    # Small but representative shapes.
    dim = 32
    window_size = (4, 4)
    num_heads = 4
    r = 8
    batch = 2
    nW = 2                      # number of (shifted) windows sharing a mask
    B_ = batch * nW
    N = window_size[0] * window_size[1]
    head_dim = dim // num_heads
    scale = head_dim ** (-0.5)

    key = jax.random.PRNGKey(0)
    ks = jax.random.split(key, 10)

    # Deterministic synthetic parameters (shapes per module __init__).
    rpb_table = 0.02 * jax.random.normal(
        ks[0], ((2 * window_size[0] - 1) * (2 * window_size[1] - 1), num_heads), jnp.float32)
    w_qkv = (1.0 / math.sqrt(dim)) * jax.random.normal(ks[1], (3 * dim, dim), jnp.float32)
    b_qkv = 0.01 * jax.random.normal(ks[2], (3 * dim,), jnp.float32)
    lora_A = (1.0 / math.sqrt(dim)) * jax.random.normal(ks[3], (2 * r, dim), jnp.float32)
    lora_B = 0.02 * jax.random.normal(ks[4], (2 * dim, r), jnp.float32)   # synthetic (loralib inits to 0)
    w_proj = (1.0 / math.sqrt(dim)) * jax.random.normal(ks[5], (dim, dim), jnp.float32)
    b_proj = 0.01 * jax.random.normal(ks[6], (dim,), jnp.float32)

    # Inputs: windows of tokens, plus a 0/-100 shifted-window attention mask.
    x = jax.random.normal(ks[7], (B_, N, dim), jnp.float32)
    mask_bits = jax.random.bernoulli(ks[8], 0.2, (nW, N, N))
    eye = jnp.eye(N, dtype=bool)[None]
    mask = jnp.where(mask_bits & ~eye, -100.0, 0.0).astype(jnp.float32)   # keep diagonal unmasked

    # Glue: LoRA merge + relative position bias gather (dropouts are 0.0 -> identity).
    # TODO(synk): attn_drop / proj_drop with p > 0 (training) would need pltpu PRNG; omitted.
    w_qkv_eff = merge_lora_qkv(w_qkv, lora_A, lora_B, dim, r, lora_alpha=1.0)
    rpb = build_relative_position_bias(rpb_table, window_size, num_heads)

    ref = reference_forward(x, w_qkv_eff, b_qkv, rpb, mask, w_proj, b_proj, num_heads, scale)

    # 1) f32 MXU path, lane-padded channels (default), approx reciprocal.
    out = window_attention_pallas(x, w_qkv_eff, b_qkv, rpb, mask, w_proj, b_proj,
                                  num_heads=num_heads, scale=scale,
                                  compute_dtype=jnp.float32)
    out = jax.block_until_ready(out)
    assert out.shape == (B_, N, dim)
    assert jnp.allclose(out, ref, atol=5e-3, rtol=5e-3), "f32 (padded) kernel mismatch"

    # 2) f32 path without lane padding, exact-divide softmax (tight escape hatch).
    out_np = window_attention_pallas(x, w_qkv_eff, b_qkv, rpb, mask, w_proj, b_proj,
                                     num_heads=num_heads, scale=scale,
                                     compute_dtype=jnp.float32,
                                     pad_lanes=False, approx_reciprocal=False)
    out_np = jax.block_until_ready(out_np)
    assert jnp.allclose(out_np, ref, atol=5e-3, rtol=5e-3), "f32 (unpadded) kernel mismatch"

    # 3) bf16 MXU path (fast path on v6e/v7x); adds / softmax / accumulation stay f32.
    out_bf16 = window_attention_pallas(x, w_qkv_eff, b_qkv, rpb, mask, w_proj, b_proj,
                                       num_heads=num_heads, scale=scale,
                                       compute_dtype=jnp.bfloat16)
    out_bf16 = jax.block_until_ready(out_bf16)
    assert out_bf16.shape == (B_, N, dim)
    assert jnp.allclose(out_bf16, ref, atol=1e-1, rtol=1e-1), "bf16 kernel mismatch"

    print("KERNEL_OK")
</pallas_src>

<mosaic_0001>
module attributes {stable_mosaic.version = 11 : i64} {
  func.func @_window_attn_kernel(%arg0: i32, %arg1: memref<2x16x128xf32, #tpu.memory_space<vmem>>, %arg2: memref<128x384xf32, #tpu.memory_space<vmem>>, %arg3: memref<1x384xf32, #tpu.memory_space<vmem>>, %arg4: memref<2x4x16x16xf32, #tpu.memory_space<vmem>>, %arg5: memref<128x128xf32, #tpu.memory_space<vmem>>, %arg6: memref<1x128xf32, #tpu.memory_space<vmem>>, %arg7: memref<2x16x128xf32, #tpu.memory_space<vmem>>) attributes {dimension_semantics = [#tpu.dimension_semantics<parallel>], iteration_bounds = array<i64: 2>, scalar_prefetch = 0 : i64, scratch_operands = 0 : i64, tpu.core_type = #tpu.core_type<tc>, window_params = [{transform_indices = @transform_0, window_bounds = array<i64: 2, 16, 128>}, {pipeline_mode = #tpu.pipeline_mode<synchronous>, transform_indices = @transform_1, window_bounds = array<i64: 128, 384>}, {pipeline_mode = #tpu.pipeline_mode<synchronous>, transform_indices = @transform_2, window_bounds = array<i64: 1, 384>}, {pipeline_mode = #tpu.pipeline_mode<synchronous>, transform_indices = @transform_3, window_bounds = array<i64: 2, 4, 16, 16>}, {pipeline_mode = #tpu.pipeline_mode<synchronous>, transform_indices = @transform_4, window_bounds = array<i64: 128, 128>}, {pipeline_mode = #tpu.pipeline_mode<synchronous>, transform_indices = @transform_5, window_bounds = array<i64: 1, 128>}, {transform_indices = @transform_6, window_bounds = array<i64: 2, 16, 128>}]} {
    %c0 = arith.constant 0 : index
    %c0_0 = arith.constant 0 : index
    %c0_1 = arith.constant 0 : index
    %0 = vector.load %arg1[%c0, %c0_0, %c0_1] : memref<2x16x128xf32, #tpu.memory_space<vmem>>, vector<2x16x128xf32>
    %1 = vector.shape_cast %0 : vector<2x16x128xf32> to vector<32x128xf32>
    %c0_2 = arith.constant 0 : index
    %c0_3 = arith.constant 0 : index
    %2 = vector.load %arg2[%c0_2, %c0_3] : memref<128x384xf32, #tpu.memory_space<vmem>>, vector<128x384xf32>
    %cst = arith.constant dense<0.000000e+00> : vector<32x384xf32>
    %3 = tpu.matmul %1, %2, %cst {dimension_numbers = #tpu.dot_dimension_numbers<[1], [0], [0], [1], [0, 0, 1, 1], [], []>} : vector<32x128xf32>, vector<128x384xf32>, vector<32x384xf32> -> vector<32x384xf32>
    %c0_4 = arith.constant 0 : index
    %c0_5 = arith.constant 0 : index
    %4 = vector.load %arg3[%c0_4, %c0_5] : memref<1x384xf32, #tpu.memory_space<vmem>>, vector<1x384xf32>
    %5 = vector.broadcast %4 : vector<1x384xf32> to vector<32x384xf32>
    %6 = arith.addf %3, %5 : vector<32x384xf32>
    %7 = vector.extract_strided_slice %6 {offsets = [0, 0], sizes = [32, 128], strides = [1, 1]} : vector<32x384xf32> to vector<32x128xf32>
    %8 = vector.shape_cast %7 : vector<32x128xf32> to vector<2x16x4x32xf32>
    %9 = tpu.transpose %8, [0, 2, 1, 3] : vector<2x16x4x32xf32> -> vector<2x4x16x32xf32>
    %10 = vector.shape_cast %9 : vector<2x4x16x32xf32> to vector<8x16x32xf32>
    %11 = vector.extract_strided_slice %6 {offsets = [0, 128], sizes = [32, 128], strides = [1, 1]} : vector<32x384xf32> to vector<32x128xf32>
    %12 = vector.shape_cast %11 : vector<32x128xf32> to vector<2x16x4x32xf32>
    %13 = tpu.transpose %12, [0, 2, 1, 3] : vector<2x16x4x32xf32> -> vector<2x4x16x32xf32>
    %14 = vector.shape_cast %13 : vector<2x4x16x32xf32> to vector<8x16x32xf32>
    %15 = vector.extract_strided_slice %6 {offsets = [0, 256], sizes = [32, 128], strides = [1, 1]} : vector<32x384xf32> to vector<32x128xf32>
    %16 = vector.shape_cast %15 : vector<32x128xf32> to vector<2x16x4x32xf32>
    %17 = tpu.transpose %16, [0, 2, 1, 3] : vector<2x16x4x32xf32> -> vector<2x4x16x32xf32>
    %18 = vector.shape_cast %17 : vector<2x4x16x32xf32> to vector<8x16x32xf32>
    "tpu.trace_start"() <{level = 10 : i32, message = "bqd,bkd->bqk"}> : () -> ()
    %cst_6 = arith.constant dense<0.000000e+00> : vector<8x16x16xf32>
    %19 = tpu.matmul %10, %14, %cst_6 {dimension_numbers = #tpu.dot_dimension_numbers<[2], [2], [1], [1], [0, 0, 0, 1, 1, 1], [0], [0]>} : vector<8x16x32xf32>, vector<8x16x32xf32>, vector<8x16x16xf32> -> vector<8x16x16xf32>
    "tpu.trace_stop"() : () -> ()
    %c0_7 = arith.constant 0 : index
    %c0_8 = arith.constant 0 : index
    %c0_9 = arith.constant 0 : index
    %c0_10 = arith.constant 0 : index
    %20 = vector.load %arg4[%c0_7, %c0_8, %c0_9, %c0_10] : memref<2x4x16x16xf32, #tpu.memory_space<vmem>>, vector<2x4x16x16xf32>
    %21 = vector.shape_cast %20 : vector<2x4x16x16xf32> to vector<8x16x16xf32>
    %22 = vector.shape_cast %19 : vector<8x16x16xf32> to vector<1x8x16x16xf32>
    %23 = vector.shape_cast %21 : vector<8x16x16xf32> to vector<1x8x16x16xf32>
    %24 = arith.addf %22, %23 : vector<1x8x16x16xf32>
    %25 = vector.shape_cast %24 : vector<1x8x16x16xf32> to vector<8x16x16xf32>
    %cst_11 = arith.constant dense<0xFF800000> : vector<8x16xf32>
    %26 = vector.multi_reduction <maximumf>, %25, %cst_11 [2] : vector<8x16x16xf32> to vector<8x16xf32>
    %27 = vector.shape_cast %26 : vector<8x16xf32> to vector<8x16x1xf32>
    %28 = vector.broadcast %27 : vector<8x16x1xf32> to vector<8x16x16xf32>
    %29 = arith.subf %25, %28 : vector<8x16x16xf32>
    %30 = math.exp %29 : vector<8x16x16xf32>
    %cst_12 = arith.constant dense<0.000000e+00> : vector<8x16xf32>
    %31 = vector.multi_reduction <add>, %30, %cst_12 [2] : vector<8x16x16xf32> to vector<8x16xf32>
    %32 = vector.shape_cast %31 : vector<8x16xf32> to vector<8x16x1xf32>
    "tpu.trace_start"() <{level = 10 : i32, message = "bqk,bkd->bqd"}> : () -> ()
    %cst_13 = arith.constant dense<0.000000e+00> : vector<8x16x32xf32>
    %33 = tpu.matmul %30, %18, %cst_13 {dimension_numbers = #tpu.dot_dimension_numbers<[2], [1], [1], [2], [0, 0, 0, 1, 1, 2], [0], [0]>} : vector<8x16x16xf32>, vector<8x16x32xf32>, vector<8x16x32xf32> -> vector<8x16x32xf32>
    "tpu.trace_stop"() : () -> ()
    %34 = tpu.reciprocal %32 {approx = true} : vector<8x16x1xf32> -> vector<8x16x1xf32>
    %35 = vector.broadcast %34 : vector<8x16x1xf32> to vector<8x16x32xf32>
    %36 = arith.mulf %33, %35 : vector<8x16x32xf32>
    %37 = vector.shape_cast %36 : vector<8x16x32xf32> to vector<2x4x16x32xf32>
    %38 = tpu.transpose %37, [0, 2, 1, 3] : vector<2x4x16x32xf32> -> vector<2x16x4x32xf32>
    %39 = vector.shape_cast %38 : vector<2x16x4x32xf32> to vector<32x128xf32>
    %c0_14 = arith.constant 0 : index
    %c0_15 = arith.constant 0 : index
    %40 = vector.load %arg5[%c0_14, %c0_15] : memref<128x128xf32, #tpu.memory_space<vmem>>, vector<128x128xf32>
    %cst_16 = arith.constant dense<0.000000e+00> : vector<32x128xf32>
    %41 = tpu.matmul %39, %40, %cst_16 {dimension_numbers = #tpu.dot_dimension_numbers<[1], [0], [0], [1], [0, 0, 1, 1], [], []>} : vector<32x128xf32>, vector<128x128xf32>, vector<32x128xf32> -> vector<32x128xf32>
    %c0_17 = arith.constant 0 : index
    %c0_18 = arith.constant 0 : index
    %42 = vector.load %arg6[%c0_17, %c0_18] : memref<1x128xf32, #tpu.memory_space<vmem>>, vector<1x128xf32>
    %43 = vector.broadcast %42 : vector<1x128xf32> to vector<32x128xf32>
    %44 = arith.addf %41, %43 : vector<32x128xf32>
    %45 = vector.shape_cast %44 : vector<32x128xf32> to vector<2x16x128xf32>
    %c0_19 = arith.constant 0 : index
    %c0_20 = arith.constant 0 : index
    %c0_21 = arith.constant 0 : index
    %46 = vector.load %arg7[%c0_19, %c0_20, %c0_21] : memref<2x16x128xf32, #tpu.memory_space<vmem>>, vector<2x16x128xf32>
    tpu.vector_store %arg7[%c0_19, %c0_20, %c0_21], %45 {strides = array<i32>} : memref<2x16x128xf32, #tpu.memory_space<vmem>>, vector<2x16x128xf32>,
    return
  }
  func.func @transform_0(%arg0: i32) -> (i32, i32, i32) {
    %c0_i32 = arith.constant 0 : i32
    %c0_i32_0 = arith.constant 0 : i32
    %c0_i32_1 = arith.constant 0 : i32
    return %arg0, %c0_i32, %c0_i32_0 : i32, i32, i32
  }
  func.func @transform_1(%arg0: i32) -> (i32, i32) {
    %c0_i32 = arith.constant 0 : i32
    %c0_i32_0 = arith.constant 0 : i32
    %c0_i32_1 = arith.constant 0 : i32
    return %c0_i32, %c0_i32_0 : i32, i32
  }
  func.func @transform_2(%arg0: i32) -> (i32, i32) {
    %c0_i32 = arith.constant 0 : i32
    %c0_i32_0 = arith.constant 0 : i32
    %c0_i32_1 = arith.constant 0 : i32
    return %c0_i32, %c0_i32_0 : i32, i32
  }
  func.func @transform_3(%arg0: i32) -> (i32, i32, i32, i32) {
    %c0_i32 = arith.constant 0 : i32
    %c0_i32_0 = arith.constant 0 : i32
    %c0_i32_1 = arith.constant 0 : i32
    %c0_i32_2 = arith.constant 0 : i32
    %c0_i32_3 = arith.constant 0 : i32
    return %c0_i32, %c0_i32_0, %c0_i32_1, %c0_i32_2 : i32, i32, i32, i32
  }
  func.func @transform_4(%arg0: i32) -> (i32, i32) {
    %c0_i32 = arith.constant 0 : i32
    %c0_i32_0 = arith.constant 0 : i32
    %c0_i32_1 = arith.constant 0 : i32
    return %c0_i32, %c0_i32_0 : i32, i32
  }
  func.func @transform_5(%arg0: i32) -> (i32, i32) {
    %c0_i32 = arith.constant 0 : i32
    %c0_i32_0 = arith.constant 0 : i32
    %c0_i32_1 = arith.constant 0 : i32
    return %c0_i32, %c0_i32_0 : i32, i32
  }
  func.func @transform_6(%arg0: i32) -> (i32, i32, i32) {
    %c0_i32 = arith.constant 0 : i32
    %c0_i32_0 = arith.constant 0 : i32
    %c0_i32_1 = arith.constant 0 : i32
    return %arg0, %c0_i32, %c0_i32_0 : i32, i32, i32
  }
}

module attributes {stable_mosaic.version = 11 : i64} {
  func.func @_window_attn_kernel(%arg0: i32, %arg1: memref<2x16x128xf32, #tpu.memory_space<vmem>>, %arg2: memref<128x384xf32, #tpu.memory_space<vmem>>, %arg3: memref<1x384xf32, #tpu.memory_space<vmem>>, %arg4: memref<2x4x16x16xf32, #tpu.memory_space<vmem>>, %arg5: memref<128x128xf32, #tpu.memory_space<vmem>>, %arg6: memref<1x128xf32, #tpu.memory_space<vmem>>, %arg7: memref<2x16x128xf32, #tpu.memory_space<vmem>>) attributes {dimension_semantics = [#tpu.dimension_semantics<parallel>], iteration_bounds = array<i64: 2>, scalar_prefetch = 0 : i64, scratch_operands = 0 : i64, tpu.core_type = #tpu.core_type<tc>, window_params = [{transform_indices = @transform_0, window_bounds = array<i64: 2, 16, 128>}, {pipeline_mode = #tpu.pipeline_mode<synchronous>, transform_indices = @transform_1, window_bounds = array<i64: 128, 384>}, {pipeline_mode = #tpu.pipeline_mode<synchronous>, transform_indices = @transform_2, window_bounds = array<i64: 1, 384>}, {pipeline_mode = #tpu.pipeline_mode<synchronous>, transform_indices = @transform_3, window_bounds = array<i64: 2, 4, 16, 16>}, {pipeline_mode = #tpu.pipeline_mode<synchronous>, transform_indices = @transform_4, window_bounds = array<i64: 128, 128>}, {pipeline_mode = #tpu.pipeline_mode<synchronous>, transform_indices = @transform_5, window_bounds = array<i64: 1, 128>}, {transform_indices = @transform_6, window_bounds = array<i64: 2, 16, 128>}]} {
    %c0 = arith.constant 0 : index
    %c0_0 = arith.constant 0 : index
    %c0_1 = arith.constant 0 : index
    %0 = vector.load %arg1[%c0, %c0_0, %c0_1] : memref<2x16x128xf32, #tpu.memory_space<vmem>>, vector<2x16x128xf32>
    %1 = vector.shape_cast %0 : vector<2x16x128xf32> to vector<32x128xf32>
    %c0_2 = arith.constant 0 : index
    %c0_3 = arith.constant 0 : index
    %2 = vector.load %arg2[%c0_2, %c0_3] : memref<128x384xf32, #tpu.memory_space<vmem>>, vector<128x384xf32>
    %cst = arith.constant dense<0.000000e+00> : vector<32x384xf32>
    %3 = tpu.matmul %1, %2, %cst {dimension_numbers = #tpu.dot_dimension_numbers<[1], [0], [0], [1], [0, 0, 1, 1], [], []>} : vector<32x128xf32>, vector<128x384xf32>, vector<32x384xf32> -> vector<32x384xf32>
    %c0_4 = arith.constant 0 : index
    %c0_5 = arith.constant 0 : index
    %4 = vector.load %arg3[%c0_4, %c0_5] : memref<1x384xf32, #tpu.memory_space<vmem>>, vector<1x384xf32>
    %5 = vector.broadcast %4 : vector<1x384xf32> to vector<32x384xf32>
    %6 = arith.addf %3, %5 : vector<32x384xf32>
    %7 = vector.extract_strided_slice %6 {offsets = [0, 0], sizes = [32, 128], strides = [1, 1]} : vector<32x384xf32> to vector<32x128xf32>
    %8 = vector.shape_cast %7 : vector<32x128xf32> to vector<2x16x4x32xf32>
    %9 = tpu.transpose %8, [0, 2, 1, 3] : vector<2x16x4x32xf32> -> vector<2x4x16x32xf32>
    %10 = vector.shape_cast %9 : vector<2x4x16x32xf32> to vector<8x16x32xf32>
    %11 = vector.extract_strided_slice %6 {offsets = [0, 128], sizes = [32, 128], strides = [1, 1]} : vector<32x384xf32> to vector<32x128xf32>
    %12 = vector.shape_cast %11 : vector<32x128xf32> to vector<2x16x4x32xf32>
    %13 = tpu.transpose %12, [0, 2, 1, 3] : vector<2x16x4x32xf32> -> vector<2x4x16x32xf32>
    %14 = vector.shape_cast %13 : vector<2x4x16x32xf32> to vector<8x16x32xf32>
    %15 = vector.extract_strided_slice %6 {offsets = [0, 256], sizes = [32, 128], strides = [1, 1]} : vector<32x384xf32> to vector<32x128xf32>
    %16 = vector.shape_cast %15 : vector<32x128xf32> to vector<2x16x4x32xf32>
    %17 = tpu.transpose %16, [0, 2, 1, 3] : vector<2x16x4x32xf32> -> vector<2x4x16x32xf32>
    %18 = vector.shape_cast %17 : vector<2x4x16x32xf32> to vector<8x16x32xf32>
    "tpu.trace_start"() <{level = 10 : i32, message = "bqd,bkd->bqk"}> : () -> ()
    %cst_6 = arith.constant dense<0.000000e+00> : vector<8x16x16xf32>
    %19 = tpu.matmul %10, %14, %cst_6 {dimension_numbers = #tpu.dot_dimension_numbers<[2], [2], [1], [1], [0, 0, 0, 1, 1, 1], [0], [0]>} : vector<8x16x32xf32>, vector<8x16x32xf32>, vector<8x16x16xf32> -> vector<8x16x16xf32>
    "tpu.trace_stop"() : () -> ()
    %c0_7 = arith.constant 0 : index
    %c0_8 = arith.constant 0 : index
    %c0_9 = arith.constant 0 : index
    %c0_10 = arith.constant 0 : index
    %20 = vector.load %arg4[%c0_7, %c0_8, %c0_9, %c0_10] : memref<2x4x16x16xf32, #tpu.memory_space<vmem>>, vector<2x4x16x16xf32>
    %21 = vector.shape_cast %20 : vector<2x4x16x16xf32> to vector<8x16x16xf32>
    %22 = vector.shape_cast %19 : vector<8x16x16xf32> to vector<1x8x16x16xf32>
    %23 = vector.shape_cast %21 : vector<8x16x16xf32> to vector<1x8x16x16xf32>
    %24 = arith.addf %22, %23 : vector<1x8x16x16xf32>
    %25 = vector.shape_cast %24 : vector<1x8x16x16xf32> to vector<8x16x16xf32>
    %cst_11 = arith.constant dense<0xFF800000> : vector<8x16xf32>
    %26 = vector.multi_reduction <maximumf>, %25, %cst_11 [2] : vector<8x16x16xf32> to vector<8x16xf32>
    %27 = vector.shape_cast %26 : vector<8x16xf32> to vector<8x16x1xf32>
    %28 = vector.broadcast %27 : vector<8x16x1xf32> to vector<8x16x16xf32>
    %29 = arith.subf %25, %28 : vector<8x16x16xf32>
    %30 = math.exp %29 : vector<8x16x16xf32>
    %cst_12 = arith.constant dense<0.000000e+00> : vector<8x16xf32>
    %31 = vector.multi_reduction <add>, %30, %cst_12 [2] : vector<8x16x16xf32> to vector<8x16xf32>
    %32 = vector.shape_cast %31 : vector<8x16xf32> to vector<8x16x1xf32>
    "tpu.trace_start"() <{level = 10 : i32, message = "bqk,bkd->bqd"}> : () -> ()
    %cst_13 = arith.constant dense<0.000000e+00> : vector<8x16x32xf32>
    %33 = tpu.matmul %30, %18, %cst_13 {dimension_numbers = #tpu.dot_dimension_numbers<[2], [1], [1], [2], [0, 0, 0, 1, 1, 2], [0], [0]>} : vector<8x16x16xf32>, vector<8x16x32xf32>, vector<8x16x32xf32> -> vector<8x16x32xf32>
    "tpu.trace_stop"() : () -> ()
    %34 = tpu.reciprocal %32 {approx = true} : vector<8x16x1xf32> -> vector<8x16x1xf32>
    %35 = vector.broadcast %34 : vector<8x16x1xf32> to vector<8x16x32xf32>
    %36 = arith.mulf %33, %35 : vector<8x16x32xf32>
    %37 = vector.shape_cast %36 : vector<8x16x32xf32> to vector<2x4x16x32xf32>
    %38 = tpu.transpose %37, [0, 2, 1, 3] : vector<2x4x16x32xf32> -> vector<2x16x4x32xf32>
    %39 = vector.shape_cast %38 : vector<2x16x4x32xf32> to vector<32x128xf32>
    %c0_14 = arith.constant 0 : index
    %c0_15 = arith.constant 0 : index
    %40 = vector.load %arg5[%c0_14, %c0_15] : memref<128x128xf32, #tpu.memory_space<vmem>>, vector<128x128xf32>
    %cst_16 = arith.constant dense<0.000000e+00> : vector<32x128xf32>
    %41 = tpu.matmul %39, %40, %cst_16 {dimension_numbers = #tpu.dot_dimension_numbers<[1], [0], [0], [1], [0, 0, 1, 1], [], []>} : vector<32x128xf32>, vector<128x128xf32>, vector<32x128xf32> -> vector<32x128xf32>
    %c0_17 = arith.constant 0 : index
    %c0_18 = arith.constant 0 : index
    %42 = vector.load %arg6[%c0_17, %c0_18] : memref<1x128xf32, #tpu.memory_space<vmem>>, vector<1x128xf32>
    %43 = vector.broadcast %42 : vector<1x128xf32> to vector<32x128xf32>
    %44 = arith.addf %41, %43 : vector<32x128xf32>
    %45 = vector.shape_cast %44 : vector<32x128xf32> to vector<2x16x128xf32>
    %c0_19 = arith.constant 0 : index
    %c0_20 = arith.constant 0 : index
    %c0_21 = arith.constant 0 : index
    %46 = vector.load %arg7[%c0_19, %c0_20, %c0_21] : memref<2x16x128xf32, #tpu.memory_space<vmem>>, vector<2x16x128xf32>
    tpu.vector_store %arg7[%c0_19, %c0_20, %c0_21], %45 {strides = array<i32>} : memref<2x16x128xf32, #tpu.memory_space<vmem>>, vector<2x16x128xf32>,
    return
  }
  func.func @transform_0(%arg0: i32) -> (i32, i32, i32) {
    %c0_i32 = arith.constant 0 : i32
    %c0_i32_0 = arith.constant 0 : i32
    %c0_i32_1 = arith.constant 0 : i32
    return %arg0, %c0_i32, %c0_i32_0 : i32, i32, i32
  }
  func.func @transform_1(%arg0: i32) -> (i32, i32) {
    %c0_i32 = arith.constant 0 : i32
    %c0_i32_0 = arith.constant 0 : i32
    %c0_i32_1 = arith.constant 0 : i32
    return %c0_i32, %c0_i32_0 : i32, i32
  }
  func.func @transform_2(%arg0: i32) -> (i32, i32) {
    %c0_i32 = arith.constant 0 : i32
    %c0_i32_0 = arith.constant 0 : i32
    %c0_i32_1 = arith.constant 0 : i32
    return %c0_i32, %c0_i32_0 : i32, i32
  }
  func.func @transform_3(%arg0: i32) -> (i32, i32, i32, i32) {
    %c0_i32 = arith.constant 0 : i32
    %c0_i32_0 = arith.constant 0 : i32
    %c0_i32_1 = arith.constant 0 : i32
    %c0_i32_2 = arith.constant 0 : i32
    %c0_i32_3 = arith.constant 0 : i32
    return %c0_i32, %c0_i32_0, %c0_i32_1, %c0_i32_2 : i32, i32, i32, i32
  }
  func.func @transform_4(%arg0: i32) -> (i32, i32) {
    %c0_i32 = arith.constant 0 : i32
    %c0_i32_0 = arith.constant 0 : i32
    %c0_i32_1 = arith.constant 0 : i32
    return %c0_i32, %c0_i32_0 : i32, i32
  }
  func.func @transform_5(%arg0: i32) -> (i32, i32) {
    %c0_i32 = arith.constant 0 : i32
    %c0_i32_0 = arith.constant 0 : i32
    %c0_i32_1 = arith.constant 0 : i32
    return %c0_i32, %c0_i32_0 : i32, i32
  }
  func.func @transform_6(%arg0: i32) -> (i32, i32, i32) {
    %c0_i32 = arith.constant 0 : i32
    %c0_i32_0 = arith.constant 0 : i32
    %c0_i32_1 = arith.constant 0 : i32
    return %arg0, %c0_i32, %c0_i32_0 : i32, i32, i32
  }
}

</mosaic_0001>

<bundles_post_ra>
// kernel: tpu_custom_call.1
= control target key start
LH: loop header
LB: loop body
LE: loop exit
PB: predicated region body
PF: predicated region fallthrough
CT: control target
= control target key end

     0   :  { %s6787_s0 = inlined_call_operand.hbm [shape: f32[4,16,128], index: 0, kind: input, shape index: {}]   ;;  %s6788_s1 = inlined_call_operand.hbm [shape: f32[128,384], index: 1, kind: input, shape index: {}]   ;;  %s6789_s2 = inlined_call_operand.vmem [shape: f32[1,384], index: 2, kind: input, shape index: {}]   ;;  %s6790_s3 = inlined_call_operand.hbm [shape: f32[2,4,16,16], index: 3, kind: input, shape index: {}]   ;;  %s6791_s4 = inlined_call_operand.hbm [shape: f32[128,128], index: 4, kind: input, shape index: {}]   ;;  %s6792_s5 = inlined_call_operand.vmem [shape: f32[1,128], index: 5, kind: input, shape index: {}]   ;;  %s6793_s6 = inlined_call_operand.hbm [shape: f32[4,16,128], index: 6, kind: output, shape index: {}]  }
   0x1   :  { %6797 = sst [smem:[#allocation15_spill]] %s6788_s1 }
   0x2   :  { %11 = vsyncpa [#allocation3], 0 }
   0x3   :  { %13 = vsyncpa [#allocation3 + $0x1], 0 }
   0x4   :  { %14 = vsyncpa [#allocation6], 0 }
   0x5   :  { %15 = vsyncpa [#allocation9], 0 }
   0x6   :  { %16 = vsyncpa [#allocation4], 0 }
   0x7   :  { %18 = vsyncpa [#allocation4 + $0x1], 0  ;;  %s5701_s21 = smov 0   ;;  %s5703_s22 = smov 0  }
   0x8   :  { %s5705_s23 = smov 0   ;;  %s5707_s24 = smov 0  }
   0x9 LB: > { %s5722_s25 = sadd.s32 4294967295, %s5647_s24   ;;  %s4701_s26 = sadd.s32 4294967294, %s5647_s24   ;;  %s5647_s24 = sphi %s5707_s24, %s6820_s24   ;;  %s5643_s23 = sphi %s5705_s23, %s6819_s23   ;;  %s5639_s22 = sphi %s5703_s22, %s6818_s22   ;;  %s5635_s21 = sphi %s5701_s21, %s6817_s21  }
   0xa   : > { %p44_p0 = scmp.ne.s32.totalorder %s5639_s22, %s5635_s21  ;;  %p6794_p1 = scmp.eq.s32.totalorder %s5722_s25, 0 }
   0xb   : > { %p179_p3 = scmp.eq.s32.totalorder %s4701_s26, 1  ;;  %p4702_p5 = scmp.ge.s32.totalorder %s5647_s24, 1 }
   0xc   : > { %p5731_p4 = por %p6794_p1, %p44_p0  ;;  %p186_p7 = scmp.lt.s32.totalorder %s5647_s24, 3 }
   0xd   : > { %p5736_p6 = por %p179_p3, %p44_p0  ;;  %s5649_s30 = smov [#allocation5]  }
   0xe   : > { %s6798_s27 = scalar_select %p5731_p4, 1, 0 }
   0xf   : > { %s6799_s28 = scalar_select %p5736_p6, 1, 0 }
  0x10   : > { %p5741_p8 = pnand %p4702_p5, %p186_p7  ;;  %s198_s7 = sshll.u32 %s5649_s30, 4  ;;  %s5745_s7 = int_to_ptr.vmem [resolvable:$true] %s198_s7 }
  0x11   : > { %s5650_s9 = smov [#allocation7]   ;;  %s6802_s1 = sld [smem:[#allocation15_spill]] }
  0x12   : > { %s6800_s29 = scalar_select %p5741_p8, 1, 0 }
  0x13   : > { %p5292_p9 = pneg %p5741_p8  ;;  %s214_s10 = sshll.u32 %s5650_s9, 4  ;;  %s5756_s10 = int_to_ptr.vmem [resolvable:$true] %s214_s10 }
  0x15   : > { %p5752_p11 = pnand %p5292_p9, %p6794_p1 }
  0x17   : > { %s5459_s13 = scalar_lea.hbm %s6802_s1, 6144  ;;  %p5766_p13 = pneg %p5752_p11 }
  0x18   : > { %p5460_p12 = scmp.ne.s32.totalorder %s6802_s1, %s5459_s13  ;;  %p5466_p5 = scmp.lt.u32.totalorder %s5459_s13, %s6802_s1 }
  0x1a   : > { %p5462_p0 = pnand %p5766_p13, %p5460_p12 }
  0x1c   : > { %p5463_p3 = pneg %p5462_p0 }
  0x1e   : > { %p5468_p7 = pnand %p5466_p5, %p5463_p3 }
  0x20   : > { %5471 = shalt.err (!%p5468_p7)
}
  0x21   : > { %s5472_s19 = scalar_lea.vmem %s5745_s7, 6144  ;;  %p5480_p2 = scmp.lt.s32.totalorder %s5745_s7, %s5745_s7 }
  0x22   : > { %p5473_p9 = scmp.ne.s32.totalorder %s5745_s7, %s5472_s19  ;;  %p5481_p6 = scmp.lt.s32.totalorder %s5472_s19, %s5472_s19 }
  0x24   : > { %p5475_p10 = pnand %p5473_p9, %p5766_p13  ;;  %p5482_p12 = por %p5481_p6, %p5480_p2 }
  0x26   : > { %p5476_p1 = pneg %p5475_p10 }
  0x28   : > { %p5483_p0 = pnand %p5482_p12, %p5476_p1 }
  0x2a   : > { %5486 = shalt.err (!%p5483_p0)
}
  0x2b   : > { %s5651_s20 = smov 384   ;;  %s5652_s26 = smov 24  }
  0x2c   : > { %5295 = dma.hbm_to_vmem [thread:$0]  (!%p5752_p11), %s6802_s1, 6144, %s5745_s7, [#allocation6], %s5651_s20, %s5651_s20, %s5652_s26  }
  0x2d   : > { %s5487_s13 = scalar_lea.hbm %s6790_s3, 2048 }
  0x2e   : > { %p5488_p2 = scmp.ne.s32.totalorder %s6790_s3, %s5487_s13  ;;  %p5494_p10 = scmp.lt.u32.totalorder %s5487_s13, %s6790_s3 }
  0x30   : > { %p5490_p1 = pnand %p5488_p2, %p5766_p13 }
  0x32   : > { %p5491_p6 = pneg %p5490_p1 }
  0x34   : > { %p5496_p3 = pnand %p5494_p10, %p5491_p6 }
  0x36   : > { %5499 = shalt.err (!%p5496_p3)
}
  0x37   : > { %s5500_s7 = scalar_lea.vmem %s5756_s10, 2048  ;;  %p5508_p12 = scmp.lt.s32.totalorder %s5756_s10, %s5756_s10 }
  0x38   : > { %p5501_p5 = scmp.ne.s32.totalorder %s5756_s10, %s5500_s7  ;;  %p5509_p0 = scmp.lt.s32.totalorder %s5500_s7, %s5500_s7 }
  0x3a   : > { %p5503_p7 = pnand %p5501_p5, %p5766_p13  ;;  %p5510_p2 = por %p5509_p0, %p5508_p12 }
  0x3c   : > { %p5504_p9 = pneg %p5503_p7 }
  0x3e   : > { %p5511_p1 = pnand %p5510_p2, %p5504_p9 }
  0x40   : > { %5514 = shalt.err (!%p5511_p1)
}
  0x41   : > { %s5653_s19 = smov 128   ;;  %s5654_s20 = smov 8  }
  0x42   : > { %5298 = dma.hbm_to_vmem [thread:$0]  (!%p5752_p11), %s6790_s3, 2048, %s5756_s10, [#allocation6], %s5653_s19, %s5653_s19, %s5654_s20  }
  0x43   : > { %s5655_s9 = smov [#allocation8]   ;;  %s5814_s12 = sadd.s32 1, %s5647_s24  }
  0x44   : > { %s227_s11 = sshll.u32 %s5655_s9, 4  ;;  %s5515_s15 = scalar_lea.hbm %s6791_s4, 2048  ;;  %s228_s11 = int_to_ptr.vmem [resolvable:$true] %s227_s11 }
  0x45   : > { %p5516_p6 = scmp.ne.s32.totalorder %s6791_s4, %s5515_s15  ;;  %p5522_p5 = scmp.lt.u32.totalorder %s5515_s15, %s6791_s4 }
  0x47   : > { %p5518_p10 = pnand %p5516_p6, %p5766_p13 }
  0x49   : > { %p5519_p3 = pneg %p5518_p10 }
  0x4b   : > { %p5524_p7 = pnand %p5522_p5, %p5519_p3 }
  0x4d   : > { %5527 = shalt.err (!%p5524_p7)
}
  0x4e   : > { %s5528_s10 = scalar_lea.vmem %s228_s11, 2048  ;;  %p5536_p2 = scmp.lt.s32.totalorder %s228_s11, %s228_s11 }
  0x4f   : > { %p5529_p9 = scmp.ne.s32.totalorder %s228_s11, %s5528_s10  ;;  %p5537_p1 = scmp.lt.s32.totalorder %s5528_s10, %s5528_s10 }
  0x51   : > { %p5531_p12 = pnand %p5529_p9, %p5766_p13  ;;  %p5538_p4 = por %p5537_p1, %p5536_p2 }
  0x53   : > { %p5532_p0 = pneg %p5531_p12 }
  0x55   : > { %p5539_p8 = pnand %p5538_p4, %p5532_p0 }
  0x57   : > { %5542 = shalt.err (!%p5539_p8)
}
  0x58   : > { %5301 = dma.hbm_to_vmem [thread:$0]  (!%p5752_p11), %s6791_s4, 2048, %s228_s11, [#allocation9], %s5653_s19, %s5653_s19, %s5654_s20  }
  0x59   : > { %s28_s16 = ssub.s32 %s5647_s24, %s5814_s12  ;;  %s31_s8 = sadd.s32 1, %s5643_s23 }
  0x5a   : > { %p29_p4 = scmp.eq.s32.totalorder %s28_s16, 0  ;;  %p38_p8 = scmp.ne.s32.totalorder %s5643_s23, %s5639_s22 }
  0x5b   : > { %p39_p13 = scmp.eq.s32.totalorder %s5647_s24, 0  ;;  %p5313_p6 = scmp.lt.s32.totalorder %s5647_s24, 2 }
  0x5c   : > { %s5845_s30 = scalar_select %p29_p4, %s5643_s23, %s31_s8  }
  0x5d   : > { %p40_p10 = por %p39_p13, %p38_p8  ;;  %p6804_p3 = scmp.eq.s32.totalorder %s5722_s25, 1 }
  0x5e   : > { %s244_s13 = sand.u32 1, %s5643_s23   ;;  %s4805_s14 = sshll.u32 %s5647_s24, 9 }
  0x5f   : > { %p5849_p5 = por %p6804_p3, %p38_p8  ;;  %s4707_s15 = sshll.u32 %s244_s13, 5 }
  0x60   : > { %s5858_s11 = scalar_lea.hbm %s6787_s0, %s4805_s14  ;;  %s248_s7 = scalar_lea.vmem [#allocation2], %s4707_s15 }
  0x61   : > { %s256_s10 = sshll.u32 %s248_s7, 4  ;;  %p5860_p11 = pnand %p5313_p6, %p40_p10  ;;  %s5864_s10 = int_to_ptr.vmem [resolvable:$true] %s256_s10 }
  0x62   : > { %s5866_s26 = scalar_lea.sflag [#allocation3], %s244_s13  ;;  %s5543_s16 = scalar_lea.hbm %s5858_s11, 512 }
  0x63   : > { %p5544_p7 = scmp.ne.s32.totalorder %s5858_s11, %s5543_s16  ;;  %p5545_p9 = pneg %p5860_p11 }
  0x64   : > { %s5548_s15 = scalar_lea.hbm %s6787_s0, 1024  ;;  %p5549_p2 = scmp.lt.u32.totalorder %s5858_s11, %s6787_s0 }
  0x65   : > { %p5546_p12 = pnand %p5545_p9, %p5544_p7  ;;  %p5550_p1 = scmp.lt.u32.totalorder %s5548_s15, %s5543_s16 }
  0x66   : > { %p5552_p8 = scmp.lt.u32.totalorder %s5543_s16, %s5858_s11 }
  0x67   : > { %p5547_p0 = pneg %p5546_p12  ;;  %p5551_p4 = por %p5550_p1, %p5549_p2 }
  0x69   : > { %p5553_p13 = por %p5552_p8, %p5551_p4 }
  0x6b   : > { %p5554_p6 = pnand %p5553_p13, %p5547_p0 }
  0x6d   : > { %5557 = shalt.err (!%p5554_p6)
}
  0x6e   : > { %s5558_s13 = scalar_lea.vmem %s5864_s10, 512  ;;  %s5656_s7 = smov [#allocation2]  }
  0x6f   : > { %p5559_p10 = scmp.ne.s32.totalorder %s5864_s10, %s5558_s13  ;;  %s5563_s8 = sshll.u32 %s5656_s7, 4  ;;  %s5564_s8 = int_to_ptr.vmem [resolvable:$false] %s5563_s8 }
  0x70   : > { %s5565_s14 = scalar_lea.vmem %s5564_s8, 1024  ;;  %p5566_p12 = scmp.lt.s32.totalorder %s5864_s10, %s5564_s8 }
  0x71   : > { %p5561_p3 = pnand %p5559_p10, %p5545_p9  ;;  %p5567_p2 = scmp.lt.s32.totalorder %s5565_s14, %s5558_s13 }
  0x73   : > { %p5562_p7 = pneg %p5561_p3  ;;  %p5568_p1 = por %p5567_p2, %p5566_p12 }
  0x75   : > { %p5569_p4 = pnand %p5568_p1, %p5562_p7 }
  0x77   : > { %5572 = shalt.err (!%p5569_p4)
}
  0x78   : > { %5305 = dma.hbm_to_vmem [thread:$0]  (!%p5860_p11), %s5858_s11, 512, %s5864_s10, %s5866_s26, %s5653_s19, %s5653_s19, %s5654_s20  }
  0x79   : > { %p6807_p9 = scmp.ne.s32.totalorder %s6800_s29, 0 }
  0x7a   : > { %s5900_s16 = sand.u32 (!%p6807_p9), 1, %s5639_s22   ;;  %p6808_p0 = scmp.ne.s32.totalorder (!%p6807_p9), %s6798_s27, 0 }
  0x7b   : > { %268 = sbr.rel (%p6807_p9) target bundleno = 1595 (0x63b), region = 44  ;;  %s4712_s15 = sshll.u32 (!%p6807_p9), %s5900_s16, 5 }
  0x7c   : > { %s271_s17 = scalar_lea.sflag (!%p6807_p9), [#allocation3], %s5900_s16  ;;  %s5906_s1 = scalar_lea.vmem (!%p6807_p9), [#allocation2], %s4712_s15 }
  0x82   : > { %5618 = dma.done.wait (%p6808_p0), %s271_s17, 512  }
  0x83   : > { %5620 = vsyncadd (%p6808_p0), %s271_s17, 4294966784  ;;  %p6809_p11 = scmp.eq.s32.totalorder %s5722_s25, 0 }
  0x85   : > { %5622 = dma.done.wait (%p6809_p11), [#allocation6], 8192   ;;  %p6810_p8 = pmov %p6809_p11 }
  0x87   : > { %5624 = vsyncadd (%p6810_p8), [#allocation6], 4294959104  ;;  %p6811_p13 = pmov %p6810_p8 }
  0x88   : > { %p6812_p6 = pmov %p6810_p8 }
  0x89   : > { %5626 = dma.done.wait (%p6811_p13), [#allocation9], 2048  }
  0x8a   : > { %5628 = vsyncadd (%p6812_p6), [#allocation9], 4294965248  ;;  %v5657_v0 = vmov 0.0   ;;  %v322_v1 = vld [vmem:[#allocation5 + $0x8] sm:$0xff]  ;;  %v325_v2 = vld [vmem:[#allocation5 + $0x20] sm:$0xff]  ;;  %s5658_s19 = smov 64  }
  0x8b   : > { %450 = vmatprep.mubr.f32.mxu0 %v5657_v0  ;;  %v321_v3 = vld [vmem:[#allocation5] sm:$0xff]  ;;  %v5100_v4 = vpack.c.bf16 %v325_v2, %v322_v1  ;;  %v324_v5 = vld [vmem:[#allocation5 + $0x18] sm:$0xff]  ;;  %v331_v7 = vld [vmem:[#allocation5 + $0x50] sm:$0xff]  ;;  %s5659_s20 = smov 96   ;;  %s5660_s11 = smov 32   ;;  %vm2312_vm0 = vcmask 261120  }
  0x8c   : > { %v328_v6 = vld [vmem:[#allocation5 + $0x38] sm:$0xff]  ;;  %v5102_v8 = vpack.c.bf16 %v324_v5, %v321_v3  ;;  %v327_v10 = vld [vmem:[#allocation5 + $0x30] sm:$0xff]  ;;  %v330_v11 = vld [vmem:[#allocation5 + $0x48] sm:$0xff]  ;;  %vm3041_vm2 = vcmask 130048   ;;  %vm4462_vm3 = vcmask 523264   ;;  %vm4467_vm4 = vcmask 785408  }
  0x8d   : > { %v5104_v9 = vpack.c.bf16 %v331_v7, %v328_v6  ;;  %v334_v12 = vld [vmem:[#allocation5 + $0x68] sm:$0xff]  ;;  %5101 = vmatprep.subr.bf16.mxu0 %v5100_v4  ;;  %v337_v13 = vld [vmem:[#allocation5 + $0x80] sm:$0xff]  ;;  %v5106_v14 = vpack.c.bf16 %v330_v11, %v327_v10  ;;  %v336_v17 = vld [vmem:[#allocation5 + $0x78] sm:$0xff]  ;;  %s314_s18 = scalar_lea.vmem [#allocation10], %s4712_s15  ;;  %s4807_s7 = sshll.u32 %s5722_s25, 9 }
  0x8e   : > { %5103 = vmatpush1.bf16.msra.mxu0 %v5102_v8  ;;  %v5108_v15 = vpack.c.bf16 %v337_v13, %v334_v12  ;;  %v333_v16 = vld [vmem:[#allocation5 + $0x60] sm:$0xff]  ;;  %v340_v18 = vld [vmem:[#allocation5 + $0x98] sm:$0xff]  ;;  %v343_v19 = vld [vmem:[#allocation5 + $0xb0] sm:$0xff]  ;;  %s4599_s13 = sshll.u32 %s314_s18, 4  ;;  %s6743_s17 = scalar_lea.hbm %s6793_s6, %s4807_s7  ;;  %s6738_s13 = int_to_ptr.vmem [resolvable:$true] %s4599_s13 }
  0x8f   : > { %5105 = vmatprep.subr.bf16.mxu0 %v5104_v9  ;;  %v5110_v20 = vpack.c.bf16 %v336_v17, %v333_v16  ;;  %v5112_v21 = vpack.c.bf16 %v343_v19, %v340_v18  ;;  %v339_v22 = vld [vmem:[#allocation5 + $0x90] sm:$0xff]  ;;  %v342_v23 = vld [vmem:[#allocation5 + $0xa8] sm:$0xff]  ;;  %v349_v25 = vld [vmem:[#allocation5 + $0xe0] sm:$0xff]  ;;  %s4585_s15 = scalar_lea.sflag [#allocation4], %s5900_s16  ;;  %s5663_s25 = smov [#allocation10]  }
  0x90   : > { %v346_v24 = vld [vmem:[#allocation5 + $0xc8] sm:$0xff]  ;;  %v5922_v26 = vld [vmem:[%s5906_s1] sm:$0xff]  ;;  %v5114_v28 = vpack.c.bf16 %v342_v23, %v339_v22  ;;  %v323_v29 = vld [vmem:[#allocation5 + $0x10] sm:$0xff]  ;;  %s5577_s27 = sshll.u32 %s5663_s25, 4  ;;  %s5578_s27 = int_to_ptr.vmem [resolvable:$false] %s5577_s27 }
  0x91   : > { %v345_v27 = vld [vmem:[#allocation5 + $0xc0] sm:$0xff]  ;;  %4944 = vmatprep.mubr.f32.mxu1 %v5922_v26  ;;  %v326_v30 = vld [vmem:[#allocation5 + $0x28] sm:$0xff]  ;;  %v5116_v32 = vpack.c.bf16 %v349_v25, %v346_v24  ;;  %v348_v33 = vld [vmem:[#allocation5 + $0xd8] sm:$0xff]  ;;  %s5579_s29 = scalar_lea.vmem %s5578_s27, 1024  ;;  %p5580_p12 = scmp.lt.s32.totalorder %s6738_s13, %s5578_s27 }
  0x92   : > { %5107 = vmatpush1.bf16.msra.mxu0 %v5106_v14  ;;  %v329_v31 = vld [vmem:[#allocation5 + $0x40] sm:$0xff]  ;;  %v352_v34 = vld [vmem:[#allocation5 + $0xf8] sm:$0xff]  ;;  %v5132_v35 = vpack.c.bf16 %v326_v30, %v323_v29  ;;  %v355_v37 = vld [vmem:[#allocation5 + $0x110] sm:$0xff]  ;;  %v5118_v41 = vpack.c.bf16 %v348_v33, %v345_v27  ;;  %v371_v14 = vlaneseq }
  0x93   : > { %5109 = vmatprep.subr.bf16.mxu0 %v5108_v15  ;;  %v332_v36 = vld [vmem:[#allocation5 + $0x58] sm:$0xff]  ;;  %v335_v39 = vld [vmem:[#allocation5 + $0x70] sm:$0xff]  ;;  %v338_v40 = vld [vmem:[#allocation5 + $0x88] sm:$0xff]  ;;  %v5120_v42 = vpack.c.bf16 %v355_v37, %v352_v34 }
  0x94   : > { %v5136_v38 = vpack.c.bf16 %v332_v36, %v329_v31  ;;  %5133 = vmatprep.subr.bf16.mxu1 %v5132_v35  ;;  %v351_v43 = vld [vmem:[#allocation5 + $0xf0] sm:$0xff]  ;;  %v354_v44 = vld [vmem:[#allocation5 + $0x108] sm:$0xff]  ;;  %v5140_v46 = vpack.c.bf16 %v338_v40, %v335_v39  ;;  %v361_v47 = vld [vmem:[#allocation5 + $0x140] sm:$0xff]  ;;  %v5932_v15 = vshrl.u32 %v371_v14, 7 }
  0x95   : > { %5135 = vmatpush3.bf16.msra.mxu1 %v5132_v35  ;;  %v358_v45 = vld [vmem:[#allocation5 + $0x128] sm:$0xff]  ;;  %v341_v48 = vld [vmem:[#allocation5 + $0xa0] sm:$0xff]  ;;  %v344_v49 = vld [vmem:[#allocation5 + $0xb8] sm:$0xff]  ;;  %v5122_v50 = vpack.c.bf16 %v354_v44, %v351_v43 }
  0x96   : > { %5111 = vmatpush1.bf16.msra.mxu0 %v5110_v20  ;;  %5137 = vmatprep.subr.bf16.mxu1 %v5136_v38  ;;  %v5124_v51 = vpack.c.bf16 %v361_v47, %v358_v45  ;;  %v357_v52 = vld [vmem:[#allocation5 + $0x120] sm:$0xff]  ;;  %v360_v53 = vld [vmem:[#allocation5 + $0x138] sm:$0xff]  ;;  %v5144_v55 = vpack.c.bf16 %v344_v49, %v341_v48  ;;  %v367_v56 = vld [vmem:[#allocation5 + $0x170] sm:$0xff]  ;;  %v377_v16 = vsub.s32 1, %v5932_v15  ;;  %v373_v23 = vsub.s32 0, %v5932_v15 }
  0x97   : > { %5113 = vmatprep.subr.bf16.mxu0 %v5112_v21  ;;  %v364_v54 = vld [vmem:[#allocation5 + $0x158] sm:$0xff]  ;;  %v347_v57 = vld [vmem:[#allocation5 + $0xd0] sm:$0xff]  ;;  %v350_v58 = vld [vmem:[#allocation5 + $0xe8] sm:$0xff]  ;;  %v5126_v59 = vpack.c.bf16 %v360_v53, %v357_v52  ;;  %v381_v36 = vsub.s32 2, %v5932_v15  ;;  %v5662_v48 = vmov 1934713408  }
  0x98   : > { %v5128_v60 = vpack.c.bf16 %v367_v56, %v364_v54  ;;  %v363_v61 = vld [vmem:[#allocation5 + $0x150] sm:$0xff]  ;;  %v366_v62 = vld [vmem:[#allocation5 + $0x168] sm:$0xff]  ;;  %v5148_v63 = vpack.c.bf16 %v350_v58, %v347_v57  ;;  %v353_v1 = vld [vmem:[#allocation5 + $0x100] sm:$0xff]  ;;  %v635_v49 = vunpack.c.l.s4 %v5662_v48 }
  0x99   : > { %5139 = vmatpush3.bf16.msra.mxu1 %v5136_v38  ;;  %v356_v2 = vld [vmem:[#allocation5 + $0x118] sm:$0xff]  ;;  %v5130_v3 = vpack.c.bf16 %v366_v62, %v363_v61  ;;  %v359_v5 = vld [vmem:[#allocation5 + $0x130] sm:$0xff]  ;;  %v362_v6 = vld [vmem:[#allocation5 + $0x148] sm:$0xff] }
  0x9a   : > { %5115 = vmatpush1.bf16.msra.mxu0 %v5114_v28  ;;  %5141 = vmatprep.subr.bf16.mxu1 %v5140_v46  ;;  %v5152_v4 = vpack.c.bf16 %v356_v2, %v353_v1  ;;  %v5156_v7 = vpack.c.bf16 %v362_v6, %v359_v5  ;;  %v318_v8 = vld [vmem:[%s5906_s1 + $0x8] sm:$0xff]  ;;  %v319_v9 = vld [vmem:[%s5906_s1 + $0x10] sm:$0xff]  ;;  %v320_v10 = vld [vmem:[%s5906_s1 + $0x18] sm:$0xff]  ;;  %v636_v53 = vunpack.c.0.s8 %v635_v49  ;;  %s5573_s1 = scalar_lea.vmem %s6738_s13, 512 }
  0x9b   : > { %5117 = vmatprep.subr.bf16.mxu0 %v5116_v32  ;;  %v365_v11 = vld [vmem:[#allocation5 + $0x160] sm:$0xff]  ;;  %v368_v12 = vld [vmem:[#allocation5 + $0x178] sm:$0xff]  ;;  %vm6164_vm1 = vmpackc.low %vm2312_vm0, %vm2312_vm0  ;;  %p5574_p10 = scmp.ne.s32.totalorder %s6738_s13, %s5573_s1  ;;  %p5581_p2 = scmp.lt.s32.totalorder %s5579_s29, %s5573_s1 }
  0x9c   : > { %v5160_v13 = vpack.c.bf16 %v368_v12, %v365_v11  ;;  %v369_v17 = vld [vmem:[%s6789_s2] sm:$0x7]  ;;  %v6038_v61 = vsub.s32 %v636_v53, %v5932_v15 }
  0x9d   : > { %5143 = vmatpush3.bf16.msra.mxu1 %v5140_v46  ;;  %v374_v27 = vrot.slane %v369_v17, %v373_v23  ;;  %v382_v39 = vrot.slane %v369_v17, %v381_v36  ;;  %v5661_v46 = vmov 1983009808   ;;  %p5575_p3 = pnand %p5574_p10, %p5849_p5  ;;  %p5582_p1 = por %p5581_p2, %p5580_p12 }
  0x9e   : > { %5119 = vmatpush1.bf16.msra.mxu0 %v5118_v41  ;;  %5145 = vmatprep.subr.bf16.mxu1 %v5144_v55  ;;  %v603_v47 = vunpack.c.l.s4 %v5661_v46 }
  0x9f   : > { %5121 = vmatprep.subr.bf16.mxu0 %v5120_v42  ;;  %p5576_p7 = pneg %p5575_p3 }
  0xa1   : > { %5147 = vmatpush3.bf16.msra.mxu1 %v5144_v55  ;;  %p5583_p4 = pnand %p5582_p1, %p5576_p7 }
  0xa2   : > { %5123 = vmatpush1.bf16.msra.mxu0 %v5122_v50  ;;  %5149 = vmatprep.subr.bf16.mxu1 %v5148_v63  ;;  %v604_v50 = vunpack.c.0.s8 %v603_v47 }
  0xa3   : > { %5125 = vmatprep.subr.bf16.mxu0 %v5124_v51 }
  0xa4   : > { %v6033_v54 = vsub.s32 %v604_v50, %v5932_v15 }
  0xa5   : > { %5151 = vmatpush3.bf16.msra.mxu1 %v5148_v63 }
  0xa6   : > { %5127 = vmatpush1.bf16.msra.mxu0 %v5126_v59  ;;  %5153 = vmatprep.subr.bf16.mxu1 %v5152_v4 }
  0xa7   : > { %5129 = vmatprep.subr.bf16.mxu0 %v5128_v60 }
  0xa9   : > { %5155 = vmatpush3.bf16.msra.mxu1 %v5152_v4 }
  0xaa   : > { %5131 = vmatpush1.bf16.msra.mxu0 %v5130_v3  ;;  %5157 = vmatprep.subr.bf16.mxu1 %v5156_v7 }
  0xad   : > { %451 = vmatmul.mubr.f32.vlgmr.msra.gmra.mrb[0].mxu0 %v5922_v26  ;;  %5159 = vmatpush3.bf16.msra.mxu1 %v5156_v7 }
  0xae   : > { %456 = vmatprep.mubr.f32.mxu0 %v5657_v0  ;;  %5161 = vmatprep.subr.bf16.mxu1 %v5160_v13 }
  0xb1   : > { %457 = vmatmul.mubr.f32.gmra.mrb[2].mxu0 %v318_v8  ;;  %5163 = vmatpush3.bf16.msra.mxu1 %v5160_v13 }
  0xb2   : > { %462 = vmatprep.mubr.f32.mxu0 %v5657_v0 }
  0xb4   : > { %4945 = vmatmul.mubr.f32.vlgmr.msra.gmra.mrb[0].mxu1 %v318_v8 }
  0xb5   : > { %463 = vmatmul.mubr.f32.gmra.mrb[4].mxu0 %v319_v9  ;;  %4947 = vmatprep.mubr.f32.mxu1 %v319_v9 }
  0xb6   : > { %468 = vmatprep.mubr.f32.mxu0 %v5657_v0  ;;  %v378_v0 = vrot.slane %v369_v17, %v377_v16 }
  0xb8   : > { %4948 = vmatmul.mubr.f32.gmra.mrb[2].mxu1 %v320_v10 }
  0xb9   : > { %469 = vmatmul.mubr.f32.gmra.mrb[6].mxu0 %v320_v10 }
 0x180   : > { %v452_v18 = vpop.f32.mrb[0].mxu0 }
 0x181   : > { %v454_v19 = vpop.f32.mrb[1].mxu0  ;;  %v5955_v30 = vadd.f32 %v452_v18, %v374_v27 }
 0x182   : > { %v5938_v20 = vadd.f32 %v454_v19, %v378_v0 }
 0x184   : > { %v458_v21 = vpop.f32.mrb[2].mxu0  ;;  %1160 = vrot.lane.b32.xlu1 %v5938_v20, %s5658_s19  ;;  %1148 = vrot.lane.b32.xlu0 %v5938_v20, %s5659_s20 }
 0x185   : > { %v460_v22 = vpop.f32.mrb[3].mxu0  ;;  %v5961_v31 = vadd.f32 %v458_v21, %v374_v27 }
 0x186   : > { %v5945_v24 = vadd.f32 %v460_v22, %v378_v0 }
 0x187   : > { %v4946_v37 = vpop.f32.mrb[0].mxu1 }
 0x188   : > { %1162 = vrot.lane.b32.xlu1 %v5945_v24, %s5658_s19  ;;  %1172 = vrot.lane.b32.xlu0 %v5938_v20, %s5660_s11  ;;  %v464_v25 = vpop.f32.mrb[4].mxu0  ;;  %v541_v38 = vpop.f32.mrb[1].mxu1  ;;  %v6004_v42 = vadd.f32 %v4946_v37, %v382_v39 }
 0x189   : > { %v466_v26 = vpop.f32.mrb[5].mxu0  ;;  %v5987_v34 = vadd.f32 %v464_v25, %v374_v27  ;;  %v6006_v43 = vadd.f32 %v541_v38, %v382_v39 }
 0x18a   : > { %v5973_v33 = vadd.f32 %v466_v26, %v378_v0 }
 0x18b   : > { %v4949_v40 = vpop.f32.mrb[2].mxu1 }
 0x18c   : > { %1174 = vrot.lane.b32.xlu1 %v5945_v24, %s5660_s11  ;;  %1150 = vrot.lane.b32.xlu0 %v5945_v24, %s5659_s20  ;;  %v470_v28 = vpop.f32.mrb[6].mxu0  ;;  %v551_v41 = vpop.f32.mrb[3].mxu1  ;;  %v6016_v44 = vadd.f32 %v4949_v40, %v382_v39 }
 0x18d   : > { %v472_v29 = vpop.f32.mrb[7].mxu0  ;;  %v5993_v35 = vadd.f32 %v470_v28, %v374_v27  ;;  %v6024_v45 = vadd.f32 %v551_v41, %v382_v39 }
 0x18e   : > { %v5967_v32 = vadd.f32 %v472_v29, %v378_v0 }
 0x190   : > { %576 = vrot.lane.b32.xlu1 %v5955_v30, %s5658_s19  ;;  %564 = vrot.lane.b32.xlu0 %v5955_v30, %s5659_s20 }
 0x194   : > { %566 = vrot.lane.b32.xlu1 %v5961_v31, %s5659_s20  ;;  %588 = vrot.lane.b32.xlu0 %v5955_v30, %s5660_s11 }
 0x198   : > { %590 = vrot.lane.b32.xlu1 %v5961_v31, %s5660_s11  ;;  %578 = vrot.lane.b32.xlu0 %v5961_v31, %s5658_s19 }
 0x19c   : > { %1154 = vrot.lane.b32.xlu1 %v5967_v32, %s5659_s20  ;;  %1152 = vrot.lane.b32.xlu0 %v5973_v33, %s5659_s20 }
 0x1a0   : > { %1166 = vrot.lane.b32.xlu1 %v5967_v32, %s5658_s19  ;;  %1164 = vrot.lane.b32.xlu0 %v5973_v33, %s5658_s19 }
 0x1a4   : > { %1178 = vrot.lane.b32.xlu1 %v5967_v32, %s5660_s11  ;;  %1176 = vrot.lane.b32.xlu0 %v5973_v33, %s5660_s11 }
 0x1a8   : > { %580 = vrot.lane.b32.xlu1 %v5987_v34, %s5658_s19  ;;  %568 = vrot.lane.b32.xlu0 %v5987_v34, %s5659_s20 }
 0x1ac   : > { %570 = vrot.lane.b32.xlu1 %v5993_v35, %s5659_s20  ;;  %592 = vrot.lane.b32.xlu0 %v5987_v34, %s5660_s11 }
 0x1b0   : > { %594 = vrot.lane.b32.xlu1 %v5993_v35, %s5660_s11  ;;  %582 = vrot.lane.b32.xlu0 %v5993_v35, %s5658_s19 }
 0x1b4   : > { %1732 = vrot.lane.b32.xlu1 %v6006_v43, %s5659_s20  ;;  %1734 = vrot.lane.b32.xlu0 %v6004_v42, %s5659_s20 }
 0x1b8   : > { %1744 = vrot.lane.b32.xlu1 %v6006_v43, %s5658_s19  ;;  %1756 = vrot.lane.b32.xlu0 %v6006_v43, %s5660_s11 }
 0x1bc   : > { %1746 = vrot.lane.b32.xlu1 %v6004_v42, %s5658_s19  ;;  %1738 = vrot.lane.b32.xlu0 %v6016_v44, %s5659_s20 }
 0x1c0   : > { %1758 = vrot.lane.b32.xlu1 %v6004_v42, %s5660_s11 }
 0x1c4   : > { %1736 = vrot.lane.b32.xlu1 %v6024_v45, %s5659_s20 }
 0x1c8   : > { %1748 = vrot.lane.b32.xlu1 %v6024_v45, %s5658_s19 }
 0x1cc   : > { %1750 = vrot.lane.b32.xlu1 %v6016_v44, %s5658_s19 }
 0x1f6   : > { %v1161_v51 = vpop.permute.xlu1 %1160  ;;  %v1149_v52 = vpop.permute.xlu0 %1148 }
 0x1f7   : > { %v1184_v55 = vcombine.low %v5938_v20, %v1161_v51  ;;  %v1185_v56 = vcombine.high %v5938_v20, %v1161_v51 }
 0x1f9   : > { %v1192_v62 = vrot.slane %v1184_v55, %v6033_v54  ;;  %v1199_v63 = vrot.slane %v1185_v56, %v6033_v54 }
 0x1fa   : > { %v1163_v57 = vpop.permute.xlu1 %1162  ;;  %v1173_v58 = vpop.permute.xlu0 %1172 }
 0x1fb   : > { %v1200_v59 = vcombine.low %v1149_v52, %v1173_v58  ;;  %v1201_v60 = vcombine.high %v1149_v52, %v1173_v58  ;;  %v1252_v3 = vcombine.low %v5945_v24, %v1163_v57  ;;  %v1253_v4 = vcombine.high %v5945_v24, %v1163_v57 }
 0x1fd   : > { %v1208_v1 = vrot.slane %v1200_v59, %v6033_v54  ;;  %v1215_v2 = vrot.slane %v1201_v60, %v6033_v54  ;;  %v1260_v17 = vrot.slane %v1252_v3, %v6033_v54  ;;  %v1267_v0 = vrot.slane %v1253_v4, %v6033_v54 }
 0x1fe   : > { %v1175_v5 = vpop.permute.xlu1 %1174  ;;  %v1151_v6 = vpop.permute.xlu0 %1150 }
 0x1ff   : > { %v1216_v7 = vcombine.low %v1192_v62, %v1208_v1  ;;  %v1217_v8 = vcombine.high %v1192_v62, %v1208_v1  ;;  %v1232_v9 = vcombine.low %v1199_v63, %v1215_v2  ;;  %v1233_v10 = vcombine.high %v1199_v63, %v1215_v2 }
 0x200   : > { %v1268_v11 = vcombine.low %v1151_v6, %v1175_v5  ;;  %v1269_v12 = vcombine.high %v1151_v6, %v1175_v5 }
 0x201   : > { %v1224_v13 = vrot.slane %v1216_v7, %v6038_v61  ;;  %v1231_v14 = vrot.slane %v1217_v8, %v6038_v61  ;;  %v1240_v15 = vrot.slane %v1232_v9, %v6038_v61  ;;  %v1247_v16 = vrot.slane %v1233_v10, %v6038_v61 }
 0x202   : > { %v1276_v18 = vrot.slane %v1268_v11, %v6033_v54  ;;  %v1283_v19 = vrot.slane %v1269_v12, %v6033_v54  ;;  %v577_v20 = vpop.permute.xlu1 %576  ;;  %v565_v21 = vpop.permute.xlu0 %564 }
 0x203   : > { %v1456_v22 = vcombine.low %v1224_v13, %v1231_v14  ;;  %v4725_v23 = vcombine.high %v1224_v13, %v1231_v14  ;;  %v1472_v24 = vcombine.low %v1240_v15, %v1247_v16  ;;  %v4726_v25 = vcombine.high %v1240_v15, %v1247_v16 }
 0x204   : > { %v1284_v26 = vcombine.low %v1260_v17, %v1276_v18  ;;  %v1285_v27 = vcombine.high %v1260_v17, %v1276_v18  ;;  %v1300_v28 = vcombine.low %v1267_v0, %v1283_v19  ;;  %v1301_v29 = vcombine.high %v1267_v0, %v1283_v19 }
 0x205   : > { %v6055_v36 = vrot.slane %v1456_v22, %v6033_v54  ;;  %v6058_v37 = vrot.slane %v4725_v23, %v6033_v54  ;;  %v600_v48 = vcombine.low %v5955_v30, %v577_v20  ;;  %v601_v49 = vcombine.high %v5955_v30, %v577_v20 }
 0x206   : > { %v1292_v38 = vrot.slane %v1284_v26, %v6038_v61  ;;  %v1299_v39 = vrot.slane %v1285_v27, %v6038_v61  ;;  %v1308_v40 = vrot.slane %v1300_v28, %v6038_v61  ;;  %v1315_v41 = vrot.slane %v1301_v29, %v6038_v61  ;;  %v567_v46 = vpop.permute.xlu1 %566  ;;  %v589_v47 = vpop.permute.xlu0 %588 }
 0x207   : > { %v616_v50 = vcombine.low %v565_v21, %v589_v47  ;;  %v617_v51 = vcombine.high %v565_v21, %v589_v47  ;;  %v6067_v52 = vrot.slane %v1472_v24, %v6033_v54  ;;  %v6070_v53 = vrot.slane %v4726_v25, %v6033_v54 }
 0x208   : > { %v1524_v55 = vcombine.low %v1292_v38, %v1299_v39  ;;  %v4727_v56 = vcombine.high %v1292_v38, %v1299_v39  ;;  %v608_v57 = vrot.slane %v600_v48, %v6033_v54  ;;  %v615_v58 = vrot.slane %v601_v49, %v6033_v54 }
 0x209   : > { %v624_v59 = vrot.slane %v616_v50, %v6033_v54  ;;  %v631_v60 = vrot.slane %v617_v51, %v6033_v54  ;;  %v1540_v63 = vcombine.low %v1308_v40, %v1315_v41  ;;  %v4728_v1 = vcombine.high %v1308_v40, %v1315_v41 }
 0x20a   : > { %v6077_v30 = vrot.slane %v1524_v55, %v6033_v54  ;;  %v6080_v62 = vrot.slane %v4727_v56, %v6033_v54  ;;  %v591_v2 = vpop.permute.xlu1 %590  ;;  %v579_v3 = vpop.permute.xlu0 %578 }
 0x20b   : > { %v632_v4 = vcombine.low %v608_v57, %v624_v59  ;;  %v633_v5 = vcombine.high %v608_v57, %v624_v59  ;;  %v648_v6 = vcombine.low %v615_v58, %v631_v60  ;;  %v649_v7 = vcombine.high %v615_v58, %v631_v60 }
 0x20c   : > { %v684_v8 = vcombine.low %v567_v46, %v591_v2  ;;  %v685_v9 = vcombine.high %v567_v46, %v591_v2  ;;  %v668_v10 = vcombine.low %v5961_v31, %v579_v3  ;;  %v669_v11 = vcombine.high %v5961_v31, %v579_v3 }
 0x20d   : > { %v640_v12 = vrot.slane %v632_v4, %v6038_v61  ;;  %v647_v13 = vrot.slane %v633_v5, %v6038_v61  ;;  %v656_v14 = vrot.slane %v648_v6, %v6038_v61  ;;  %v663_v15 = vrot.slane %v649_v7, %v6038_v61 }
 0x20e   : > { %v692_v16 = vrot.slane %v684_v8, %v6033_v54  ;;  %v699_v17 = vrot.slane %v685_v9, %v6033_v54  ;;  %v676_v0 = vrot.slane %v668_v10, %v6033_v54  ;;  %v683_v18 = vrot.slane %v669_v11, %v6033_v54  ;;  %v6092_v19 = vpop.permute.xlu1 %1154  ;;  %v6094_v20 = vpop.permute.xlu0 %1152 }
 0x20f   : > { %v6097_v31 = vrot.slane %v1540_v63, %v6033_v54  ;;  %v6100_v21 = vrot.slane %v4728_v1, %v6033_v54  ;;  %v872_v22 = vcombine.low %v640_v12, %v647_v13  ;;  %v4717_v23 = vcombine.high %v640_v12, %v647_v13 }
 0x210   : > { %v700_v24 = vcombine.low %v676_v0, %v692_v16  ;;  %v701_v25 = vcombine.high %v676_v0, %v692_v16  ;;  %v716_v26 = vcombine.low %v683_v18, %v699_v17  ;;  %v717_v27 = vcombine.high %v683_v18, %v699_v17 }
 0x211   : > { %v6103_v28 = vrot.slane %v872_v22, %v6033_v54  ;;  %v6106_v29 = vrot.slane %v4717_v23, %v6033_v54  ;;  %v888_v38 = vcombine.low %v656_v14, %v663_v15  ;;  %v4718_v39 = vcombine.high %v656_v14, %v663_v15 }
 0x212   : > { %v708_v40 = vrot.slane %v700_v24, %v6038_v61  ;;  %v715_v41 = vrot.slane %v701_v25, %v6038_v61  ;;  %v724_v46 = vrot.slane %v716_v26, %v6038_v61  ;;  %v731_v47 = vrot.slane %v717_v27, %v6038_v61  ;;  %v1167_v48 = vpop.permute.xlu1 %1166  ;;  %v1165_v49 = vpop.permute.xlu0 %1164 }
 0x213   : > { %v1388_v50 = vcombine.low %v5967_v32, %v1167_v48  ;;  %v1389_v51 = vcombine.high %v5967_v32, %v1167_v48  ;;  %v1320_v55 = vcombine.low %v5973_v33, %v1165_v49  ;;  %v1321_v56 = vcombine.high %v5973_v33, %v1165_v49 }
 0x214   : > { %v940_v57 = vcombine.low %v708_v40, %v715_v41  ;;  %v4719_v58 = vcombine.high %v708_v40, %v715_v41  ;;  %v956_v59 = vcombine.low %v724_v46, %v731_v47  ;;  %v4720_v60 = vcombine.high %v724_v46, %v731_v47 }
 0x215   : > { %v6117_v63 = vrot.slane %v888_v38, %v6033_v54  ;;  %v6120_v1 = vrot.slane %v4718_v39, %v6033_v54  ;;  %v1396_v2 = vrot.slane %v1388_v50, %v6033_v54  ;;  %v1403_v3 = vrot.slane %v1389_v51, %v6033_v54 }
 0x216   : > { %v6125_v32 = vrot.slane %v940_v57, %v6033_v54  ;;  %v6128_v4 = vrot.slane %v4719_v58, %v6033_v54  ;;  %v6131_v33 = vrot.slane %v956_v59, %v6033_v54  ;;  %v6134_v5 = vrot.slane %v4720_v60, %v6033_v54  ;;  %v1179_v6 = vpop.permute.xlu1 %1178  ;;  %v1177_v11 = vpop.permute.xlu0 %1176 }
 0x217   : > { %v1488_v7 = vcombine.low %v6055_v36, %v6058_v37  ;;  %v1504_v8 = vcombine.low %v6067_v52, %v6070_v53  ;;  %v1556_v9 = vcombine.low %v6077_v30, %v6080_v62  ;;  %v1572_v10 = vcombine.low %v6097_v31, %v6100_v21 }
 0x218   : > { %v972_v12 = vcombine.low %v6125_v32, %v6128_v4  ;;  %v988_v13 = vcombine.low %v6131_v33, %v6134_v5  ;;  %v1328_v14 = vrot.slane %v1320_v55, %v6033_v54  ;;  %v1335_v15 = vrot.slane %v1321_v56, %v6033_v54 }
 0x219   : > { %v1496_v16 = vrot.slane %v1488_v7, %v6038_v61  ;;  %v1512_v17 = vrot.slane %v1504_v8, %v6038_v61  ;;  %v1564_v0 = vrot.slane %v1556_v9, %v6038_v61  ;;  %v1580_v18 = vrot.slane %v1572_v10, %v6038_v61 }
 0x21a   : > { %v6155_v22 = vrot.slane %v972_v12, %v6038_v61  ;;  %v6158_v23 = vrot.slane %v988_v13, %v6038_v61  ;;  %v1404_v24 = vcombine.low %v6092_v19, %v1179_v6  ;;  %v1405_v25 = vcombine.high %v6092_v19, %v1179_v6  ;;  %v581_v40 = vpop.permute.xlu1 %580  ;;  %v6176_v56 = vpop.permute.xlu0 %568 }
 0x21b   : > { %v1520_v26 = vcombine.low %v1496_v16, %v1512_v17  ;;  %v1588_v27 = vcombine.low %v1564_v0, %v1580_v18  ;;  %v1521_v38 = vcombine.high %v1496_v16, %v1512_v17  ;;  %v1589_v39 = vcombine.high %v1564_v0, %v1580_v18 }
 0x21c   : > { %v1412_v46 = vrot.slane %v1404_v24, %v6033_v54  ;;  %v1419_v47 = vrot.slane %v1405_v25, %v6033_v54  ;;  %v1336_v48 = vcombine.low %v6094_v20, %v1177_v11  ;;  %v1337_v49 = vcombine.high %v6094_v20, %v1177_v11 }
 0x21d   : > { %v5164_v19 = vpack.c.bf16 %v1588_v27, %v1520_v26  ;;  %v5170_v50 = vpack.c.bf16 %v1589_v39, %v1521_v38  ;;  %v904_v51 = vcombine.low %v6103_v28, %v6106_v29  ;;  %v920_v55 = vcombine.low %v6117_v63, %v6120_v1 }
 0x21e   : > { %v1420_v57 = vcombine.low %v1396_v2, %v1412_v46  ;;  %v1421_v58 = vcombine.high %v1396_v2, %v1412_v46  ;;  %v1436_v59 = vcombine.low %v1403_v3, %v1419_v47  ;;  %v1437_v60 = vcombine.high %v1403_v3, %v1419_v47  ;;  %v571_v17 = vpop.permute.xlu1 %570  ;;  %v593_v46 = vpop.permute.xlu0 %592 }
 0x21f   : > { %5166 = vmatprep.subr.msk.bf16.mxu1 %vm6164_vm1, %v5164_v19  ;;  %v1344_v6 = vrot.slane %v1336_v48, %v6033_v54  ;;  %v1351_v20 = vrot.slane %v1337_v49, %v6033_v54  ;;  %v912_v7 = vrot.slane %v904_v51, %v6038_v61  ;;  %v928_v8 = vrot.slane %v920_v55, %v6038_v61 }
 0x220   : > { %5169 = vmatpush3.bf16.xpose.msk.msra.mxu1 %vm6164_vm1, %v5164_v19  ;;  %v1428_v9 = vrot.slane %v1420_v57, %v6038_v61  ;;  %v1435_v2 = vrot.slane %v1421_v58, %v6038_v61  ;;  %v1444_v3 = vrot.slane %v1436_v59, %v6038_v61  ;;  %v1451_v10 = vrot.slane %v1437_v60, %v6038_v61 }
 0x221   : > { %5172 = vmatprep.subr.msk.bf16.mxu1 %vm6164_vm1, %v5170_v50  ;;  %v1352_v11 = vcombine.low %v1328_v14, %v1344_v6  ;;  %v1353_v12 = vcombine.high %v1328_v14, %v1344_v6  ;;  %v1368_v13 = vcombine.low %v1335_v15, %v1351_v20  ;;  %v1369_v16 = vcombine.high %v1335_v15, %v1351_v20 }
 0x222   : > { %v1660_v0 = vcombine.low %v1428_v9, %v1435_v2  ;;  %v4731_v18 = vcombine.high %v1428_v9, %v1435_v2  ;;  %v1676_v24 = vcombine.low %v1444_v3, %v1451_v10  ;;  %v4732_v25 = vcombine.high %v1444_v3, %v1451_v10  ;;  %v595_v9 = vpop.permute.xlu1 %594 }
 0x223   : > { %v1360_v26 = vrot.slane %v1352_v11, %v6038_v61  ;;  %v1367_v27 = vrot.slane %v1353_v12, %v6038_v61  ;;  %v6195_v38 = vrot.slane %v1368_v13, %v6038_v61  ;;  %v6198_v39 = vrot.slane %v1369_v16, %v6038_v61  ;;  %v583_v16 = vpop.permute.xlu0 %582 }
 0x224   : > { %v973_v14 = vcombine.high %v6125_v32, %v6128_v4  ;;  %v989_v15 = vcombine.high %v6131_v33, %v6134_v5  ;;  %v6205_v47 = vrot.slane %v1660_v0, %v6033_v54  ;;  %v6208_v48 = vrot.slane %v4731_v18, %v6033_v54 }
 0x225   : > { %v6211_v49 = vrot.slane %v1676_v24, %v6033_v54  ;;  %v6214_v19 = vrot.slane %v4732_v25, %v6033_v54  ;;  %v936_v51 = vcombine.low %v912_v7, %v928_v8  ;;  %v736_v55 = vcombine.low %v5987_v34, %v581_v40 }
 0x226   : > { %v737_v57 = vcombine.high %v5987_v34, %v581_v40  ;;  %v1004_v58 = vcombine.low %v6155_v22, %v6158_v23  ;;  %v1592_v59 = vcombine.low %v1360_v26, %v1367_v27  ;;  %v4729_v60 = vcombine.high %v1360_v26, %v1367_v27 }
 0x227   : > { %v1608_v6 = vcombine.low %v6195_v38, %v6198_v39  ;;  %v4730_v20 = vcombine.high %v6195_v38, %v6198_v39  ;;  %4954 = vmatprep.mubr.msk.f32.mxu1 %vm2312_vm0, %v936_v51  ;;  %v744_v2 = vrot.slane %v736_v55, %v6033_v54  ;;  %v937_v10 = vcombine.high %v912_v7, %v928_v8 }
 0x228   : > { %v751_v3 = vrot.slane %v737_v57, %v6033_v54  ;;  %v1489_v34 = vcombine.high %v6055_v36, %v6058_v37  ;;  %4955 = vmatmul.mubr.msk.f32.vlgmr.msra.gmra.mrb[4].mxu1 %vm2312_vm0, %v1004_v58  ;;  %v1505_v40 = vcombine.high %v6067_v52, %v6070_v53  ;;  %v1557_v11 = vcombine.high %v6077_v30, %v6080_v62 }
 0x229   : > { %v1573_v12 = vcombine.high %v6097_v31, %v6100_v21  ;;  %v752_v13 = vcombine.low %v6176_v56, %v593_v46  ;;  %5175 = vmatpush3.bf16.xpose.msk.msra.mxu1 %vm6164_vm1, %v5170_v50  ;;  %4961 = vmatprep.mubr.msk.f32.mxu1 %vm2312_vm0, %v937_v10  ;;  %v753_v37 = vcombine.high %v6176_v56, %v593_v46 }
 0x22a   : > { %v1503_v36 = vrot.slane %v1489_v34, %v6038_v61  ;;  %v820_v7 = vcombine.low %v571_v17, %v595_v9  ;;  %v1519_v52 = vrot.slane %v1505_v40, %v6038_v61  ;;  %v1571_v53 = vrot.slane %v1557_v11, %v6038_v61 }
 0x22b   : > { %v1587_v30 = vrot.slane %v1573_v12, %v6038_v61  ;;  %v760_v62 = vrot.slane %v752_v13, %v6033_v54  ;;  %v767_v31 = vrot.slane %v753_v37, %v6033_v54  ;;  %v821_v21 = vcombine.high %v571_v17, %v595_v9 }
 0x22c   : > { %v828_v50 = vrot.slane %v820_v7, %v6033_v54  ;;  %v804_v8 = vcombine.low %v5993_v35, %v583_v16  ;;  %v1522_v0 = vcombine.low %v1503_v36, %v1519_v52  ;;  %v805_v38 = vcombine.high %v5993_v35, %v583_v16 }
 0x22d   : > { %v1590_v18 = vcombine.low %v1571_v53, %v1587_v30  ;;  %v768_v24 = vcombine.low %v744_v2, %v760_v62  ;;  %v769_v56 = vcombine.high %v744_v2, %v760_v62  ;;  %v784_v25 = vcombine.low %v751_v3, %v767_v31 }
 0x22e   : > { %v785_v26 = vcombine.high %v751_v3, %v767_v31  ;;  %v835_v27 = vrot.slane %v821_v21, %v6033_v54  ;;  %v812_v17 = vrot.slane %v804_v8, %v6033_v54  ;;  %v819_v58 = vrot.slane %v805_v38, %v6033_v54 }
 0x22f   : > { %v5176_v39 = vpack.c.bf16 %v1590_v18, %v1522_v0  ;;  %v776_v46 = vrot.slane %v768_v24, %v6038_v61  ;;  %v783_v51 = vrot.slane %v769_v56, %v6038_v61  ;;  %v792_v55 = vrot.slane %v784_v25, %v6038_v61 }
 0x230   : > { %v799_v57 = vrot.slane %v785_v26, %v6038_v61  ;;  %v1005_v9 = vcombine.high %v6155_v22, %v6158_v23  ;;  %v6260_v2 = vrot.slane %v1592_v59, %v6033_v54  ;;  %v1607_v35 = vrot.slane %v4729_v60, %v6033_v54 }
 0x231   : > { %5178 = vmatprep.subr.msk.bf16.mxu1 %vm6164_vm1, %v5176_v39  ;;  %v836_v3 = vcombine.low %v812_v17, %v828_v50  ;;  %v837_v10 = vcombine.high %v812_v17, %v828_v50  ;;  %v1615_v34 = vrot.slane %v1608_v6, %v6033_v54  ;;  %v1623_v40 = vrot.slane %v4730_v20, %v6033_v54 }
 0x232   : > { %v852_v11 = vcombine.low %v819_v58, %v835_v27  ;;  %v853_v12 = vcombine.high %v819_v58, %v835_v27  ;;  %4962 = vmatmul.mubr.msk.f32.vlgmr.msra.gmra.mrb[6].mxu1 %vm2312_vm0, %v1005_v9  ;;  %v1008_v13 = vcombine.low %v776_v46, %v783_v51  ;;  %v4721_v22 = vcombine.high %v776_v46, %v783_v51 }
 0x233   : > { %v844_v23 = vrot.slane %v836_v3, %v6038_v61  ;;  %v851_v59 = vrot.slane %v837_v10, %v6038_v61  ;;  %5181 = vmatpush3.bf16.xpose.msk.msra.mxu1 %vm6164_vm1, %v5176_v39  ;;  %v1024_v60 = vcombine.low %v792_v55, %v799_v57  ;;  %v4722_v16 = vcombine.high %v792_v55, %v799_v57 }
 0x234   : > { %v860_v37 = vrot.slane %v852_v11, %v6038_v61  ;;  %v867_v6 = vrot.slane %v853_v12, %v6038_v61  ;;  %v905_v62 = vcombine.high %v6103_v28, %v6106_v29  ;;  %v921_v31 = vcombine.high %v6117_v63, %v6120_v1 }
 0x235   : > { %v1076_v20 = vcombine.low %v844_v23, %v851_v59  ;;  %v4723_v7 = vcombine.high %v844_v23, %v851_v59  ;;  %v1523_v8 = vcombine.high %v1503_v36, %v1519_v52  ;;  %v1591_v0 = vcombine.high %v1571_v53, %v1587_v30 }
 0x236   : > { %v1092_v21 = vcombine.low %v860_v37, %v867_v6  ;;  %v4724_v50 = vcombine.high %v860_v37, %v867_v6  ;;  %v919_v56 = vrot.slane %v905_v62, %v6038_v61  ;;  %v935_v25 = vrot.slane %v921_v31, %v6038_v61 }
 0x237   : > { %v6279_v18 = vrot.slane %v1076_v20, %v6033_v54  ;;  %v6282_v24 = vrot.slane %v4723_v7, %v6033_v54  ;;  %v5182_v29 = vpack.c.bf16 %v1591_v0, %v1523_v8  ;;  %v1624_v63 = vcombine.low %v6260_v2, %v1607_v35 }
 0x238   : > { %v6287_v26 = vrot.slane %v1092_v21, %v6033_v54  ;;  %v6290_v28 = vrot.slane %v4724_v50, %v6033_v54  ;;  %v1015_v1 = vrot.slane %v1008_v13, %v6033_v54  ;;  %v1023_v36 = vrot.slane %v4721_v22, %v6033_v54 }
 0x239   : > { %v938_v52 = vcombine.low %v919_v56, %v935_v25  ;;  %v1640_v53 = vcombine.low %v1615_v34, %v1623_v40  ;;  %v1031_v30 = vrot.slane %v1024_v60, %v6033_v54  ;;  %v1039_v27 = vrot.slane %v4722_v16, %v6033_v54  ;;  %5184 = vmatprep.subr.msk.bf16.mxu1 %vm6164_vm1, %v5182_v29 }
 0x23a   : > { %v1632_v38 = vrot.slane %v1624_v63, %v6038_v61  ;;  %v1692_v39 = vcombine.low %v6205_v47, %v6208_v48  ;;  %v1108_v46 = vcombine.low %v6279_v18, %v6282_v24  ;;  %v1708_v17 = vcombine.low %v6211_v49, %v6214_v19 }
 0x23b   : > { %4968 = vmatprep.mubr.msk.f32.mxu1 %vm2312_vm0, %v938_v52  ;;  %v1648_v51 = vrot.slane %v1640_v53, %v6038_v61  ;;  %v987_v55 = vrot.slane %v973_v14, %v6038_v61  ;;  %v1124_v57 = vcombine.low %v6287_v26, %v6290_v28  ;;  %v1003_v9 = vrot.slane %v989_v15, %v6038_v61  ;;  %v1733_v52 = vpop.permute.xlu1 %1732  ;;  %v1735_v53 = vpop.permute.xlu0 %1734 }
 0x23c   : > { %v1700_v58 = vrot.slane %v1692_v39, %v6038_v61  ;;  %v939_v3 = vcombine.high %v919_v56, %v935_v25  ;;  %v1716_v11 = vrot.slane %v1708_v17, %v6038_v61  ;;  %v1625_v12 = vcombine.high %v6260_v2, %v1607_v35 }
 0x23d   : > { %v1657_v10 = vcombine.high %v1632_v38, %v1648_v51  ;;  %v1641_v13 = vcombine.high %v1615_v34, %v1623_v40  ;;  %v1006_v22 = vcombine.low %v987_v55, %v1003_v9  ;;  %v1693_v32 = vcombine.high %v6205_v47, %v6208_v48 }
 0x23e   : > { %v1709_v4 = vcombine.high %v6211_v49, %v6214_v19  ;;  %v1656_v14 = vcombine.low %v1632_v38, %v1648_v51  ;;  %v1725_v23 = vcombine.high %v1700_v58, %v1716_v11  ;;  %v1639_v59 = vrot.slane %v1625_v12, %v6038_v61 }
 0x23f   : > { %v1655_v33 = vrot.slane %v1641_v13, %v6038_v61  ;;  %v1724_v5 = vcombine.low %v1700_v58, %v1716_v11  ;;  %4969 = vmatmul.mubr.msk.f32.vlgmr.msra.gmra.mrb[8].mxu1 %vm2312_vm0, %v1006_v22  ;;  %v1707_v15 = vrot.slane %v1693_v32, %v6038_v61  ;;  %v1040_v35 = vcombine.low %v1015_v1, %v1023_v36  ;;  %v1757_v38 = vpop.permute.xlu0 %1756 }
 0x240   : > { %v1723_v2 = vrot.slane %v1709_v4, %v6038_v61  ;;  %v1056_v34 = vcombine.low %v1031_v30, %v1039_v27  ;;  %v5194_v40 = vpack.c.bf16 %v1725_v23, %v1657_v10  ;;  %5187 = vmatpush3.bf16.xpose.msk.msra.mxu1 %vm6164_vm1, %v5182_v29  ;;  %4975 = vmatprep.mubr.msk.f32.mxu1 %vm2312_vm0, %v939_v3 }
 0x241   : > { %v1659_v47 = vcombine.high %v1639_v59, %v1655_v33  ;;  %v5188_v48 = vpack.c.bf16 %v1724_v5, %v1656_v14  ;;  %v1048_v19 = vrot.slane %v1040_v35, %v6038_v61  ;;  %v1116_v16 = vrot.slane %v1108_v46, %v6038_v61 }
 0x242   : > { %v1727_v49 = vcombine.high %v1707_v15, %v1723_v2  ;;  %v1064_v60 = vrot.slane %v1056_v34, %v6038_v61  ;;  %v1132_v37 = vrot.slane %v1124_v57, %v6038_v61  ;;  %5196 = vmatprep.subr.msk.bf16.mxu0 %vm6164_vm1, %v5194_v40  ;;  %v1658_v6 = vcombine.low %v1639_v59, %v1655_v33 }
 0x243   : > { %5190 = vmatprep.subr.msk.bf16.mxu1 %vm6164_vm1, %v5188_v48  ;;  %5199 = vmatpush3.bf16.xpose.msk.msra.mxu0 %vm6164_vm1, %v5194_v40  ;;  %v1726_v62 = vcombine.low %v1707_v15, %v1723_v2  ;;  %v1041_v31 = vcombine.high %v1015_v1, %v1023_v36  ;;  %v1057_v21 = vcombine.high %v1031_v30, %v1039_v27  ;;  %v1745_v27 = vpop.permute.xlu1 %1744 }
 0x244   : > { %v5206_v20 = vpack.c.bf16 %v1727_v49, %v1659_v47  ;;  %v1073_v7 = vcombine.high %v1048_v19, %v1064_v60  ;;  %v1007_v50 = vcombine.high %v987_v55, %v1003_v9  ;;  %v1072_v0 = vcombine.low %v1048_v19, %v1064_v60 }
 0x245   : > { %v1055_v8 = vrot.slane %v1041_v31, %v6038_v61  ;;  %v1141_v56 = vcombine.high %v1116_v16, %v1132_v37  ;;  %v1071_v25 = vrot.slane %v1057_v21, %v6038_v61  ;;  %v5200_v29 = vpack.c.bf16 %v1726_v62, %v1658_v6 }
 0x246   : > { %5208 = vmatprep.subr.msk.bf16.mxu0 %vm6164_vm1, %v5206_v20  ;;  %4989 = vmatprep.mubr.msk.f32.mxu0 %vm2312_vm0, %v1073_v7  ;;  %v1109_v63 = vcombine.high %v6279_v18, %v6282_v24  ;;  %v1125_v1 = vcombine.high %v6287_v26, %v6290_v28  ;;  %v1140_v26 = vcombine.low %v1116_v16, %v1132_v37 }
 0x247   : > { %4976 = vmatmul.mubr.msk.f32.vlgmr.msra.gmra.mrb[10].mxu1 %vm2312_vm0, %v1007_v50  ;;  %v1075_v36 = vcombine.high %v1055_v8, %v1071_v25  ;;  %v1074_v28 = vcombine.low %v1055_v8, %v1071_v25  ;;  %v1768_v39 = vcombine.low %v6006_v43, %v1745_v27  ;;  %v1769_v46 = vcombine.high %v6006_v43, %v1745_v27  ;;  %v1747_v3 = vpop.permute.xlu1 %1746 }
 0x248   : > { %5193 = vmatpush3.bf16.xpose.msk.msra.mxu1 %vm6164_vm1, %v5188_v48  ;;  %4982 = vmatprep.mubr.msk.f32.mxu1 %vm2312_vm0, %v1072_v0  ;;  %v1123_v18 = vrot.slane %v1109_v63, %v6038_v61  ;;  %v1139_v24 = vrot.slane %v1125_v1, %v6038_v61  ;;  %v1784_v51 = vcombine.low %v1733_v52, %v1757_v38 }
 0x249   : > { %5202 = vmatprep.subr.msk.bf16.mxu1 %vm6164_vm1, %v5200_v29  ;;  %v1785_v17 = vcombine.high %v1733_v52, %v1757_v38  ;;  %v1776_v57 = vrot.slane %v1768_v39, %v6033_v54  ;;  %v1783_v58 = vrot.slane %v1769_v46, %v6033_v54  ;;  %v1836_v10 = vcombine.low %v6004_v42, %v1747_v3 }
 0x24a   : > { %4990 = vmatmul.mubr.msk.f32.vlgmr.msra.gmra.mrb[8].mxu0 %vm2312_vm0, %v1141_v56  ;;  %v1143_v30 = vcombine.high %v1123_v18, %v1139_v24  ;;  %v1142_v55 = vcombine.low %v1123_v18, %v1139_v24  ;;  %v1792_v41 = vrot.slane %v1784_v51, %v6033_v54  ;;  %v1837_v11 = vcombine.high %v6004_v42, %v1747_v3 }
 0x24b   : > { %5211 = vmatpush3.bf16.xpose.msk.msra.mxu0 %vm6164_vm1, %v5206_v20  ;;  %5003 = vmatprep.mubr.msk.f32.mxu0 %vm2312_vm0, %v1075_v36  ;;  %v1799_v9 = vrot.slane %v1785_v17, %v6033_v54  ;;  %v1844_v14 = vrot.slane %v1836_v10, %v6033_v54  ;;  %v1759_v59 = vpop.permute.xlu1 %1758 }
 0x24c   : > { %v1800_v12 = vcombine.low %v1776_v57, %v1792_v41  ;;  %v1801_v43 = vcombine.high %v1776_v57, %v1792_v41  ;;  %v1851_v23 = vrot.slane %v1837_v11, %v6033_v54  ;;  %v1852_v15 = vcombine.low %v1735_v53, %v1759_v59 }
 0x24d   : > { %v1816_v13 = vcombine.low %v1783_v58, %v1799_v9  ;;  %v1817_v22 = vcombine.high %v1783_v58, %v1799_v9  ;;  %v1853_v2 = vcombine.high %v1735_v53, %v1759_v59  ;;  %v3009_v59 = vld [vmem:[#allocation7] sm:$0xff] }
 0x24e   : > { %v1808_v32 = vrot.slane %v1800_v12, %v6038_v61  ;;  %v1815_v4 = vrot.slane %v1801_v43, %v6038_v61  ;;  %v1860_v47 = vrot.slane %v1852_v15, %v6033_v54 }
 0x24f   : > { %4983 = vmatmul.mubr.msk.f32.vlgmr.msra.gmra.mrb[12].mxu1 %vm2312_vm0, %v1140_v26  ;;  %v1824_v33 = vrot.slane %v1816_v13, %v6038_v61  ;;  %v1831_v5 = vrot.slane %v1817_v22, %v6038_v61  ;;  %v1867_v48 = vrot.slane %v1853_v2, %v6033_v54 }
 0x250   : > { %5205 = vmatpush3.bf16.xpose.msk.msra.mxu1 %vm6164_vm1, %v5200_v29  ;;  %4996 = vmatprep.mubr.msk.f32.mxu1 %vm2312_vm0, %v1074_v28  ;;  %v2040_v42 = vcombine.low %v1808_v32, %v1815_v4  ;;  %v4733_v35 = vcombine.high %v1808_v32, %v1815_v4  ;;  %v1868_v37 = vcombine.low %v1844_v14, %v1860_v47 }
 0x251   : > { %v2056_v34 = vcombine.low %v1824_v33, %v1831_v5  ;;  %v4734_v40 = vcombine.high %v1824_v33, %v1831_v5  ;;  %v1869_v6 = vcombine.high %v1844_v14, %v1860_v47  ;;  %v1884_v20 = vcombine.low %v1851_v23, %v1867_v48 }
 0x252   : > { %5004 = vmatmul.mubr.msk.f32.vlgmr.msra.gmra.mrb[10].mxu0 %vm2312_vm0, %v1143_v30  ;;  %v2047_v49 = vrot.slane %v2040_v42, %v6033_v54  ;;  %v2055_v19 = vrot.slane %v4733_v35, %v6033_v54  ;;  %v1885_v7 = vcombine.high %v1851_v23, %v1867_v48  ;;  %v1876_v21 = vrot.slane %v1868_v37, %v6038_v61  ;;  %v3010_v23 = vld [vmem:[#allocation7 + $0x8] sm:$0xff] }
 0x253   : > { %v2063_v60 = vrot.slane %v2056_v34, %v6033_v54  ;;  %v2071_v16 = vrot.slane %v4734_v40, %v6033_v54  ;;  %v1883_v50 = vrot.slane %v1869_v6, %v6038_v61  ;;  %v1892_v8 = vrot.slane %v1884_v20, %v6038_v61  ;;  %v3012_v34 = vld [vmem:[#allocation7 + $0x18] sm:$0xff] }
 0x254   : > { %v2072_v62 = vcombine.low %v2047_v49, %v2055_v19  ;;  %v1899_v0 = vrot.slane %v1885_v7, %v6038_v61  ;;  %v2073_v51 = vcombine.high %v2047_v49, %v2055_v19  ;;  %v3020_v20 = vld [vmem:[#allocation7 + $0x58] sm:$0xff] }
 0x255   : > { %v2088_v31 = vcombine.low %v2063_v60, %v2071_v16  ;;  %v2108_v56 = vcombine.low %v1876_v21, %v1883_v50  ;;  %v4735_v25 = vcombine.high %v1876_v21, %v1883_v50  ;;  %v2089_v17 = vcombine.high %v2063_v60, %v2071_v16  ;;  %v3015_v16 = vld [vmem:[#allocation7 + $0x30] sm:$0xff] }
 0x256   : > { %v2124_v29 = vcombine.low %v1892_v8, %v1899_v0  ;;  %v4736_v63 = vcombine.high %v1892_v8, %v1899_v0  ;;  %v2080_v1 = vrot.slane %v2072_v62, %v6038_v61  ;;  %v2087_v9 = vrot.slane %v2073_v51, %v6038_v61  ;;  %v3011_v62 = vld [vmem:[#allocation7 + $0x10] sm:$0xff]  ;;  %v3024_v51 = vld [vmem:[#allocation7 + $0x78] sm:$0xff] }
 0x257   : > { %4997 = vmatmul.mubr.msk.f32.vlgmr.msra.gmra.mrb[14].mxu1 %vm2312_vm0, %v1142_v55  ;;  %v2096_v36 = vrot.slane %v2088_v31, %v6038_v61  ;;  %v2115_v18 = vrot.slane %v2108_v56, %v6033_v54  ;;  %v2123_v24 = vrot.slane %v4735_v25, %v6033_v54  ;;  %v2103_v3 = vrot.slane %v2089_v17, %v6038_v61  ;;  %v3018_v25 = vld [vmem:[#allocation7 + $0x48] sm:$0xff] }
 0x258   : > { %v2131_v26 = vrot.slane %v2124_v29, %v6033_v54  ;;  %v2139_v28 = vrot.slane %v4736_v63, %v6033_v54  ;;  %v3019_v29 = vld [vmem:[#allocation7 + $0x50] sm:$0xff] }
 0x259   : > { %v2140_v52 = vcombine.low %v2115_v18, %v2123_v24  ;;  %v2104_v30 = vcombine.low %v2080_v1, %v2096_v36  ;;  %v2141_v55 = vcombine.high %v2115_v18, %v2123_v24  ;;  %v2105_v58 = vcombine.high %v2080_v1, %v2096_v36  ;;  %v3017_v1 = vld [vmem:[#allocation7 + $0x40] sm:$0xff] }
 0x25a   : > { %v2156_v53 = vcombine.low %v2131_v26, %v2139_v28  ;;  %v2157_v57 = vcombine.high %v2131_v26, %v2139_v28  ;;  %v2106_v43 = vcombine.low %v2087_v9, %v2103_v3  ;;  %v2107_v32 = vcombine.high %v2087_v9, %v2103_v3  ;;  %v3014_v28 = vld [vmem:[#allocation7 + $0x28] sm:$0xff] }
 0x25b   : > { %v2148_v27 = vrot.slane %v2140_v52, %v6038_v61  ;;  %v2155_v10 = vrot.slane %v2141_v55, %v6038_v61 }
 0x25c   : > { %v2164_v38 = vrot.slane %v2156_v53, %v6038_v61  ;;  %v2171_v11 = vrot.slane %v2157_v57, %v6038_v61  ;;  %v3021_v57 = vld [vmem:[#allocation7 + $0x60] sm:$0xff] }
 0x25e   : > { %v2172_v39 = vcombine.low %v2148_v27, %v2164_v38  ;;  %v2173_v41 = vcombine.high %v2148_v27, %v2164_v38  ;;  %v2174_v13 = vcombine.low %v2155_v10, %v2171_v11  ;;  %v2175_v4 = vcombine.high %v2155_v10, %v2171_v11  ;;  %v3013_v10 = vld [vmem:[#allocation7 + $0x20] sm:$0xff] }
 0x260   : > { %v5212_v46 = vpack.c.bf16 %v2172_v39, %v2104_v30  ;;  %v6406_v12 = vpack.c.bf16 %v2173_v41, %v2105_v58  ;;  %v5220_v22 = vpack.c.bf16 %v2174_v13, %v2106_v43  ;;  %v6409_v14 = vpack.c.bf16 %v2175_v4, %v2107_v32  ;;  %v3023_v32 = vld [vmem:[#allocation7 + $0x70] sm:$0xff] }
 0x262   : > { %5213 = vmatprep.subr.bf16.mxu1 %v5212_v46  ;;  %5221 = vmatprep.subr.bf16.mxu0 %v5220_v22 }
 0x263   : > { %5215 = vmatpush3.bf16.msra.mxu1 %v5212_v46  ;;  %5223 = vmatpush3.bf16.msra.mxu0 %v5220_v22  ;;  %v3022_v46 = vld [vmem:[#allocation7 + $0x68] sm:$0xff] }
 0x264   : > { %5217 = vmatprep.subr.bf16.mxu1 %v6406_v12 }
 0x2fb   : > { %v4956_v33 = vpop.f32.mrb[4].mxu1 }
 0x2fc   : > { %v6411_v5 = vadd.f32 %v4956_v33, %v3010_v23  ;;  %v2391_v15 = vpop.f32.mrb[5].mxu1  ;;  %v3016_v33 = vld [vmem:[#allocation7 + $0x38] sm:$0xff] }
 0x2fd   : > { %v6413_v2 = vadd.f32 %v3009_v59, %v2391_v15 }
 0x2fe   : > { %v3045_v42 = vsel %vm3041_vm2, %v6411_v5, -inf }
 0x2ff   : > { %3046 = vmax.xlane.f32.xlu1 %v3045_v42  ;;  %v3042_v35 = vsel %vm3041_vm2, %v6413_v2, -inf }
 0x300   : > { %3043 = vmax.xlane.f32.xlu0 %v3042_v35 }
 0x305   : > { %v4963_v40 = vpop.f32.mrb[6].mxu1 }
 0x306   : > { %v6419_v47 = vadd.f32 %v4963_v40, %v3012_v34  ;;  %v2478_v48 = vpop.f32.mrb[7].mxu1  ;;  %v6479_v34 = vpop.permute.xlu1 %1736 }
 0x307   : > { %v6429_v0 = vadd.f32 %v3011_v62, %v2478_v48 }
 0x308   : > { %v3051_v49 = vsel %vm3041_vm2, %v6419_v47, -inf }
 0x309   : > { %3052 = vmax.xlane.f32.xlu0 %v3051_v49  ;;  %v3048_v26 = vsel %vm3041_vm2, %v6429_v0, -inf  ;;  %v6485_v49 = vpop.permute.xlu0 %1738 }
 0x30a   : > { %v6481_v40 = vpop.permute.xlu1 %1748 }
 0x30e   : > { %v6483_v48 = vpop.permute.xlu1 %1750 }
 0x312   : > { %v4970_v19 = vpop.f32.mrb[8].mxu1 }
 0x313   : > { %v2565_v60 = vpop.f32.mrb[9].mxu1  ;;  %v6443_v38 = vadd.f32 %v4970_v19, %v3014_v28 }
 0x314   : > { %v6459_v13 = vadd.f32 %v3013_v10, %v2565_v60 }
 0x315   : > { %v3057_v3 = vsel %vm3041_vm2, %v6443_v38, -inf }
 0x316   : > { %v3054_v59 = vsel %vm3041_vm2, %v6459_v13, -inf }
 0x31a   : > { %v4977_v37 = vpop.f32.mrb[10].mxu1 }
 0x31b   : > { %v2652_v6 = vpop.f32.mrb[11].mxu1  ;;  %v6469_v15 = vadd.f32 %v4977_v37, %v3016_v33 }
 0x31c   : > { %v6423_v7 = vadd.f32 %v3015_v16, %v2652_v6 }
 0x31d   : > { %v4991_v31 = vpop.f32.mrb[8].mxu0  ;;  %v3063_v35 = vsel %vm3041_vm2, %v6469_v15, -inf }
 0x31e   : > { %v6425_v21 = vadd.f32 %v4991_v31, %v3020_v20  ;;  %v2826_v50 = vpop.f32.mrb[9].mxu0  ;;  %v3060_v8 = vsel %vm3041_vm2, %v6423_v7, -inf }
 0x31f   : > { %3061 = vmax.xlane.f32.xlu1 %v3060_v8  ;;  %v6435_v24 = vadd.f32 %v3019_v29, %v2826_v50 }
 0x320   : > { %v3075_v56 = vsel %vm3041_vm2, %v6425_v21, -inf }
 0x321   : > { %3076 = vmax.xlane.f32.xlu0 %v3075_v56  ;;  %v3072_v39 = vsel %vm3041_vm2, %v6435_v24, -inf }
 0x322   : > { %v4984_v63 = vpop.f32.mrb[12].mxu1 }
 0x323   : > { %v6433_v36 = vadd.f32 %v4984_v63, %v3018_v25  ;;  %v2739_v18 = vpop.f32.mrb[13].mxu1 }
 0x324   : > { %v6439_v53 = vadd.f32 %v3017_v1, %v2739_v18 }
 0x325   : > { %v5005_v52 = vpop.f32.mrb[10].mxu0  ;;  %3049 = vmax.xlane.f32.xlu0 %v3048_v26  ;;  %v3069_v30 = vsel %vm3041_vm2, %v6433_v36, -inf }
 0x326   : > { %v3000_v27 = vpop.f32.mrb[11].mxu0  ;;  %3070 = vmax.xlane.f32.xlu1 %v3069_v30  ;;  %v3066_v17 = vsel %vm3041_vm2, %v6439_v53, -inf  ;;  %v6451_v9 = vadd.f32 %v5005_v52, %v3024_v51 }
 0x327   : > { %v6465_v23 = vadd.f32 %v3023_v32, %v3000_v27 }
 0x328   : > { %v3087_v22 = vsel %vm3041_vm2, %v6451_v9, -inf }
 0x329   : > { %3073 = vmax.xlane.f32.xlu0 %v3072_v39  ;;  %v3084_v42 = vsel %vm3041_vm2, %v6465_v23, -inf }
 0x32a   : > { %3067 = vmax.xlane.f32.xlu1 %v3066_v17  ;;  %v4998_v55 = vpop.f32.mrb[14].mxu1 }
 0x32b   : > { %v6449_v58 = vadd.f32 %v4998_v55, %v3022_v46  ;;  %v2913_v41 = vpop.f32.mrb[15].mxu1 }
 0x32c   : > { %v6455_v11 = vadd.f32 %v3021_v57, %v2913_v41 }
 0x32d   : > { %3058 = vmax.xlane.f32.xlu0 %v3057_v3  ;;  %v3081_v43 = vsel %vm3041_vm2, %v6449_v58, -inf }
 0x32e   : > { %3082 = vmax.xlane.f32.xlu1 %v3081_v43  ;;  %v3078_v4 = vsel %vm3041_vm2, %v6455_v11, -inf }
 0x331   : > { %3088 = vmax.xlane.f32.xlu0 %v3087_v22 }
 0x332   : > { %3079 = vmax.xlane.f32.xlu1 %v3078_v4 }
 0x335   : > { %3055 = vmax.xlane.f32.xlu0 %v3054_v59 }
 0x339   : > { %3085 = vmax.xlane.f32.xlu0 %v3084_v42 }
 0x33d   : > { %3064 = vmax.xlane.f32.xlu0 %v3063_v35 }
 0x343   : > { %1762 = vrot.lane.b32.xlu1 %v6016_v44, %s5660_s11 }
 0x353   : > { %1760 = vrot.lane.b32.xlu0 %v6024_v45, %s5660_s11 }
 0x38c   : > { %v3047_v19 = vpop.xlane.xlu1 %3046 }
 0x38d   : > { %v3091_v60 = vsub.f32 %v6411_v5, %v3047_v19  ;;  %v3044_v16 = vpop.xlane.xlu0 %3043 }
 0x38e   : > { %v3090_v37 = vsub.f32 %v6413_v2, %v3044_v16 }
 0x38f   : > { %v3108_v6 = vmul.f32 1.442695, %v3091_v60 }
 0x390   : > { %v3106_v20 = vmul.f32 1.442695, %v3090_v37 }
 0x391   : > { %5395 = vpow2.f32 %v3108_v6 }
 0x392   : > { %5397 = vpow2.f32 %v3106_v20 }
 0x396   : > { %v3053_v62 = vpop.xlane.xlu0 %3052 }
 0x397   : > { %v3093_v31 = vsub.f32 %v6419_v47, %v3053_v62 }
 0x399   : > { %v3112_v50 = vmul.f32 1.442695, %v3093_v31 }
 0x39b   : > { %5399 = vpow2.f32 %v3112_v50  ;;  %v5396_v8 = vpop.eup %5395 }
 0x39c   : > { %v5398_v56 = vpop.eup %5397  ;;  %v3141_v25 = vsel %vm3041_vm2, %v5396_v8, 0.0 }
 0x39d   : > { %3142 = vadd.xlane.f32.xlu1 %v3141_v25  ;;  %5010 = vmatprep.mubr.msk.f32.mxu1 %vm3041_vm2, %v5398_v56  ;;  %v3138_v5 = vsel %vm3041_vm2, %v5398_v56, 0.0 }
 0x39e   : > { %5011 = vmatmul.mubr.msk.f32.vlgmr.msra.gmra.mrb[16].mxu1 %vm3041_vm2, %v5396_v8  ;;  %3139 = vadd.xlane.f32.xlu0 %v3138_v5 }
 0x39f   : > { %5219 = vmatpush3.bf16.msra.mxu1 %v6406_v12 }
 0x3a0   : > { %5225 = vmatprep.subr.bf16.mxu1 %v6409_v14 }
 0x3a5   : > { %v5400_v2 = vpop.eup %5399 }
 0x3a6   : > { %v3147_v47 = vsel %vm3041_vm2, %v5400_v2, 0.0 }
 0x3a7   : > { %3148 = vadd.xlane.f32.xlu0 %v3147_v47 }
 0x3ac   : > { %v3062_v29 = vpop.xlane.xlu1 %3061 }
 0x3ad   : > { %v3096_v1 = vsub.f32 %v6423_v7, %v3062_v29 }
 0x3ae   : > { %v6497_v63 = vpop.xlane.xlu0 %3076 }
 0x3af   : > { %v3118_v52 = vmul.f32 1.442695, %v3096_v1 }
 0x3b2   : > { %v3050_v18 = vpop.xlane.xlu0 %3049 }
 0x3b3   : > { %v3092_v26 = vsub.f32 %v6429_v0, %v3050_v18  ;;  %v3071_v28 = vpop.xlane.xlu1 %3070 }
 0x3b4   : > { %v3099_v51 = vsub.f32 %v6433_v36, %v3071_v28  ;;  %v1973_v36 = vcombine.high %v6016_v44, %v6483_v48 }
 0x3b5   : > { %v3110_v30 = vmul.f32 1.442695, %v3092_v26  ;;  %v3101_v26 = vsub.f32 %v6425_v21, %v6497_v63 }
 0x3b6   : > { %v3074_v27 = vpop.xlane.xlu0 %3073  ;;  %v3124_v41 = vmul.f32 1.442695, %v3099_v51  ;;  %v1987_v19 = vrot.slane %v1973_v36, %v6033_v54 }
 0x3b7   : > { %5401 = vpow2.f32 %v3110_v30  ;;  %v3100_v12 = vsub.f32 %v6435_v24, %v3074_v27  ;;  %v3068_v39 = vpop.xlane.xlu1 %3067  ;;  %v1972_v24 = vcombine.low %v6016_v44, %v6483_v48  ;;  %v1904_v30 = vcombine.low %v6024_v45, %v6481_v40 }
 0x3b8   : > { %5403 = vpow2.f32 %v3118_v52  ;;  %v3098_v57 = vsub.f32 %v6439_v53, %v3068_v39  ;;  %v1905_v27 = vcombine.high %v6024_v45, %v6481_v40 }
 0x3b9   : > { %v3126_v46 = vmul.f32 1.442695, %v3100_v12  ;;  %v1980_v44 = vrot.slane %v1972_v24, %v6033_v54 }
 0x3ba   : > { %v3059_v17 = vpop.xlane.xlu0 %3058  ;;  %v3122_v32 = vmul.f32 1.442695, %v3098_v57 }
 0x3bb   : > { %5405 = vpow2.f32 %v3126_v46  ;;  %v3095_v55 = vsub.f32 %v6443_v38, %v3059_v17  ;;  %v3083_v7 = vpop.xlane.xlu1 %3082 }
 0x3bc   : > { %v3103_v38 = vsub.f32 %v6449_v58, %v3083_v7  ;;  %v3128_v7 = vmul.f32 1.442695, %v3101_v26 }
 0x3bd   : > { %v3116_v0 = vmul.f32 1.442695, %v3095_v55 }
 0x3be   : > { %v6505_v3 = vpop.xlane.xlu0 %3088 }
 0x3bf   : > { %5407 = vpow2.f32 %v3116_v0  ;;  %v3080_v10 = vpop.xlane.xlu1 %3079  ;;  %v3105_v57 = vsub.f32 %v6451_v9, %v6505_v3 }
 0x3c0   : > { %v3102_v43 = vsub.f32 %v6455_v11, %v3080_v10  ;;  %5409 = vpow2.f32 %v3124_v41  ;;  %v1912_v41 = vrot.slane %v1904_v30, %v6033_v54  ;;  %v1919_v10 = vrot.slane %v1905_v27, %v6033_v54 }
 0x3c1   : > { %v5402_v22 = vpop.eup %5401  ;;  %5411 = vpow2.f32 %v3122_v32 }
 0x3c2   : > { %v3130_v53 = vmul.f32 1.442695, %v3102_v43  ;;  %5017 = vmatprep.mubr.msk.f32.mxu1 %vm3041_vm2, %v5402_v22  ;;  %v3056_v4 = vpop.xlane.xlu0 %3055  ;;  %v3144_v59 = vsel %vm3041_vm2, %v5402_v22, 0.0  ;;  %v6515_v33 = vpop.eup %5403 }
 0x3c3   : > { %v3094_v42 = vsub.f32 %v6459_v13, %v3056_v4  ;;  %5018 = vmatmul.mubr.msk.f32.vlgmr.msra.gmra.mrb[18].mxu1 %vm3041_vm2, %v5400_v2  ;;  %3145 = vadd.xlane.f32.xlu1 %v3144_v59  ;;  %v1763_v11 = vpop.permute.xlu1 %1762  ;;  %v3132_v13 = vmul.f32 1.442695, %v3103_v38  ;;  %v3136_v59 = vmul.f32 1.442695, %v3105_v57  ;;  %v3156_v27 = vsel %vm3041_vm2, %v6515_v33, 0.0 }
 0x3c4   : > { %5227 = vmatpush3.bf16.msra.mxu1 %v6409_v14  ;;  %5031 = vmatprep.mubr.msk.f32.mxu1 %vm3041_vm2, %v6515_v33  ;;  %v1988_v58 = vcombine.low %v6485_v49, %v1763_v11  ;;  %v1989_v35 = vcombine.high %v6485_v49, %v1763_v11  ;;  %5413 = vpow2.f32 %v3130_v53 }
 0x3c5   : > { %v6525_v48 = vpop.eup %5405  ;;  %v3114_v60 = vmul.f32 1.442695, %v3094_v42 }
 0x3c6   : > { %v1996_v16 = vrot.slane %v1988_v58, %v6033_v54  ;;  %v2003_v37 = vrot.slane %v1989_v35, %v6033_v54  ;;  %v3086_v14 = vpop.xlane.xlu0 %3085  ;;  %v3168_v6 = vsel %vm3041_vm2, %v6525_v48, 0.0 }
 0x3c7   : > { %5415 = vpow2.f32 %v3114_v60  ;;  %v3104_v20 = vsub.f32 %v6465_v23, %v3086_v14  ;;  %3169 = vadd.xlane.f32.xlu0 %v3168_v6 }
 0x3c8   : > { %v2004_v49 = vcombine.low %v1980_v44, %v1996_v16  ;;  %v2005_v62 = vcombine.high %v1980_v44, %v1996_v16  ;;  %v2020_v31 = vcombine.low %v1987_v19, %v2003_v37  ;;  %v2021_v50 = vcombine.high %v1987_v19, %v2003_v37 }
 0x3c9   : > { %v5408_v8 = vpop.eup %5407  ;;  %5417 = vpow2.f32 %v3132_v13  ;;  %v3134_v56 = vmul.f32 1.442695, %v3104_v20 }
 0x3ca   : > { %v2012_v25 = vrot.slane %v2004_v49, %v6038_v61  ;;  %v2019_v5 = vrot.slane %v2005_v62, %v6038_v61  ;;  %v2028_v2 = vrot.slane %v2020_v31, %v6038_v61  ;;  %v2035_v47 = vrot.slane %v2021_v50, %v6038_v61  ;;  %v3065_v29 = vpop.xlane.xlu0 %3064  ;;  %v6539_v18 = vpop.eup %5409 }
 0x3cb   : > { %5419 = vpow2.f32 %v3134_v56  ;;  %v3097_v23 = vsub.f32 %v6469_v15, %v3065_v29  ;;  %v3153_v1 = vsel %vm3041_vm2, %v5408_v8, 0.0  ;;  %v5412_v51 = vpop.eup %5411  ;;  %v3165_v21 = vsel %vm3041_vm2, %v6539_v18, 0.0 }
 0x3cc   : > { %v2244_v28 = vcombine.low %v2012_v25, %v2019_v5  ;;  %v4739_v52 = vcombine.high %v2012_v25, %v2019_v5  ;;  %3154 = vadd.xlane.f32.xlu1 %v3153_v1  ;;  %v2260_v39 = vcombine.low %v2028_v2, %v2035_v47  ;;  %v4740_v46 = vcombine.high %v2028_v2, %v2035_v47 }
 0x3cd   : > { %v3120_v12 = vmul.f32 1.442695, %v3097_v23  ;;  %v3162_v9 = vsel %vm3041_vm2, %v5412_v51, 0.0 }
 0x3ce   : > { %v1761_v15 = vpop.permute.xlu0 %1760  ;;  %v6551_v63 = vpop.eup %5413  ;;  %v2251_v45 = vrot.slane %v2244_v28, %v6033_v54  ;;  %v2259_v40 = vrot.slane %v4739_v52, %v6033_v54  ;;  %v2267_v43 = vrot.slane %v2260_v39, %v6033_v54  ;;  %v2275_v22 = vrot.slane %v4740_v46, %v6033_v54 }
 0x3cf   : > { %5421 = vpow2.f32 %v3120_v12  ;;  %v1920_v17 = vcombine.low %v6479_v34, %v1761_v15  ;;  %v1921_v55 = vcombine.high %v6479_v34, %v1761_v15  ;;  %v3174_v42 = vsel %vm3041_vm2, %v6551_v63, 0.0 }
 0x3d0   : > { %3166 = vadd.xlane.f32.xlu1 %v3165_v21  ;;  %5423 = vpow2.f32 %v3128_v7  ;;  %v2276_v11 = vcombine.low %v2251_v45, %v2259_v40  ;;  %v2292_v16 = vcombine.low %v2267_v43, %v2275_v22  ;;  %v2277_v37 = vcombine.high %v2251_v45, %v2259_v40 }
 0x3d1   : > { %v5416_v0 = vpop.eup %5415  ;;  %v1928_v34 = vrot.slane %v1920_v17, %v6033_v54  ;;  %v1935_v24 = vrot.slane %v1921_v55, %v6033_v54  ;;  %v2293_v14 = vcombine.high %v2267_v43, %v2275_v22  ;;  %5425 = vpow2.f32 %v3136_v59  ;;  %v4472_v22 = vld [vmem:[#allocation8] sm:$0xff]  ;;  %v4478_v59 = vld [vmem:[#allocation8 + $0x30] sm:$0xff] }
 0x3d2   : > { %5024 = vmatprep.mubr.msk.f32.mxu0 %vm3041_vm2, %v5416_v0  ;;  %v3150_v3 = vsel %vm3041_vm2, %v5416_v0, 0.0  ;;  %v2284_v50 = vrot.slane %v2276_v11, %v6038_v61  ;;  %v2300_v29 = vrot.slane %v2292_v16, %v6038_v61  ;;  %v2291_v23 = vrot.slane %v2277_v37, %v6038_v61 }
 0x3d3   : > { %v6566_v36 = vpop.eup %5417  ;;  %v1936_v32 = vcombine.low %v1912_v41, %v1928_v34  ;;  %v1937_v38 = vcombine.high %v1912_v41, %v1928_v34  ;;  %v1952_v53 = vcombine.low %v1919_v10, %v1935_v24  ;;  %v1953_v4 = vcombine.high %v1919_v10, %v1935_v24  ;;  %5025 = vmatmul.mubr.msk.f32.vlgmr.msra.gmra.mrb[12].mxu0 %vm3041_vm2, %v5408_v8 }
 0x3d4   : > { %3163 = vadd.xlane.f32.xlu1 %v3162_v9  ;;  %3151 = vadd.xlane.f32.xlu0 %v3150_v3  ;;  %v3177_v31 = vsel %vm3041_vm2, %v6566_v36, 0.0  ;;  %v2307_v1 = vrot.slane %v2293_v14, %v6038_v61  ;;  %v2308_v17 = vcombine.low %v2284_v50, %v2300_v29  ;;  %v4473_v9 = vld [vmem:[#allocation8 + $0x8] sm:$0xff]  ;;  %v4474_v3 = vld [vmem:[#allocation8 + $0x10] sm:$0xff] }
 0x3d5   : > { %v6571_v44 = vpop.eup %5419  ;;  %v1944_v58 = vrot.slane %v1936_v32, %v6038_v61  ;;  %v1951_v35 = vrot.slane %v1937_v38, %v6038_v61  ;;  %v1960_v19 = vrot.slane %v1952_v53, %v6038_v61  ;;  %v1967_v13 = vrot.slane %v1953_v4, %v6038_v61  ;;  %5038 = vmatprep.mubr.msk.f32.mxu0 %vm3041_vm2, %v5412_v51  ;;  %v4475_v32 = vld [vmem:[#allocation8 + $0x18] sm:$0xff]  ;;  %v4476_v53 = vld [vmem:[#allocation8 + $0x20] sm:$0xff]  ;;  %v4477_v4 = vld [vmem:[#allocation8 + $0x28] sm:$0xff] }
 0x3d6   : > { %v3180_v60 = vsel %vm3041_vm2, %v6571_v44, 0.0  ;;  %v2310_v55 = vcombine.low %v2291_v23, %v2307_v1  ;;  %v2311_v21 = vcombine.high %v2291_v23, %v2307_v1  ;;  %v5248_v38 = vpack.c.bf16 %v4475_v32, %v4474_v3 }
 0x3d7   : > { %v2176_v6 = vcombine.low %v1944_v58, %v1951_v35  ;;  %v4737_v20 = vcombine.high %v1944_v58, %v1951_v35  ;;  %v2192_v49 = vcombine.low %v1960_v19, %v1967_v13  ;;  %v4738_v62 = vcombine.high %v1960_v19, %v1967_v13  ;;  %v4482_v35 = vld [vmem:[#allocation8 + $0x50] sm:$0xff]  ;;  %v4483_v19 = vld [vmem:[#allocation8 + $0x58] sm:$0xff] }
 0x3d8   : > { %3175 = vadd.xlane.f32.xlu1 %v3174_v42  ;;  %3181 = vadd.xlane.f32.xlu0 %v3180_v60  ;;  %v4479_v42 = vld [vmem:[#allocation8 + $0x38] sm:$0xff]  ;;  %v5264_v13 = vpack.c.bf16 %v4483_v19, %v4482_v35 }
 0x3d9   : > { %v5422_v8 = vpop.eup %5421  ;;  %v2183_v56 = vrot.slane %v2176_v6, %v6033_v54  ;;  %v2191_v25 = vrot.slane %v4737_v20, %v6033_v54  ;;  %v2199_v5 = vrot.slane %v2192_v49, %v6033_v54  ;;  %v2207_v2 = vrot.slane %v4738_v62, %v6033_v54 }
 0x3da   : > { %5032 = vmatmul.mubr.msk.f32.vlgmr.msra.gmra.mrb[20].mxu1 %vm3041_vm2, %v5422_v8  ;;  %v3159_v47 = vsel %vm3041_vm2, %v5422_v8, 0.0  ;;  %v5424_v51 = vpop.eup %5423  ;;  %v5256_v11 = vpack.c.bf16 %v4479_v42, %v4478_v59 }
 0x3db   : > { %5045 = vmatprep.mubr.msk.f32.mxu1 %vm3041_vm2, %v6525_v48  ;;  %v2208_v26 = vcombine.low %v2183_v56, %v2191_v25  ;;  %v2224_v28 = vcombine.low %v2199_v5, %v2207_v2  ;;  %v2209_v52 = vcombine.high %v2183_v56, %v2191_v25  ;;  %v2225_v30 = vcombine.high %v2199_v5, %v2207_v2  ;;  %v5426_v34 = vpop.eup %5425 }
 0x3dc   : > { %3178 = vadd.xlane.f32.xlu1 %v3177_v31  ;;  %3160 = vadd.xlane.f32.xlu0 %v3159_v47  ;;  %v2309_v48 = vcombine.high %v2284_v50, %v2300_v29  ;;  %v3171_v24 = vsel %vm3041_vm2, %v5424_v51, 0.0  ;;  %v3183_v43 = vsel %vm3041_vm2, %v5426_v34, 0.0 }
 0x3dd   : > { %v2216_v12 = vrot.slane %v2208_v26, %v6038_v61  ;;  %v2232_v39 = vrot.slane %v2224_v28, %v6038_v61  ;;  %v2223_v46 = vrot.slane %v2209_v52, %v6038_v61  ;;  %v2239_v15 = vrot.slane %v2225_v30, %v6038_v61 }
 0x3df   : > { %v2240_v7 = vcombine.low %v2216_v12, %v2232_v39  ;;  %v2241_v57 = vcombine.high %v2216_v12, %v2232_v39  ;;  %v2242_v45 = vcombine.low %v2223_v46, %v2239_v15  ;;  %v2243_v40 = vcombine.high %v2223_v46, %v2239_v15 }
 0x3e0   : > { %3157 = vadd.xlane.f32.xlu0 %v3156_v27 }
 0x3e1   : > { %v5228_v0 = vpack.c.bf16 %v2308_v17, %v2240_v7  ;;  %v5232_v33 = vpack.c.bf16 %v2309_v48, %v2241_v57  ;;  %v5236_v41 = vpack.c.bf16 %v2310_v55, %v2242_v45  ;;  %v5240_v10 = vpack.c.bf16 %v2311_v21, %v2243_v40 }
 0x3e3   : > { %5229 = vmatprep.subr.bf16.mxu0 %v5228_v0  ;;  %5233 = vmatprep.subr.bf16.mxu1 %v5232_v33 }
 0x3e4   : > { %3172 = vadd.xlane.f32.xlu0 %v3171_v24  ;;  %5231 = vmatpush3.bf16.msra.mxu0 %v5228_v0 }
 0x3e5   : > { %5235 = vmatpush3.bf16.msra.mxu1 %v5232_v33  ;;  %5237 = vmatprep.subr.bf16.mxu0 %v5236_v41 }
 0x3e6   : > { %5241 = vmatprep.subr.bf16.mxu1 %v5240_v10 }
 0x3e7   : > { %5039 = vmatmul.mubr.msk.f32.vlgmr.msra.gmra.mrb[14].mxu0 %vm3041_vm2, %v6539_v18  ;;  %v5244_v18 = vpack.c.bf16 %v4473_v9, %v4472_v22 }
 0x3e8   : > { %3184 = vadd.xlane.f32.xlu0 %v3183_v43  ;;  %5046 = vmatmul.mubr.msk.f32.vlgmr.msra.gmra.mrb[22].mxu1 %vm3041_vm2, %v5424_v51 }
 0x3e9   : > { %5239 = vmatpush3.bf16.msra.mxu0 %v5236_v41  ;;  %5052 = vmatprep.mubr.msk.f32.mxu0 %vm3041_vm2, %v6551_v63  ;;  %v5252_v63 = vpack.c.bf16 %v4477_v4, %v4476_v53 }
 0x3ea   : > { %5243 = vmatpush3.bf16.msra.mxu1 %v5240_v10  ;;  %5059 = vmatprep.mubr.msk.f32.mxu1 %vm3041_vm2, %v6571_v44  ;;  %v4481_v44 = vld [vmem:[#allocation8 + $0x48] sm:$0xff] }
 0x3eb   : > { %5245 = vmatprep.subr.bf16.mxu0 %v5244_v18 }
 0x3ec   : > { %5053 = vmatmul.mubr.msk.f32.vlgmr.msra.gmra.mrb[16].mxu0 %vm3041_vm2, %v6566_v36  ;;  %v4480_v36 = vld [vmem:[#allocation8 + $0x40] sm:$0xff] }
 0x3ed   : > { %5060 = vmatmul.mubr.msk.f32.vlgmr.msra.gmra.mrb[24].mxu1 %vm3041_vm2, %v5426_v34  ;;  %5247 = vmatpush3.bf16.msra.mxu0 %v5244_v18  ;;  %v5260_v58 = vpack.c.bf16 %v4481_v44, %v4480_v36 }
 0x3ee   : > { %5249 = vmatprep.subr.bf16.mxu0 %v5248_v38 }
 0x3f1   : > { %5251 = vmatpush3.bf16.msra.mxu0 %v5248_v38 }
 0x3f2   : > { %5253 = vmatprep.subr.bf16.mxu0 %v5252_v63 }
 0x3f5   : > { %5255 = vmatpush3.bf16.msra.mxu0 %v5252_v63 }
 0x3f6   : > { %5257 = vmatprep.subr.bf16.mxu0 %v5256_v11 }
 0x3f9   : > { %5259 = vmatpush3.bf16.msra.mxu0 %v5256_v11 }
 0x3fa   : > { %5261 = vmatprep.subr.bf16.mxu0 %v5260_v58 }
 0x3fd   : > { %5263 = vmatpush3.bf16.msra.mxu0 %v5260_v58 }
 0x3fe   : > { %5265 = vmatprep.subr.bf16.mxu0 %v5264_v13 }
 0x401   : > { %5267 = vmatpush3.bf16.msra.mxu0 %v5264_v13 }
 0x42a   : > { %v3143_v20 = vpop.xlane.xlu1 %3142 }
 0x42b   : > { %v3140_v37 = vpop.xlane.xlu0 %3139  ;;  %5427 = vrcp.f32 %v3143_v20 }
 0x42c   : > { %5429 = vrcp.f32 %v3140_v37 }
 0x434   : > { %v3149_v14 = vpop.xlane.xlu0 %3148 }
 0x435   : > { %v5428_v29 = vpop.eup %5427 }
 0x436   : > { %v5430_v23 = vpop.eup %5429 }
 0x450   : > { %v3146_v62 = vpop.xlane.xlu1 %3145 }
 0x454   : > { %v3170_v6 = vpop.xlane.xlu0 %3169 }
 0x459   : > { %v3155_v31 = vpop.xlane.xlu1 %3154 }
 0x45a   : > { %5431 = vrcp.f32 %v3155_v31 }
 0x45d   : > { %v3167_v25 = vpop.xlane.xlu1 %3166 }
 0x461   : > { %v3152_v49 = vpop.xlane.xlu0 %3151  ;;  %v3164_v2 = vpop.xlane.xlu1 %3163 }
 0x462   : > { %5433 = vrcp.f32 %v3152_v49 }
 0x463   : > { %5435 = vrcp.f32 %v3149_v14 }
 0x464   : > { %5437 = vrcp.f32 %v3146_v62  ;;  %v5432_v1 = vpop.eup %5431 }
 0x465   : > { %v3182_v50 = vpop.xlane.xlu0 %3181  ;;  %v3176_v26 = vpop.xlane.xlu1 %3175 }
 0x469   : > { %v3161_v5 = vpop.xlane.xlu0 %3160  ;;  %v3179_v57 = vpop.xlane.xlu1 %3178 }
 0x46a   : > { %5439 = vrcp.f32 %v3161_v5 }
 0x46c   : > { %v5434_v52 = vpop.eup %5433 }
 0x46d   : > { %v3158_v47 = vpop.xlane.xlu0 %3157  ;;  %v5436_v21 = vpop.eup %5435 }
 0x46e   : > { %5441 = vrcp.f32 %v3158_v47  ;;  %v5438_v7 = vpop.eup %5437 }
 0x46f   : > { %5443 = vrcp.f32 %v3170_v6 }
 0x470   : > { %5445 = vrcp.f32 %v3167_v25 }
 0x471   : > { %v5012_v60 = vpop.f32.mrb[16].mxu1  ;;  %v3173_v39 = vpop.xlane.xlu0 %3172  ;;  %5447 = vrcp.f32 %v3164_v2 }
 0x472   : > { %v3258_v16 = vpop.f32.mrb[17].mxu1  ;;  %v3851_v30 = vmul.f32 %v5428_v29, %v5012_v60  ;;  %5449 = vrcp.f32 %v3176_v26 }
 0x473   : > { %v3850_v46 = vmul.f32 %v5430_v23, %v3258_v16  ;;  %5451 = vrcp.f32 %v3182_v50 }
 0x474   : > { %v5440_v45 = vpop.eup %5439  ;;  %5453 = vrcp.f32 %v3179_v57 }
 0x475   : > { %v3185_v33 = vpop.xlane.xlu0 %3184  ;;  %5455 = vrcp.f32 %v3173_v39 }
 0x476   : > { %5457 = vrcp.f32 %v3185_v33 }
 0x478   : > { %v5442_v0 = vpop.eup %5441 }
 0x479   : > { %v5444_v36 = vpop.eup %5443 }
 0x47a   : > { %v5446_v13 = vpop.eup %5445 }
 0x47b   : > { %v5448_v6 = vpop.eup %5447 }
 0x47c   : > { %v5450_v50 = vpop.eup %5449 }
 0x47d   : > { %v5452_v2 = vpop.eup %5451 }
 0x47e   : > { %v5454_v26 = vpop.eup %5453 }
 0x496   : > { %v5019_v8 = vpop.f32.mrb[18].mxu1 }
 0x497   : > { %v3339_v56 = vpop.f32.mrb[19].mxu1  ;;  %v3853_v41 = vmul.f32 %v5436_v21, %v5019_v8 }
 0x498   : > { %v3852_v24 = vmul.f32 %v5438_v7, %v3339_v56 }
 0x4a6   : > { %v5026_v28 = vpop.f32.mrb[12].mxu0 }
 0x4a7   : > { %v3855_v27 = vmul.f32 %v5432_v1, %v5026_v28  ;;  %v3420_v12 = vpop.f32.mrb[13].mxu0 }
 0x4a8   : > { %v3854_v15 = vmul.f32 %v5434_v52, %v3420_v12  ;;  %v5456_v12 = vpop.eup %5455 }
 0x4a9   : > { %v3934_v51 = vcombine.low %v3851_v30, %v3855_v27  ;;  %v3935_v17 = vcombine.high %v3851_v30, %v3855_v27 }
 0x4aa   : > { %v3866_v48 = vcombine.low %v3850_v46, %v3854_v15  ;;  %v3867_v55 = vcombine.high %v3850_v46, %v3854_v15 }
 0x4ab   : > { %v3942_v32 = vrot.slane %v3934_v51, %v6033_v54  ;;  %v3949_v38 = vrot.slane %v3935_v17, %v6033_v54 }
 0x4ac   : > { %v3874_v63 = vrot.slane %v3866_v48, %v6033_v54  ;;  %v3881_v59 = vrot.slane %v3867_v55, %v6033_v54  ;;  %v5458_v48 = vpop.eup %5457 }
 0x4ad   : > { %v5033_v40 = vpop.f32.mrb[20].mxu1 }
 0x4ae   : > { %v3857_v10 = vmul.f32 %v5440_v45, %v5033_v40  ;;  %v3501_v34 = vpop.f32.mrb[21].mxu1 }
 0x4af   : > { %v3856_v43 = vmul.f32 %v5442_v0, %v3501_v34 }
 0x4b0   : > { %v3950_v22 = vcombine.low %v3853_v41, %v3857_v10  ;;  %v3951_v9 = vcombine.high %v3853_v41, %v3857_v10 }
 0x4b1   : > { %v3882_v3 = vcombine.low %v3852_v24, %v3856_v43  ;;  %v3883_v18 = vcombine.high %v3852_v24, %v3856_v43 }
 0x4b2   : > { %v3958_v53 = vrot.slane %v3950_v22, %v6033_v54  ;;  %v3965_v4 = vrot.slane %v3951_v9, %v6033_v54 }
 0x4b3   : > { %v3890_v42 = vrot.slane %v3882_v3, %v6033_v54  ;;  %v3897_v11 = vrot.slane %v3883_v18, %v6033_v54 }
 0x4b4   : > { %v3966_v44 = vcombine.low %v3942_v32, %v3958_v53  ;;  %v3967_v58 = vcombine.high %v3942_v32, %v3958_v53  ;;  %v3982_v35 = vcombine.low %v3949_v38, %v3965_v4  ;;  %v3983_v19 = vcombine.high %v3949_v38, %v3965_v4 }
 0x4b5   : > { %v3898_v60 = vcombine.low %v3874_v63, %v3890_v42  ;;  %v3899_v16 = vcombine.high %v3874_v63, %v3890_v42  ;;  %v3914_v37 = vcombine.low %v3881_v59, %v3897_v11  ;;  %v3915_v14 = vcombine.high %v3881_v59, %v3897_v11 }
 0x4b6   : > { %v3974_v20 = vrot.slane %v3966_v44, %v6038_v61  ;;  %v3981_v49 = vrot.slane %v3967_v58, %v6038_v61  ;;  %v3990_v62 = vrot.slane %v3982_v35, %v6038_v61  ;;  %v3997_v31 = vrot.slane %v3983_v19, %v6038_v61 }
 0x4b7   : > { %v3906_v8 = vrot.slane %v3898_v60, %v6038_v61  ;;  %v3913_v56 = vrot.slane %v3899_v16, %v6038_v61  ;;  %v3922_v25 = vrot.slane %v3914_v37, %v6038_v61  ;;  %v3929_v5 = vrot.slane %v3915_v14, %v6038_v61 }
 0x4b8   : > { %v4206_v47 = vcombine.low %v3974_v20, %v3981_v49  ;;  %v4791_v29 = vcombine.high %v3974_v20, %v3981_v49  ;;  %v4222_v23 = vcombine.low %v3990_v62, %v3997_v31  ;;  %v4792_v1 = vcombine.high %v3990_v62, %v3997_v31 }
 0x4b9   : > { %v4138_v28 = vcombine.low %v3906_v8, %v3913_v56  ;;  %v4789_v52 = vcombine.high %v3906_v8, %v3913_v56  ;;  %v4154_v30 = vcombine.low %v3922_v25, %v3929_v5  ;;  %v4790_v27 = vcombine.high %v3922_v25, %v3929_v5 }
 0x4ba   : > { %v5040_v39 = vpop.f32.mrb[14].mxu0  ;;  %v4213_v46 = vrot.slane %v4206_v47, %v6033_v54  ;;  %v4221_v15 = vrot.slane %v4791_v29, %v6033_v54  ;;  %v4229_v51 = vrot.slane %v4222_v23, %v6033_v54  ;;  %v4237_v17 = vrot.slane %v4792_v1, %v6033_v54 }
 0x4bb   : > { %v3859_v55 = vmul.f32 %v5446_v13, %v5040_v39  ;;  %v5047_v21 = vpop.f32.mrb[22].mxu1  ;;  %v3582_v7 = vpop.f32.mrb[15].mxu0  ;;  %v4145_v57 = vrot.slane %v4138_v28, %v6033_v54  ;;  %v4153_v45 = vrot.slane %v4789_v52, %v6033_v54  ;;  %v4161_v40 = vrot.slane %v4154_v30, %v6033_v54 }
 0x4bc   : > { %v3861_v0 = vmul.f32 %v5456_v12, %v5047_v21  ;;  %v3858_v33 = vmul.f32 %v5448_v6, %v3582_v7  ;;  %v3663_v41 = vpop.f32.mrb[23].mxu1  ;;  %v4169_v10 = vrot.slane %v4790_v27, %v6033_v54  ;;  %v4239_v34 = vcombine.high %v4213_v46, %v4221_v15 }
 0x4bd   : > { %v3860_v24 = vmul.f32 %v5444_v36, %v3663_v41  ;;  %v4171_v43 = vcombine.high %v4145_v57, %v4153_v45  ;;  %v4255_v22 = vcombine.high %v4229_v51, %v4237_v17  ;;  %v4170_v9 = vcombine.low %v4145_v57, %v4153_v45 }
 0x4be   : > { %v4187_v3 = vcombine.high %v4161_v40, %v4169_v10  ;;  %v6637_v18 = vrot.slane %v4239_v34, %v6038_v61  ;;  %v4186_v32 = vcombine.low %v4161_v40, %v4169_v10  ;;  %v4238_v38 = vcombine.low %v4213_v46, %v4221_v15 }
 0x4bf   : > { %v5054_v53 = vpop.f32.mrb[16].mxu0  ;;  %v6640_v4 = vrot.slane %v4171_v43, %v6038_v61  ;;  %v6643_v63 = vrot.slane %v4255_v22, %v6038_v61  ;;  %v6646_v59 = vrot.slane %v4170_v9, %v6038_v61  ;;  %v4254_v42 = vcombine.low %v4229_v51, %v4237_v17 }
 0x4c0   : > { %v3863_v11 = vmul.f32 %v5454_v26, %v5054_v53  ;;  %v5061_v36 = vpop.f32.mrb[24].mxu1  ;;  %v3744_v44 = vpop.f32.mrb[17].mxu0  ;;  %v6649_v58 = vrot.slane %v4187_v3, %v6038_v61  ;;  %v6652_v35 = vrot.slane %v4186_v32, %v6038_v61  ;;  %v6655_v19 = vrot.slane %v4238_v38, %v6038_v61 }
 0x4c1   : > { %v3865_v13 = vmul.f32 %v5458_v48, %v5061_v36  ;;  %v3862_v60 = vmul.f32 %v5450_v50, %v3744_v44  ;;  %v3825_v16 = vpop.f32.mrb[25].mxu1  ;;  %v4272_v37 = vcombine.low %v6637_v18, %v6643_v63  ;;  %v6660_v14 = vrot.slane %v4254_v42, %v6038_v61 }
 0x4c2   : > { %v4070_v6 = vcombine.low %v3859_v55, %v3863_v11  ;;  %v4071_v20 = vcombine.high %v3859_v55, %v3863_v11  ;;  %v3864_v49 = vmul.f32 %v5452_v2, %v3825_v16  ;;  %v4204_v62 = vcombine.low %v6640_v4, %v6649_v58 }
 0x4c3   : > { %v4086_v31 = vcombine.low %v3861_v0, %v3865_v13  ;;  %v4087_v8 = vcombine.high %v3861_v0, %v3865_v13  ;;  %v4002_v56 = vcombine.low %v3858_v33, %v3862_v60  ;;  %v4003_v25 = vcombine.high %v3858_v33, %v3862_v60 }
 0x4c4   : > { %v4078_v5 = vrot.slane %v4070_v6, %v6033_v54  ;;  %v4085_v50 = vrot.slane %v4071_v20, %v6033_v54  ;;  %v4018_v47 = vcombine.low %v3860_v24, %v3864_v49  ;;  %v4019_v29 = vcombine.high %v3860_v24, %v3864_v49 }
 0x4c5   : > { %v4094_v23 = vrot.slane %v4086_v31, %v6033_v54  ;;  %v4101_v1 = vrot.slane %v4087_v8, %v6033_v54  ;;  %v4010_v26 = vrot.slane %v4002_v56, %v6033_v54  ;;  %v4017_v2 = vrot.slane %v4003_v25, %v6033_v54  ;;  %v4484_v56 = vld [vmem:[#allocation8 + $0x60] sm:$0xff]  ;;  %v4485_v25 = vld [vmem:[#allocation8 + $0x68] sm:$0xff] }
 0x4c6   : > { %v4026_v28 = vrot.slane %v4018_v47, %v6033_v54  ;;  %v4033_v52 = vrot.slane %v4019_v29, %v6033_v54  ;;  %v5370_v30 = vpack.i.bf16 %v4272_v37, %v4204_v62  ;;  %v4203_v27 = vcombine.high %v6646_v59, %v6652_v35 }
 0x4c7   : > { %v4102_v12 = vcombine.low %v4078_v5, %v4094_v23  ;;  %v4103_v39 = vcombine.high %v4078_v5, %v4094_v23  ;;  %v4118_v46 = vcombine.low %v4085_v50, %v4101_v1  ;;  %v4119_v15 = vcombine.high %v4085_v50, %v4101_v1 }
 0x4c8   : > { %v4034_v51 = vcombine.low %v4010_v26, %v4026_v28  ;;  %v4035_v17 = vcombine.high %v4010_v26, %v4026_v28  ;;  %v4050_v48 = vcombine.low %v4017_v2, %v4033_v52  ;;  %v4051_v55 = vcombine.high %v4017_v2, %v4033_v52  ;;  %5371 = vrot.lane.b32.xlu0 %v5370_v30, %s5658_s19 }
 0x4c9   : > { %v4110_v21 = vrot.slane %v4102_v12, %v6038_v61  ;;  %v4117_v7 = vrot.slane %v4103_v39, %v6038_v61  ;;  %v4126_v57 = vrot.slane %v4118_v46, %v6038_v61  ;;  %v4133_v45 = vrot.slane %v4119_v15, %v6038_v61  ;;  %v4487_v12 = vld [vmem:[#allocation8 + $0x78] sm:$0xff] }
 0x4ca   : > { %v4042_v40 = vrot.slane %v4034_v51, %v6038_v61  ;;  %v4049_v0 = vrot.slane %v4035_v17, %v6038_v61  ;;  %v4058_v33 = vrot.slane %v4050_v48, %v6038_v61  ;;  %v4065_v41 = vrot.slane %v4051_v55, %v6038_v61 }
 0x4cb   : > { %v4342_v10 = vcombine.low %v4110_v21, %v4117_v7  ;;  %v4795_v34 = vcombine.high %v4110_v21, %v4117_v7  ;;  %v4358_v24 = vcombine.low %v4126_v57, %v4133_v45  ;;  %v4796_v43 = vcombine.high %v4126_v57, %v4133_v45 }
 0x4cc   : > { %v4274_v22 = vcombine.low %v4042_v40, %v4049_v0  ;;  %v4793_v9 = vcombine.high %v4042_v40, %v4049_v0  ;;  %v4290_v3 = vcombine.low %v4058_v33, %v4065_v41  ;;  %v4794_v32 = vcombine.high %v4058_v33, %v4065_v41 }
 0x4cd   : > { %v4270_v38 = vcombine.low %v6655_v19, %v6660_v14  ;;  %v4271_v53 = vcombine.high %v6655_v19, %v6660_v14  ;;  %v4202_v42 = vcombine.low %v6646_v59, %v6652_v35  ;;  %v4205_v11 = vcombine.high %v6640_v4, %v6649_v58 }
 0x4ce   : > { %v4273_v36 = vcombine.high %v6637_v18, %v6643_v63  ;;  %v4281_v44 = vrot.slane %v4274_v22, %v6033_v54  ;;  %v4289_v13 = vrot.slane %v4793_v9, %v6033_v54  ;;  %v4297_v60 = vrot.slane %v4290_v3, %v6033_v54 }
 0x4cf   : > { %v5365_v16 = vpack.i.bf16 %v4271_v53, %v4203_v27  ;;  %v4305_v37 = vrot.slane %v4794_v32, %v6033_v54  ;;  %v4349_v6 = vrot.slane %v4342_v10, %v6033_v54  ;;  %v4357_v20 = vrot.slane %v4795_v34, %v6033_v54  ;;  %v4486_v27 = vld [vmem:[#allocation8 + $0x70] sm:$0xff] }
 0x4d0   : > { %v5375_v49 = vpack.i.bf16 %v4273_v36, %v4205_v11  ;;  %v4307_v62 = vcombine.high %v4281_v44, %v4289_v13  ;;  %v4365_v4 = vrot.slane %v4358_v24, %v6033_v54  ;;  %v4373_v58 = vrot.slane %v4796_v43, %v6033_v54 }
 0x4d1   : > { %5366 = vrot.lane.b32.xlu1 %v5365_v16, %s5660_s11  ;;  %v4323_v18 = vcombine.high %v4297_v60, %v4305_v37  ;;  %v4375_v63 = vcombine.high %v4349_v6, %v4357_v20  ;;  %v4306_v31 = vcombine.low %v4281_v44, %v4289_v13  ;;  %v4322_v8 = vcombine.low %v4297_v60, %v4305_v37 }
 0x4d2   : > { %v4321_v5 = vrot.slane %v4307_v62, %v6038_v61  ;;  %v4391_v50 = vcombine.high %v4365_v4, %v4373_v58  ;;  %v4374_v47 = vcombine.low %v4349_v6, %v4357_v20  ;;  %v4390_v29 = vcombine.low %v4365_v4, %v4373_v58  ;;  %v4797_v4 = vld [vmem:[%s6792_s5] ss:$0 sm:$0xff] }
 0x4d3   : > { %v4337_v23 = vrot.slane %v4323_v18, %v6038_v61  ;;  %v4389_v1 = vrot.slane %v4375_v63, %v6038_v61  ;;  %v4314_v26 = vrot.slane %v4306_v31, %v6038_v61  ;;  %v4330_v54 = vrot.slane %v4322_v8, %v6038_v61 }
 0x4d4   : > { %v4405_v2 = vrot.slane %v4391_v50, %v6038_v61  ;;  %v4382_v28 = vrot.slane %v4374_v47, %v6038_v61  ;;  %v4398_v52 = vrot.slane %v4390_v29, %v6038_v61  ;;  %v5268_v30 = vpack.c.bf16 %v4485_v25, %v4484_v56 }
 0x4d5   : > { %5376 = vrot.lane.b32.xlu1 %v5375_v49, %s5659_s20  ;;  %v4340_v39 = vcombine.low %v4321_v5, %v4337_v23  ;;  %v4338_v46 = vcombine.low %v4314_v26, %v4330_v54  ;;  %v4339_v15 = vcombine.high %v4314_v26, %v4330_v54  ;;  %v4341_v51 = vcombine.high %v4321_v5, %v4337_v23 }
 0x4d6   : > { %v4408_v17 = vcombine.low %v4389_v1, %v4405_v2  ;;  %v4407_v48 = vcombine.high %v4382_v28, %v4398_v52  ;;  %v4406_v55 = vcombine.low %v4382_v28, %v4398_v52  ;;  %v4409_v21 = vcombine.high %v4389_v1, %v4405_v2  ;;  %5269 = vmatprep.subr.bf16.mxu0 %v5268_v30 }
 0x4d7   : > { %5271 = vmatpush3.bf16.msra.mxu0 %v5268_v30  ;;  %v5272_v7 = vpack.c.bf16 %v4487_v12, %v4486_v27 }
 0x4d8   : > { %v5385_v57 = vpack.i.bf16 %v4408_v17, %v4340_v39  ;;  %v5380_v45 = vpack.i.bf16 %v4407_v48, %v4339_v15  ;;  %v5390_v40 = vpack.i.bf16 %v4409_v21, %v4341_v51 }
 0x4d9   : > { %5273 = vmatprep.subr.bf16.mxu0 %v5272_v7 }
 0x4da   : > { %5386 = vrot.lane.b32.xlu0 %v5385_v57, %s5658_s19  ;;  %5381 = vrot.lane.b32.xlu1 %v5380_v45, %s5660_s11 }
 0x4db   : > { %5275 = vmatpush3.bf16.msra.mxu0 %v5272_v7 }
 0x4de   : > { %5391 = vrot.lane.b32.xlu1 %v5390_v40, %s5659_s20 }
 0x53a   : > { %v5372_v61 = vpop.permute.xlu0 %5371 }
 0x53b   : > { %v5374_v10 = vunpack.i.h.bf16 %v5372_v61  ;;  %v5373_v34 = vunpack.i.l.bf16 %v5372_v61 }
 0x543   : > { %v5367_v0 = vpop.permute.xlu1 %5366 }
 0x544   : > { %v5369_v33 = vunpack.i.h.bf16 %v5367_v0  ;;  %v5368_v41 = vunpack.i.l.bf16 %v5367_v0 }
 0x546   : > { %v4459_v24 = vsel %vm2312_vm0, %v4270_v38, %v5369_v33  ;;  %v4458_v43 = vsel %vm2312_vm0, %v4202_v42, %v5368_v41 }
 0x547   : > { %v5377_v22 = vpop.permute.xlu1 %5376  ;;  %v4463_v32 = vsel %vm4462_vm3, %v4458_v43, %v5373_v34  ;;  %v4464_v53 = vsel %vm4462_vm3, %v4459_v24, %v5374_v10 }
 0x548   : > { %v5379_v9 = vunpack.i.h.bf16 %v5377_v22  ;;  %v5378_v3 = vunpack.i.l.bf16 %v5377_v22 }
 0x54a   : > { %v4468_v11 = vsel %vm4467_vm4, %v4463_v32, %v5378_v3  ;;  %v4469_v19 = vsel %vm4467_vm4, %v4464_v53, %v5379_v9 }
 0x54b   : > { %5094 = vmatprep.mubr.f32.mxu0 %v4468_v11 }
 0x54c   : > { %5095 = vmatmul.mubr.f32.vlgmr.msra.gmra.mrb[18].mxu0 %v4469_v19  ;;  %v5382_v14 = vpop.permute.xlu1 %5381  ;;  %v5387_v38 = vpop.permute.xlu0 %5386 }
 0x54d   : > { %v5384_v59 = vunpack.i.h.bf16 %v5382_v14  ;;  %v5383_v35 = vunpack.i.l.bf16 %v5382_v14  ;;  %v5389_v42 = vunpack.i.h.bf16 %v5387_v38  ;;  %v5388_v36 = vunpack.i.l.bf16 %v5387_v38 }
 0x54f   : > { %v4460_v44 = vsel %vm2312_vm0, %v4338_v46, %v5383_v35  ;;  %v4461_v13 = vsel %vm2312_vm0, %v4406_v55, %v5384_v59 }
 0x550   : > { %v5392_v60 = vpop.permute.xlu1 %5391  ;;  %v4465_v6 = vsel %vm4462_vm3, %v4460_v44, %v5388_v36  ;;  %v4466_v20 = vsel %vm4462_vm3, %v4461_v13, %v5389_v42 }
 0x551   : > { %v5394_v16 = vunpack.i.h.bf16 %v5392_v60  ;;  %v5393_v37 = vunpack.i.l.bf16 %v5392_v60 }
 0x553   : > { %v4470_v49 = vsel %vm4467_vm4, %v4465_v6, %v5393_v37  ;;  %v4471_v62 = vsel %vm4467_vm4, %v4466_v20, %v5394_v16 }
 0x554   : > { %5097 = vmatprep.mubr.f32.mxu0 %v4470_v49 }
 0x555   : > { %5098 = vmatmul.mubr.f32.gmra.mrb[20].mxu0 %v4471_v62 }
 0x61f   : > { %v5096_v58 = vpop.f32.mrb[18].mxu0 }
 0x620   : > { %v4567_v18 = vadd.f32 %v5096_v58, %v4797_v4  ;;  %v4561_v63 = vpop.f32.mrb[19].mxu0 }
 0x621   : > { %v4562_v31 = vadd.f32 %v4797_v4, %v4561_v63 }
 0x622   : > { %4581 = vst [vmem:[%s314_s18 + $0x8] sm:$0xff] %v4567_v18 }
 0x623   : > { %4580 = vst [vmem:[%s314_s18] sm:$0xff] %v4562_v31 }
 0x628   : > { %v5099_v8 = vpop.f32.mrb[20].mxu0 }
 0x629   : > { %v4577_v56 = vadd.f32 %v5099_v8, %v4797_v4  ;;  %v4571_v25 = vpop.f32.mrb[21].mxu0 }
 0x62a   : > { %v4572_v5 = vadd.f32 %v4797_v4, %v4571_v25 }
 0x62b   : > { %4583 = vst [vmem:[%s314_s18 + $0x18] sm:$0xff] %v4577_v56 }
 0x62c   : > { %4582 = vst [vmem:[%s314_s18 + $0x10] sm:$0xff] %v4572_v5 }
 0x62d   : > { %5586 = shalt.err (!%p5583_p4)
}
 0x62e   : > { %s5587_s19 = scalar_lea.hbm %s6743_s17, 512  ;;  %s5591_s10 = scalar_lea.hbm %s6793_s6, 1024 }
 0x62f   : > { %p5588_p9 = scmp.ne.s32.totalorder %s6743_s17, %s5587_s19  ;;  %p5592_p8 = scmp.lt.u32.totalorder %s6743_s17, %s6793_s6 }
 0x630   : > { %p5593_p13 = scmp.lt.u32.totalorder %s5591_s10, %s5587_s19  ;;  %p5595_p10 = scmp.lt.u32.totalorder %s5587_s19, %s6743_s17 }
 0x631   : > { %p5589_p0 = pnand %p5588_p9, %p5849_p5 }
 0x632   : > { %p5594_p6 = por %p5593_p13, %p5592_p8 }
 0x633   : > { %p5590_p11 = pneg %p5589_p0 }
 0x634   : > { %p5596_p3 = por %p5595_p10, %p5594_p6 }
 0x636   : > { %p5597_p7 = pnand %p5596_p3, %p5590_p11 }
 0x638   : > { %5600 = shalt.err (!%p5597_p7)
}
 0x639   : > { %s5664_s7 = smov 128   ;;  %s5665_s8 = smov 8  }
 0x63a   : > { %5290 = dma.vmem_to_hbm [thread:$0]  (%p5849_p5), %s6738_s13, 512, %s6743_s17, %s4585_s15, %s5664_s7, %s5664_s7, %s5665_s8  }
 0x63b PF: > { %s4614_s14 = sand.u32 1, %s5635_s21   ;;  %p6815_p12 = scmp.ne.s32.totalorder %s6799_s28, 0 }
 0x63c   : > { %p6816_p2 = scmp.ge.s32.totalorder %s5647_s24, 2  ;;  %s4615_s1 = scalar_lea.sflag [#allocation4], %s4614_s14 }
 0x63e   : > { %p5307_p1 = pnand %p6816_p2, %p6815_p12 }
 0x640   : > { %5630 = dma.done.wait (!%p5307_p1), %s4615_s1, 512  }
 0x641   : > { %5632 = vsyncadd (!%p5307_p1), %s4615_s1, 4294966784  ;;  %p21_p4 = scmp.ge.s32.totalorder %s5814_s12, 4   ;;  %s6817_s21 = smov %s5639_s22 }
 0x642   : > { %s6818_s22 = smov %s5643_s23  ;;  %s6819_s23 = smov %s5845_s30 }
 0x643   : > { %s6820_s24 = smov %s5814_s12  ;;  %23 = sbr.rel (!%p21_p4) target bundleno = 9 (0x9), region = 101 }
 0x64a   :  { %4620 = vsyncpa [#allocation3], 1 }
 0x64b   :  { %4622 = vsyncpa [#allocation3 + $0x1], 1 }
 0x64c   :  { %4623 = vsyncpa [#allocation6], 1 }
 0x64d   :  { %4624 = vsyncpa [#allocation9], 1 }
 0x64e   :  { %4625 = vsyncpa [#allocation4], 1 }
 0x64f   :  { %4627 = vsyncpa [#allocation4 + $0x1], 1 }

// kernel: tpu_custom_call.1
= control target key start
LH: loop header
LB: loop body
LE: loop exit
PB: predicated region body
PF: predicated region fallthrough
CT: control target
= control target key end

     0   :  { %s6787_s0 = inlined_call_operand.hbm [shape: f32[4,16,128], index: 0, kind: input, shape index: {}]   ;;  %s6788_s1 = inlined_call_operand.hbm [shape: f32[128,384], index: 1, kind: input, shape index: {}]   ;;  %s6789_s2 = inlined_call_operand.vmem [shape: f32[1,384], index: 2, kind: input, shape index: {}]   ;;  %s6790_s3 = inlined_call_operand.hbm [shape: f32[2,4,16,16], index: 3, kind: input, shape index: {}]   ;;  %s6791_s4 = inlined_call_operand.hbm [shape: f32[128,128], index: 4, kind: input, shape index: {}]   ;;  %s6792_s5 = inlined_call_operand.vmem [shape: f32[1,128], index: 5, kind: input, shape index: {}]   ;;  %s6793_s6 = inlined_call_operand.hbm [shape: f32[4,16,128], index: 6, kind: output, shape index: {}]  }
   0x1   :  { %6797 = sst [smem:[#allocation15_spill]] %s6788_s1 }
   0x2   :  { %11 = vsyncpa [#allocation3], 0 }
   0x3   :  { %13 = vsyncpa [#allocation3 + $0x1], 0 }
   0x4   :  { %14 = vsyncpa [#allocation6], 0 }
   0x5   :  { %15 = vsyncpa [#allocation9], 0 }
   0x6   :  { %16 = vsyncpa [#allocation4], 0 }
   0x7   :  { %18 = vsyncpa [#allocation4 + $0x1], 0  ;;  %s5701_s21 = smov 0   ;;  %s5703_s22 = smov 0  }
   0x8   :  { %s5705_s23 = smov 0   ;;  %s5707_s24 = smov 0  }
   0x9 LB: > { %s5722_s25 = sadd.s32 4294967295, %s5647_s24   ;;  %s4701_s26 = sadd.s32 4294967294, %s5647_s24   ;;  %s5647_s24 = sphi %s5707_s24, %s6820_s24   ;;  %s5643_s23 = sphi %s5705_s23, %s6819_s23   ;;  %s5639_s22 = sphi %s5703_s22, %s6818_s22   ;;  %s5635_s21 = sphi %s5701_s21, %s6817_s21  }
   0xa   : > { %p44_p0 = scmp.ne.s32.totalorder %s5639_s22, %s5635_s21  ;;  %p6794_p1 = scmp.eq.s32.totalorder %s5722_s25, 0 }
   0xb   : > { %p179_p3 = scmp.eq.s32.totalorder %s4701_s26, 1  ;;  %p4702_p5 = scmp.ge.s32.totalorder %s5647_s24, 1 }
   0xc   : > { %p5731_p4 = por %p6794_p1, %p44_p0  ;;  %p186_p7 = scmp.lt.s32.totalorder %s5647_s24, 3 }
   0xd   : > { %p5736_p6 = por %p179_p3, %p44_p0  ;;  %s5649_s30 = smov [#allocation5]  }
   0xe   : > { %s6798_s27 = scalar_select %p5731_p4, 1, 0 }
   0xf   : > { %s6799_s28 = scalar_select %p5736_p6, 1, 0 }
  0x10   : > { %p5741_p8 = pnand %p4702_p5, %p186_p7  ;;  %s198_s7 = sshll.u32 %s5649_s30, 4  ;;  %s5745_s7 = int_to_ptr.vmem [resolvable:$true] %s198_s7 }
  0x11   : > { %s5650_s9 = smov [#allocation7]   ;;  %s6802_s1 = sld [smem:[#allocation15_spill]] }
  0x12   : > { %s6800_s29 = scalar_select %p5741_p8, 1, 0 }
  0x13   : > { %p5292_p9 = pneg %p5741_p8  ;;  %s214_s10 = sshll.u32 %s5650_s9, 4  ;;  %s5756_s10 = int_to_ptr.vmem [resolvable:$true] %s214_s10 }
  0x15   : > { %p5752_p11 = pnand %p5292_p9, %p6794_p1 }
  0x17   : > { %s5459_s13 = scalar_lea.hbm %s6802_s1, 6144  ;;  %p5766_p13 = pneg %p5752_p11 }
  0x18   : > { %p5460_p12 = scmp.ne.s32.totalorder %s6802_s1, %s5459_s13  ;;  %p5466_p5 = scmp.lt.u32.totalorder %s5459_s13, %s6802_s1 }
  0x1a   : > { %p5462_p0 = pnand %p5766_p13, %p5460_p12 }
  0x1c   : > { %p5463_p3 = pneg %p5462_p0 }
  0x1e   : > { %p5468_p7 = pnand %p5466_p5, %p5463_p3 }
  0x20   : > { %5471 = shalt.err (!%p5468_p7)
}
  0x21   : > { %s5472_s19 = scalar_lea.vmem %s5745_s7, 6144  ;;  %p5480_p2 = scmp.lt.s32.totalorder %s5745_s7, %s5745_s7 }
  0x22   : > { %p5473_p9 = scmp.ne.s32.totalorder %s5745_s7, %s5472_s19  ;;  %p5481_p6 = scmp.lt.s32.totalorder %s5472_s19, %s5472_s19 }
  0x24   : > { %p5475_p10 = pnand %p5473_p9, %p5766_p13  ;;  %p5482_p12 = por %p5481_p6, %p5480_p2 }
  0x26   : > { %p5476_p1 = pneg %p5475_p10 }
  0x28   : > { %p5483_p0 = pnand %p5482_p12, %p5476_p1 }
  0x2a   : > { %5486 = shalt.err (!%p5483_p0)
}
  0x2b   : > { %s5651_s20 = smov 384   ;;  %s5652_s26 = smov 24  }
  0x2c   : > { %5295 = dma.hbm_to_vmem [thread:$0]  (!%p5752_p11), %s6802_s1, 6144, %s5745_s7, [#allocation6], %s5651_s20, %s5651_s20, %s5652_s26  }
  0x2d   : > { %s5487_s13 = scalar_lea.hbm %s6790_s3, 2048 }
  0x2e   : > { %p5488_p2 = scmp.ne.s32.totalorder %s6790_s3, %s5487_s13  ;;  %p5494_p10 = scmp.lt.u32.totalorder %s5487_s13, %s6790_s3 }
  0x30   : > { %p5490_p1 = pnand %p5488_p2, %p5766_p13 }
  0x32   : > { %p5491_p6 = pneg %p5490_p1 }
  0x34   : > { %p5496_p3 = pnand %p5494_p10, %p5491_p6 }
  0x36   : > { %5499 = shalt.err (!%p5496_p3)
}
  0x37   : > { %s5500_s7 = scalar_lea.vmem %s5756_s10, 2048  ;;  %p5508_p12 = scmp.lt.s32.totalorder %s5756_s10, %s5756_s10 }
  0x38   : > { %p5501_p5 = scmp.ne.s32.totalorder %s5756_s10, %s5500_s7  ;;  %p5509_p0 = scmp.lt.s32.totalorder %s5500_s7, %s5500_s7 }
  0x3a   : > { %p5503_p7 = pnand %p5501_p5, %p5766_p13  ;;  %p5510_p2 = por %p5509_p0, %p5508_p12 }
  0x3c   : > { %p5504_p9 = pneg %p5503_p7 }
  0x3e   : > { %p5511_p1 = pnand %p5510_p2, %p5504_p9 }
  0x40   : > { %5514 = shalt.err (!%p5511_p1)
}
  0x41   : > { %s5653_s19 = smov 128   ;;  %s5654_s20 = smov 8  }
  0x42   : > { %5298 = dma.hbm_to_vmem [thread:$0]  (!%p5752_p11), %s6790_s3, 2048, %s5756_s10, [#allocation6], %s5653_s19, %s5653_s19, %s5654_s20  }
  0x43   : > { %s5655_s9 = smov [#allocation8]   ;;  %s5814_s12 = sadd.s32 1, %s5647_s24  }
  0x44   : > { %s227_s11 = sshll.u32 %s5655_s9, 4  ;;  %s5515_s15 = scalar_lea.hbm %s6791_s4, 2048  ;;  %s228_s11 = int_to_ptr.vmem [resolvable:$true] %s227_s11 }
  0x45   : > { %p5516_p6 = scmp.ne.s32.totalorder %s6791_s4, %s5515_s15  ;;  %p5522_p5 = scmp.lt.u32.totalorder %s5515_s15, %s6791_s4 }
  0x47   : > { %p5518_p10 = pnand %p5516_p6, %p5766_p13 }
  0x49   : > { %p5519_p3 = pneg %p5518_p10 }
  0x4b   : > { %p5524_p7 = pnand %p5522_p5, %p5519_p3 }
  0x4d   : > { %5527 = shalt.err (!%p5524_p7)
}
  0x4e   : > { %s5528_s10 = scalar_lea.vmem %s228_s11, 2048  ;;  %p5536_p2 = scmp.lt.s32.totalorder %s228_s11, %s228_s11 }
  0x4f   : > { %p5529_p9 = scmp.ne.s32.totalorder %s228_s11, %s5528_s10  ;;  %p5537_p1 = scmp.lt.s32.totalorder %s5528_s10, %s5528_s10 }
  0x51   : > { %p5531_p12 = pnand %p5529_p9, %p5766_p13  ;;  %p5538_p4 = por %p5537_p1, %p5536_p2 }
  0x53   : > { %p5532_p0 = pneg %p5531_p12 }
  0x55   : > { %p5539_p8 = pnand %p5538_p4, %p5532_p0 }
  0x57   : > { %5542 = shalt.err (!%p5539_p8)
}
  0x58   : > { %5301 = dma.hbm_to_vmem [thread:$0]  (!%p5752_p11), %s6791_s4, 2048, %s228_s11, [#allocation9], %s5653_s19, %s5653_s19, %s5654_s20  }
  0x59   : > { %s28_s16 = ssub.s32 %s5647_s24, %s5814_s12  ;;  %s31_s8 = sadd.s32 1, %s5643_s23 }
  0x5a   : > { %p29_p4 = scmp.eq.s32.totalorder %s28_s16, 0  ;;  %p38_p8 = scmp.ne.s32.totalorder %s5643_s23, %s5639_s22 }
  0x5b   : > { %p39_p13 = scmp.eq.s32.totalorder %s5647_s24, 0  ;;  %p5313_p6 = scmp.lt.s32.totalorder %s5647_s24, 2 }
  0x5c   : > { %s5845_s30 = scalar_select %p29_p4, %s5643_s23, %s31_s8  }
  0x5d   : > { %p40_p10 = por %p39_p13, %p38_p8  ;;  %p6804_p3 = scmp.eq.s32.totalorder %s5722_s25, 1 }
  0x5e   : > { %s244_s13 = sand.u32 1, %s5643_s23   ;;  %s4805_s14 = sshll.u32 %s5647_s24, 9 }
  0x5f   : > { %p5849_p5 = por %p6804_p3, %p38_p8  ;;  %s4707_s15 = sshll.u32 %s244_s13, 5 }
  0x60   : > { %s5858_s11 = scalar_lea.hbm %s6787_s0, %s4805_s14  ;;  %s248_s7 = scalar_lea.vmem [#allocation2], %s4707_s15 }
  0x61   : > { %s256_s10 = sshll.u32 %s248_s7, 4  ;;  %p5860_p11 = pnand %p5313_p6, %p40_p10  ;;  %s5864_s10 = int_to_ptr.vmem [resolvable:$true] %s256_s10 }
  0x62   : > { %s5866_s26 = scalar_lea.sflag [#allocation3], %s244_s13  ;;  %s5543_s16 = scalar_lea.hbm %s5858_s11, 512 }
  0x63   : > { %p5544_p7 = scmp.ne.s32.totalorder %s5858_s11, %s5543_s16  ;;  %p5545_p9 = pneg %p5860_p11 }
  0x64   : > { %s5548_s15 = scalar_lea.hbm %s6787_s0, 1024  ;;  %p5549_p2 = scmp.lt.u32.totalorder %s5858_s11, %s6787_s0 }
  0x65   : > { %p5546_p12 = pnand %p5545_p9, %p5544_p7  ;;  %p5550_p1 = scmp.lt.u32.totalorder %s5548_s15, %s5543_s16 }
  0x66   : > { %p5552_p8 = scmp.lt.u32.totalorder %s5543_s16, %s5858_s11 }
  0x67   : > { %p5547_p0 = pneg %p5546_p12  ;;  %p5551_p4 = por %p5550_p1, %p5549_p2 }
  0x69   : > { %p5553_p13 = por %p5552_p8, %p5551_p4 }
  0x6b   : > { %p5554_p6 = pnand %p5553_p13, %p5547_p0 }
  0x6d   : > { %5557 = shalt.err (!%p5554_p6)
}
  0x6e   : > { %s5558_s13 = scalar_lea.vmem %s5864_s10, 512  ;;  %s5656_s7 = smov [#allocation2]  }
  0x6f   : > { %p5559_p10 = scmp.ne.s32.totalorder %s5864_s10, %s5558_s13  ;;  %s5563_s8 = sshll.u32 %s5656_s7, 4  ;;  %s5564_s8 = int_to_ptr.vmem [resolvable:$false] %s5563_s8 }
  0x70   : > { %s5565_s14 = scalar_lea.vmem %s5564_s8, 1024  ;;  %p5566_p12 = scmp.lt.s32.totalorder %s5864_s10, %s5564_s8 }
  0x71   : > { %p5561_p3 = pnand %p5559_p10, %p5545_p9  ;;  %p5567_p2 = scmp.lt.s32.totalorder %s5565_s14, %s5558_s13 }
  0x73   : > { %p5562_p7 = pneg %p5561_p3  ;;  %p5568_p1 = por %p5567_p2, %p5566_p12 }
  0x75   : > { %p5569_p4 = pnand %p5568_p1, %p5562_p7 }
  0x77   : > { %5572 = shalt.err (!%p5569_p4)
}
  0x78   : > { %5305 = dma.hbm_to_vmem [thread:$0]  (!%p5860_p11), %s5858_s11, 512, %s5864_s10, %s5866_s26, %s5653_s19, %s5653_s19, %s5654_s20  }
  0x79   : > { %p6807_p9 = scmp.ne.s32.totalorder %s6800_s29, 0 }
  0x7a   : > { %s5900_s16 = sand.u32 (!%p6807_p9), 1, %s5639_s22   ;;  %p6808_p0 = scmp.ne.s32.totalorder (!%p6807_p9), %s6798_s27, 0 }
  0x7b   : > { %268 = sbr.rel (%p6807_p9) target bundleno = 1595 (0x63b), region = 44  ;;  %s4712_s15 = sshll.u32 (!%p6807_p9), %s5900_s16, 5 }
  0x7c   : > { %s271_s17 = scalar_lea.sflag (!%p6807_p9), [#allocation3], %s5900_s16  ;;  %s5906_s1 = scalar_lea.vmem (!%p6807_p9), [#allocation2], %s4712_s15 }
  0x82   : > { %5618 = dma.done.wait (%p6808_p0), %s271_s17, 512  }
  0x83   : > { %5620 = vsyncadd (%p6808_p0), %s271_s17, 4294966784  ;;  %p6809_p11 = scmp.eq.s32.totalorder %s5722_s25, 0 }
  0x85   : > { %5622 = dma.done.wait (%p6809_p11), [#allocation6], 8192   ;;  %p6810_p8 = pmov %p6809_p11 }
  0x87   : > { %5624 = vsyncadd (%p6810_p8), [#allocation6], 4294959104  ;;  %p6811_p13 = pmov %p6810_p8 }
  0x88   : > { %p6812_p6 = pmov %p6810_p8 }
  0x89   : > { %5626 = dma.done.wait (%p6811_p13), [#allocation9], 2048  }
  0x8a   : > { %5628 = vsyncadd (%p6812_p6), [#allocation9], 4294965248  ;;  %v5657_v0 = vmov 0.0   ;;  %v322_v1 = vld [vmem:[#allocation5 + $0x8] sm:$0xff]  ;;  %v325_v2 = vld [vmem:[#allocation5 + $0x20] sm:$0xff]  ;;  %s5658_s19 = smov 64  }
  0x8b   : > { %450 = vmatprep.mubr.f32.mxu0 %v5657_v0  ;;  %v321_v3 = vld [vmem:[#allocation5] sm:$0xff]  ;;  %v5100_v4 = vpack.c.bf16 %v325_v2, %v322_v1  ;;  %v324_v5 = vld [vmem:[#allocation5 + $0x18] sm:$0xff]  ;;  %v331_v7 = vld [vmem:[#allocation5 + $0x50] sm:$0xff]  ;;  %s5659_s20 = smov 96   ;;  %s5660_s11 = smov 32   ;;  %vm2312_vm0 = vcmask 261120  }
  0x8c   : > { %v328_v6 = vld [vmem:[#allocation5 + $0x38] sm:$0xff]  ;;  %v5102_v8 = vpack.c.bf16 %v324_v5, %v321_v3  ;;  %v327_v10 = vld [vmem:[#allocation5 + $0x30] sm:$0xff]  ;;  %v330_v11 = vld [vmem:[#allocation5 + $0x48] sm:$0xff]  ;;  %vm3041_vm2 = vcmask 130048   ;;  %vm4462_vm3 = vcmask 523264   ;;  %vm4467_vm4 = vcmask 785408  }
  0x8d   : > { %v5104_v9 = vpack.c.bf16 %v331_v7, %v328_v6  ;;  %v334_v12 = vld [vmem:[#allocation5 + $0x68] sm:$0xff]  ;;  %5101 = vmatprep.subr.bf16.mxu0 %v5100_v4  ;;  %v337_v13 = vld [vmem:[#allocation5 + $0x80] sm:$0xff]  ;;  %v5106_v14 = vpack.c.bf16 %v330_v11, %v327_v10  ;;  %v336_v17 = vld [vmem:[#allocation5 + $0x78] sm:$0xff]  ;;  %s314_s18 = scalar_lea.vmem [#allocation10], %s4712_s15  ;;  %s4807_s7 = sshll.u32 %s5722_s25, 9 }
  0x8e   : > { %5103 = vmatpush1.bf16.msra.mxu0 %v5102_v8  ;;  %v5108_v15 = vpack.c.bf16 %v337_v13, %v334_v12  ;;  %v333_v16 = vld [vmem:[#allocation5 + $0x60] sm:$0xff]  ;;  %v340_v18 = vld [vmem:[#allocation5 + $0x98] sm:$0xff]  ;;  %v343_v19 = vld [vmem:[#allocation5 + $0xb0] sm:$0xff]  ;;  %s4599_s13 = sshll.u32 %s314_s18, 4  ;;  %s6743_s17 = scalar_lea.hbm %s6793_s6, %s4807_s7  ;;  %s6738_s13 = int_to_ptr.vmem [resolvable:$true] %s4599_s13 }
  0x8f   : > { %5105 = vmatprep.subr.bf16.mxu0 %v5104_v9  ;;  %v5110_v20 = vpack.c.bf16 %v336_v17, %v333_v16  ;;  %v5112_v21 = vpack.c.bf16 %v343_v19, %v340_v18  ;;  %v339_v22 = vld [vmem:[#allocation5 + $0x90] sm:$0xff]  ;;  %v342_v23 = vld [vmem:[#allocation5 + $0xa8] sm:$0xff]  ;;  %v349_v25 = vld [vmem:[#allocation5 + $0xe0] sm:$0xff]  ;;  %s4585_s15 = scalar_lea.sflag [#allocation4], %s5900_s16  ;;  %s5663_s25 = smov [#allocation10]  }
  0x90   : > { %v346_v24 = vld [vmem:[#allocation5 + $0xc8] sm:$0xff]  ;;  %v5922_v26 = vld [vmem:[%s5906_s1] sm:$0xff]  ;;  %v5114_v28 = vpack.c.bf16 %v342_v23, %v339_v22  ;;  %v323_v29 = vld [vmem:[#allocation5 + $0x10] sm:$0xff]  ;;  %s5577_s27 = sshll.u32 %s5663_s25, 4  ;;  %s5578_s27 = int_to_ptr.vmem [resolvable:$false] %s5577_s27 }
  0x91   : > { %v345_v27 = vld [vmem:[#allocation5 + $0xc0] sm:$0xff]  ;;  %4944 = vmatprep.mubr.f32.mxu1 %v5922_v26  ;;  %v326_v30 = vld [vmem:[#allocation5 + $0x28] sm:$0xff]  ;;  %v5116_v32 = vpack.c.bf16 %v349_v25, %v346_v24  ;;  %v348_v33 = vld [vmem:[#allocation5 + $0xd8] sm:$0xff]  ;;  %s5579_s29 = scalar_lea.vmem %s5578_s27, 1024  ;;  %p5580_p12 = scmp.lt.s32.totalorder %s6738_s13, %s5578_s27 }
  0x92   : > { %5107 = vmatpush1.bf16.msra.mxu0 %v5106_v14  ;;  %v329_v31 = vld [vmem:[#allocation5 + $0x40] sm:$0xff]  ;;  %v352_v34 = vld [vmem:[#allocation5 + $0xf8] sm:$0xff]  ;;  %v5132_v35 = vpack.c.bf16 %v326_v30, %v323_v29  ;;  %v355_v37 = vld [vmem:[#allocation5 + $0x110] sm:$0xff]  ;;  %v5118_v41 = vpack.c.bf16 %v348_v33, %v345_v27  ;;  %v371_v14 = vlaneseq }
  0x93   : > { %5109 = vmatprep.subr.bf16.mxu0 %v5108_v15  ;;  %v332_v36 = vld [vmem:[#allocation5 + $0x58] sm:$0xff]  ;;  %v335_v39 = vld [vmem:[#allocation5 + $0x70] sm:$0xff]  ;;  %v338_v40 = vld [vmem:[#allocation5 + $0x88] sm:$0xff]  ;;  %v5120_v42 = vpack.c.bf16 %v355_v37, %v352_v34 }
  0x94   : > { %v5136_v38 = vpack.c.bf16 %v332_v36, %v329_v31  ;;  %5133 = vmatprep.subr.bf16.mxu1 %v5132_v35  ;;  %v351_v43 = vld [vmem:[#allocation5 + $0xf0] sm:$0xff]  ;;  %v354_v44 = vld [vmem:[#allocation5 + $0x108] sm:$0xff]  ;;  %v5140_v46 = vpack.c.bf16 %v338_v40, %v335_v39  ;;  %v361_v47 = vld [vmem:[#allocation5 + $0x140] sm:$0xff]  ;;  %v5932_v15 = vshrl.u32 %v371_v14, 7 }
  0x95   : > { %5135 = vmatpush3.bf16.msra.mxu1 %v5132_v35  ;;  %v358_v45 = vld [vmem:[#allocation5 + $0x128] sm:$0xff]  ;;  %v341_v48 = vld [vmem:[#allocation5 + $0xa0] sm:$0xff]  ;;  %v344_v49 = vld [vmem:[#allocation5 + $0xb8] sm:$0xff]  ;;  %v5122_v50 = vpack.c.bf16 %v354_v44, %v351_v43 }
  0x96   : > { %5111 = vmatpush1.bf16.msra.mxu0 %v5110_v20  ;;  %5137 = vmatprep.subr.bf16.mxu1 %v5136_v38  ;;  %v5124_v51 = vpack.c.bf16 %v361_v47, %v358_v45  ;;  %v357_v52 = vld [vmem:[#allocation5 + $0x120] sm:$0xff]  ;;  %v360_v53 = vld [vmem:[#allocation5 + $0x138] sm:$0xff]  ;;  %v5144_v55 = vpack.c.bf16 %v344_v49, %v341_v48  ;;  %v367_v56 = vld [vmem:[#allocation5 + $0x170] sm:$0xff]  ;;  %v377_v16 = vsub.s32 1, %v5932_v15  ;;  %v373_v23 = vsub.s32 0, %v5932_v15 }
  0x97   : > { %5113 = vmatprep.subr.bf16.mxu0 %v5112_v21  ;;  %v364_v54 = vld [vmem:[#allocation5 + $0x158] sm:$0xff]  ;;  %v347_v57 = vld [vmem:[#allocation5 + $0xd0] sm:$0xff]  ;;  %v350_v58 = vld [vmem:[#allocation5 + $0xe8] sm:$0xff]  ;;  %v5126_v59 = vpack.c.bf16 %v360_v53, %v357_v52  ;;  %v381_v36 = vsub.s32 2, %v5932_v15  ;;  %v5662_v48 = vmov 1934713408  }
  0x98   : > { %v5128_v60 = vpack.c.bf16 %v367_v56, %v364_v54  ;;  %v363_v61 = vld [vmem:[#allocation5 + $0x150] sm:$0xff]  ;;  %v366_v62 = vld [vmem:[#allocation5 + $0x168] sm:$0xff]  ;;  %v5148_v63 = vpack.c.bf16 %v350_v58, %v347_v57  ;;  %v353_v1 = vld [vmem:[#allocation5 + $0x100] sm:$0xff]  ;;  %v635_v49 = vunpack.c.l.s4 %v5662_v48 }
  0x99   : > { %5139 = vmatpush3.bf16.msra.mxu1 %v5136_v38  ;;  %v356_v2 = vld [vmem:[#allocation5 + $0x118] sm:$0xff]  ;;  %v5130_v3 = vpack.c.bf16 %v366_v62, %v363_v61  ;;  %v359_v5 = vld [vmem:[#allocation5 + $0x130] sm:$0xff]  ;;  %v362_v6 = vld [vmem:[#allocation5 + $0x148] sm:$0xff] }
  0x9a   : > { %5115 = vmatpush1.bf16.msra.mxu0 %v5114_v28  ;;  %5141 = vmatprep.subr.bf16.mxu1 %v5140_v46  ;;  %v5152_v4 = vpack.c.bf16 %v356_v2, %v353_v1  ;;  %v5156_v7 = vpack.c.bf16 %v362_v6, %v359_v5  ;;  %v318_v8 = vld [vmem:[%s5906_s1 + $0x8] sm:$0xff]  ;;  %v319_v9 = vld [vmem:[%s5906_s1 + $0x10] sm:$0xff]  ;;  %v320_v10 = vld [vmem:[%s5906_s1 + $0x18] sm:$0xff]  ;;  %v636_v53 = vunpack.c.0.s8 %v635_v49  ;;  %s5573_s1 = scalar_lea.vmem %s6738_s13, 512 }
  0x9b   : > { %5117 = vmatprep.subr.bf16.mxu0 %v5116_v32  ;;  %v365_v11 = vld [vmem:[#allocation5 + $0x160] sm:$0xff]  ;;  %v368_v12 = vld [vmem:[#allocation5 + $0x178] sm:$0xff]  ;;  %vm6164_vm1 = vmpackc.low %vm2312_vm0, %vm2312_vm0  ;;  %p5574_p10 = scmp.ne.s32.totalorder %s6738_s13, %s5573_s1  ;;  %p5581_p2 = scmp.lt.s32.totalorder %s5579_s29, %s5573_s1 }
  0x9c   : > { %v5160_v13 = vpack.c.bf16 %v368_v12, %v365_v11  ;;  %v369_v17 = vld [vmem:[%s6789_s2] sm:$0x7]  ;;  %v6038_v61 = vsub.s32 %v636_v53, %v5932_v15 }
  0x9d   : > { %5143 = vmatpush3.bf16.msra.mxu1 %v5140_v46  ;;  %v374_v27 = vrot.slane %v369_v17, %v373_v23  ;;  %v382_v39 = vrot.slane %v369_v17, %v381_v36  ;;  %v5661_v46 = vmov 1983009808   ;;  %p5575_p3 = pnand %p5574_p10, %p5849_p5  ;;  %p5582_p1 = por %p5581_p2, %p5580_p12 }
  0x9e   : > { %5119 = vmatpush1.bf16.msra.mxu0 %v5118_v41  ;;  %5145 = vmatprep.subr.bf16.mxu1 %v5144_v55  ;;  %v603_v47 = vunpack.c.l.s4 %v5661_v46 }
  0x9f   : > { %5121 = vmatprep.subr.bf16.mxu0 %v5120_v42  ;;  %p5576_p7 = pneg %p5575_p3 }
  0xa1   : > { %5147 = vmatpush3.bf16.msra.mxu1 %v5144_v55  ;;  %p5583_p4 = pnand %p5582_p1, %p5576_p7 }
  0xa2   : > { %5123 = vmatpush1.bf16.msra.mxu0 %v5122_v50  ;;  %5149 = vmatprep.subr.bf16.mxu1 %v5148_v63  ;;  %v604_v50 = vunpack.c.0.s8 %v603_v47 }
  0xa3   : > { %5125 = vmatprep.subr.bf16.mxu0 %v5124_v51 }
  0xa4   : > { %v6033_v54 = vsub.s32 %v604_v50, %v5932_v15 }
  0xa5   : > { %5151 = vmatpush3.bf16.msra.mxu1 %v5148_v63 }
  0xa6   : > { %5127 = vmatpush1.bf16.msra.mxu0 %v5126_v59  ;;  %5153 = vmatprep.subr.bf16.mxu1 %v5152_v4 }
  0xa7   : > { %5129 = vmatprep.subr.bf16.mxu0 %v5128_v60 }
  0xa9   : > { %5155 = vmatpush3.bf16.msra.mxu1 %v5152_v4 }
  0xaa   : > { %5131 = vmatpush1.bf16.msra.mxu0 %v5130_v3  ;;  %5157 = vmatprep.subr.bf16.mxu1 %v5156_v7 }
  0xad   : > { %451 = vmatmul.mubr.f32.vlgmr.msra.gmra.mrb[0].mxu0 %v5922_v26  ;;  %5159 = vmatpush3.bf16.msra.mxu1 %v5156_v7 }
  0xae   : > { %456 = vmatprep.mubr.f32.mxu0 %v5657_v0  ;;  %5161 = vmatprep.subr.bf16.mxu1 %v5160_v13 }
  0xb1   : > { %457 = vmatmul.mubr.f32.gmra.mrb[2].mxu0 %v318_v8  ;;  %5163 = vmatpush3.bf16.msra.mxu1 %v5160_v13 }
  0xb2   : > { %462 = vmatprep.mubr.f32.mxu0 %v5657_v0 }
  0xb4   : > { %4945 = vmatmul.mubr.f32.vlgmr.msra.gmra.mrb[0].mxu1 %v318_v8 }
  0xb5   : > { %463 = vmatmul.mubr.f32.gmra.mrb[4].mxu0 %v319_v9  ;;  %4947 = vmatprep.mubr.f32.mxu1 %v319_v9 }
  0xb6   : > { %468 = vmatprep.mubr.f32.mxu0 %v5657_v0  ;;  %v378_v0 = vrot.slane %v369_v17, %v377_v16 }
  0xb8   : > { %4948 = vmatmul.mubr.f32.gmra.mrb[2].mxu1 %v320_v10 }
  0xb9   : > { %469 = vmatmul.mubr.f32.gmra.mrb[6].mxu0 %v320_v10 }
 0x180   : > { %v452_v18 = vpop.f32.mrb[0].mxu0 }
 0x181   : > { %v454_v19 = vpop.f32.mrb[1].mxu0  ;;  %v5955_v30 = vadd.f32 %v452_v18, %v374_v27 }
 0x182   : > { %v5938_v20 = vadd.f32 %v454_v19, %v378_v0 }
 0x184   : > { %v458_v21 = vpop.f32.mrb[2].mxu0  ;;  %1160 = vrot.lane.b32.xlu1 %v5938_v20, %s5658_s19  ;;  %1148 = vrot.lane.b32.xlu0 %v5938_v20, %s5659_s20 }
 0x185   : > { %v460_v22 = vpop.f32.mrb[3].mxu0  ;;  %v5961_v31 = vadd.f32 %v458_v21, %v374_v27 }
 0x186   : > { %v5945_v24 = vadd.f32 %v460_v22, %v378_v0 }
 0x187   : > { %v4946_v37 = vpop.f32.mrb[0].mxu1 }
 0x188   : > { %1162 = vrot.lane.b32.xlu1 %v5945_v24, %s5658_s19  ;;  %1172 = vrot.lane.b32.xlu0 %v5938_v20, %s5660_s11  ;;  %v464_v25 = vpop.f32.mrb[4].mxu0  ;;  %v541_v38 = vpop.f32.mrb[1].mxu1  ;;  %v6004_v42 = vadd.f32 %v4946_v37, %v382_v39 }
 0x189   : > { %v466_v26 = vpop.f32.mrb[5].mxu0  ;;  %v5987_v34 = vadd.f32 %v464_v25, %v374_v27  ;;  %v6006_v43 = vadd.f32 %v541_v38, %v382_v39 }
 0x18a   : > { %v5973_v33 = vadd.f32 %v466_v26, %v378_v0 }
 0x18b   : > { %v4949_v40 = vpop.f32.mrb[2].mxu1 }
 0x18c   : > { %1174 = vrot.lane.b32.xlu1 %v5945_v24, %s5660_s11  ;;  %1150 = vrot.lane.b32.xlu0 %v5945_v24, %s5659_s20  ;;  %v470_v28 = vpop.f32.mrb[6].mxu0  ;;  %v551_v41 = vpop.f32.mrb[3].mxu1  ;;  %v6016_v44 = vadd.f32 %v4949_v40, %v382_v39 }
 0x18d   : > { %v472_v29 = vpop.f32.mrb[7].mxu0  ;;  %v5993_v35 = vadd.f32 %v470_v28, %v374_v27  ;;  %v6024_v45 = vadd.f32 %v551_v41, %v382_v39 }
 0x18e   : > { %v5967_v32 = vadd.f32 %v472_v29, %v378_v0 }
 0x190   : > { %576 = vrot.lane.b32.xlu1 %v5955_v30, %s5658_s19  ;;  %564 = vrot.lane.b32.xlu0 %v5955_v30, %s5659_s20 }
 0x194   : > { %566 = vrot.lane.b32.xlu1 %v5961_v31, %s5659_s20  ;;  %588 = vrot.lane.b32.xlu0 %v5955_v30, %s5660_s11 }
 0x198   : > { %590 = vrot.lane.b32.xlu1 %v5961_v31, %s5660_s11  ;;  %578 = vrot.lane.b32.xlu0 %v5961_v31, %s5658_s19 }
 0x19c   : > { %1154 = vrot.lane.b32.xlu1 %v5967_v32, %s5659_s20  ;;  %1152 = vrot.lane.b32.xlu0 %v5973_v33, %s5659_s20 }
 0x1a0   : > { %1166 = vrot.lane.b32.xlu1 %v5967_v32, %s5658_s19  ;;  %1164 = vrot.lane.b32.xlu0 %v5973_v33, %s5658_s19 }
 0x1a4   : > { %1178 = vrot.lane.b32.xlu1 %v5967_v32, %s5660_s11  ;;  %1176 = vrot.lane.b32.xlu0 %v5973_v33, %s5660_s11 }
 0x1a8   : > { %580 = vrot.lane.b32.xlu1 %v5987_v34, %s5658_s19  ;;  %568 = vrot.lane.b32.xlu0 %v5987_v34, %s5659_s20 }
 0x1ac   : > { %570 = vrot.lane.b32.xlu1 %v5993_v35, %s5659_s20  ;;  %592 = vrot.lane.b32.xlu0 %v5987_v34, %s5660_s11 }
 0x1b0   : > { %594 = vrot.lane.b32.xlu1 %v5993_v35, %s5660_s11  ;;  %582 = vrot.lane.b32.xlu0 %v5993_v35, %s5658_s19 }
 0x1b4   : > { %1732 = vrot.lane.b32.xlu1 %v6006_v43, %s5659_s20  ;;  %1734 = vrot.lane.b32.xlu0 %v6004_v42, %s5659_s20 }
 0x1b8   : > { %1744 = vrot.lane.b32.xlu1 %v6006_v43, %s5658_s19  ;;  %1756 = vrot.lane.b32.xlu0 %v6006_v43, %s5660_s11 }
 0x1bc   : > { %1746 = vrot.lane.b32.xlu1 %v6004_v42, %s5658_s19  ;;  %1738 = vrot.lane.b32.xlu0 %v6016_v44, %s5659_s20 }
 0x1c0   : > { %1758 = vrot.lane.b32.xlu1 %v6004_v42, %s5660_s11 }
 0x1c4   : > { %1736 = vrot.lane.b32.xlu1 %v6024_v45, %s5659_s20 }
 0x1c8   : > { %1748 = vrot.lane.b32.xlu1 %v6024_v45, %s5658_s19 }
 0x1cc   : > { %1750 = vrot.lane.b32.xlu1 %v6016_v44, %s5658_s19 }
 0x1f6   : > { %v1161_v51 = vpop.permute.xlu1 %1160  ;;  %v1149_v52 = vpop.permute.xlu0 %1148 }
 0x1f7   : > { %v1184_v55 = vcombine.low %v5938_v20, %v1161_v51  ;;  %v1185_v56 = vcombine.high %v5938_v20, %v1161_v51 }
 0x1f9   : > { %v1192_v62 = vrot.slane %v1184_v55, %v6033_v54  ;;  %v1199_v63 = vrot.slane %v1185_v56, %v6033_v54 }
 0x1fa   : > { %v1163_v57 = vpop.permute.xlu1 %1162  ;;  %v1173_v58 = vpop.permute.xlu0 %1172 }
 0x1fb   : > { %v1200_v59 = vcombine.low %v1149_v52, %v1173_v58  ;;  %v1201_v60 = vcombine.high %v1149_v52, %v1173_v58  ;;  %v1252_v3 = vcombine.low %v5945_v24, %v1163_v57  ;;  %v1253_v4 = vcombine.high %v5945_v24, %v1163_v57 }
 0x1fd   : > { %v1208_v1 = vrot.slane %v1200_v59, %v6033_v54  ;;  %v1215_v2 = vrot.slane %v1201_v60, %v6033_v54  ;;  %v1260_v17 = vrot.slane %v1252_v3, %v6033_v54  ;;  %v1267_v0 = vrot.slane %v1253_v4, %v6033_v54 }
 0x1fe   : > { %v1175_v5 = vpop.permute.xlu1 %1174  ;;  %v1151_v6 = vpop.permute.xlu0 %1150 }
 0x1ff   : > { %v1216_v7 = vcombine.low %v1192_v62, %v1208_v1  ;;  %v1217_v8 = vcombine.high %v1192_v62, %v1208_v1  ;;  %v1232_v9 = vcombine.low %v1199_v63, %v1215_v2  ;;  %v1233_v10 = vcombine.high %v1199_v63, %v1215_v2 }
 0x200   : > { %v1268_v11 = vcombine.low %v1151_v6, %v1175_v5  ;;  %v1269_v12 = vcombine.high %v1151_v6, %v1175_v5 }
 0x201   : > { %v1224_v13 = vrot.slane %v1216_v7, %v6038_v61  ;;  %v1231_v14 = vrot.slane %v1217_v8, %v6038_v61  ;;  %v1240_v15 = vrot.slane %v1232_v9, %v6038_v61  ;;  %v1247_v16 = vrot.slane %v1233_v10, %v6038_v61 }
 0x202   : > { %v1276_v18 = vrot.slane %v1268_v11, %v6033_v54  ;;  %v1283_v19 = vrot.slane %v1269_v12, %v6033_v54  ;;  %v577_v20 = vpop.permute.xlu1 %576  ;;  %v565_v21 = vpop.permute.xlu0 %564 }
 0x203   : > { %v1456_v22 = vcombine.low %v1224_v13, %v1231_v14  ;;  %v4725_v23 = vcombine.high %v1224_v13, %v1231_v14  ;;  %v1472_v24 = vcombine.low %v1240_v15, %v1247_v16  ;;  %v4726_v25 = vcombine.high %v1240_v15, %v1247_v16 }
 0x204   : > { %v1284_v26 = vcombine.low %v1260_v17, %v1276_v18  ;;  %v1285_v27 = vcombine.high %v1260_v17, %v1276_v18  ;;  %v1300_v28 = vcombine.low %v1267_v0, %v1283_v19  ;;  %v1301_v29 = vcombine.high %v1267_v0, %v1283_v19 }
 0x205   : > { %v6055_v36 = vrot.slane %v1456_v22, %v6033_v54  ;;  %v6058_v37 = vrot.slane %v4725_v23, %v6033_v54  ;;  %v600_v48 = vcombine.low %v5955_v30, %v577_v20  ;;  %v601_v49 = vcombine.high %v5955_v30, %v577_v20 }
 0x206   : > { %v1292_v38 = vrot.slane %v1284_v26, %v6038_v61  ;;  %v1299_v39 = vrot.slane %v1285_v27, %v6038_v61  ;;  %v1308_v40 = vrot.slane %v1300_v28, %v6038_v61  ;;  %v1315_v41 = vrot.slane %v1301_v29, %v6038_v61  ;;  %v567_v46 = vpop.permute.xlu1 %566  ;;  %v589_v47 = vpop.permute.xlu0 %588 }
 0x207   : > { %v616_v50 = vcombine.low %v565_v21, %v589_v47  ;;  %v617_v51 = vcombine.high %v565_v21, %v589_v47  ;;  %v6067_v52 = vrot.slane %v1472_v24, %v6033_v54  ;;  %v6070_v53 = vrot.slane %v4726_v25, %v6033_v54 }
 0x208   : > { %v1524_v55 = vcombine.low %v1292_v38, %v1299_v39  ;;  %v4727_v56 = vcombine.high %v1292_v38, %v1299_v39  ;;  %v608_v57 = vrot.slane %v600_v48, %v6033_v54  ;;  %v615_v58 = vrot.slane %v601_v49, %v6033_v54 }
 0x209   : > { %v624_v59 = vrot.slane %v616_v50, %v6033_v54  ;;  %v631_v60 = vrot.slane %v617_v51, %v6033_v54  ;;  %v1540_v63 = vcombine.low %v1308_v40, %v1315_v41  ;;  %v4728_v1 = vcombine.high %v1308_v40, %v1315_v41 }
 0x20a   : > { %v6077_v30 = vrot.slane %v1524_v55, %v6033_v54  ;;  %v6080_v62 = vrot.slane %v4727_v56, %v6033_v54  ;;  %v591_v2 = vpop.permute.xlu1 %590  ;;  %v579_v3 = vpop.permute.xlu0 %578 }
 0x20b   : > { %v632_v4 = vcombine.low %v608_v57, %v624_v59  ;;  %v633_v5 = vcombine.high %v608_v57, %v624_v59  ;;  %v648_v6 = vcombine.low %v615_v58, %v631_v60  ;;  %v649_v7 = vcombine.high %v615_v58, %v631_v60 }
 0x20c   : > { %v684_v8 = vcombine.low %v567_v46, %v591_v2  ;;  %v685_v9 = vcombine.high %v567_v46, %v591_v2  ;;  %v668_v10 = vcombine.low %v5961_v31, %v579_v3  ;;  %v669_v11 = vcombine.high %v5961_v31, %v579_v3 }
 0x20d   : > { %v640_v12 = vrot.slane %v632_v4, %v6038_v61  ;;  %v647_v13 = vrot.slane %v633_v5, %v6038_v61  ;;  %v656_v14 = vrot.slane %v648_v6, %v6038_v61  ;;  %v663_v15 = vrot.slane %v649_v7, %v6038_v61 }
 0x20e   : > { %v692_v16 = vrot.slane %v684_v8, %v6033_v54  ;;  %v699_v17 = vrot.slane %v685_v9, %v6033_v54  ;;  %v676_v0 = vrot.slane %v668_v10, %v6033_v54  ;;  %v683_v18 = vrot.slane %v669_v11, %v6033_v54  ;;  %v6092_v19 = vpop.permute.xlu1 %1154  ;;  %v6094_v20 = vpop.permute.xlu0 %1152 }
 0x20f   : > { %v6097_v31 = vrot.slane %v1540_v63, %v6033_v54  ;;  %v6100_v21 = vrot.slane %v4728_v1, %v6033_v54  ;;  %v872_v22 = vcombine.low %v640_v12, %v647_v13  ;;  %v4717_v23 = vcombine.high %v640_v12, %v647_v13 }
 0x210   : > { %v700_v24 = vcombine.low %v676_v0, %v692_v16  ;;  %v701_v25 = vcombine.high %v676_v0, %v692_v16  ;;  %v716_v26 = vcombine.low %v683_v18, %v699_v17  ;;  %v717_v27 = vcombine.high %v683_v18, %v699_v17 }
 0x211   : > { %v6103_v28 = vrot.slane %v872_v22, %v6033_v54  ;;  %v6106_v29 = vrot.slane %v4717_v23, %v6033_v54  ;;  %v888_v38 = vcombine.low %v656_v14, %v663_v15  ;;  %v4718_v39 = vcombine.high %v656_v14, %v663_v15 }
 0x212   : > { %v708_v40 = vrot.slane %v700_v24, %v6038_v61  ;;  %v715_v41 = vrot.slane %v701_v25, %v6038_v61  ;;  %v724_v46 = vrot.slane %v716_v26, %v6038_v61  ;;  %v731_v47 = vrot.slane %v717_v27, %v6038_v61  ;;  %v1167_v48 = vpop.permute.xlu1 %1166  ;;  %v1165_v49 = vpop.permute.xlu0 %1164 }
 0x213   : > { %v1388_v50 = vcombine.low %v5967_v32, %v1167_v48  ;;  %v1389_v51 = vcombine.high %v5967_v32, %v1167_v48  ;;  %v1320_v55 = vcombine.low %v5973_v33, %v1165_v49  ;;  %v1321_v56 = vcombine.high %v5973_v33, %v1165_v49 }
 0x214   : > { %v940_v57 = vcombine.low %v708_v40, %v715_v41  ;;  %v4719_v58 = vcombine.high %v708_v40, %v715_v41  ;;  %v956_v59 = vcombine.low %v724_v46, %v731_v47  ;;  %v4720_v60 = vcombine.high %v724_v46, %v731_v47 }
 0x215   : > { %v6117_v63 = vrot.slane %v888_v38, %v6033_v54  ;;  %v6120_v1 = vrot.slane %v4718_v39, %v6033_v54  ;;  %v1396_v2 = vrot.slane %v1388_v50, %v6033_v54  ;;  %v1403_v3 = vrot.slane %v1389_v51, %v6033_v54 }
 0x216   : > { %v6125_v32 = vrot.slane %v940_v57, %v6033_v54  ;;  %v6128_v4 = vrot.slane %v4719_v58, %v6033_v54  ;;  %v6131_v33 = vrot.slane %v956_v59, %v6033_v54  ;;  %v6134_v5 = vrot.slane %v4720_v60, %v6033_v54  ;;  %v1179_v6 = vpop.permute.xlu1 %1178  ;;  %v1177_v11 = vpop.permute.xlu0 %1176 }
 0x217   : > { %v1488_v7 = vcombine.low %v6055_v36, %v6058_v37  ;;  %v1504_v8 = vcombine.low %v6067_v52, %v6070_v53  ;;  %v1556_v9 = vcombine.low %v6077_v30, %v6080_v62  ;;  %v1572_v10 = vcombine.low %v6097_v31, %v6100_v21 }
 0x218   : > { %v972_v12 = vcombine.low %v6125_v32, %v6128_v4  ;;  %v988_v13 = vcombine.low %v6131_v33, %v6134_v5  ;;  %v1328_v14 = vrot.slane %v1320_v55, %v6033_v54  ;;  %v1335_v15 = vrot.slane %v1321_v56, %v6033_v54 }
 0x219   : > { %v1496_v16 = vrot.slane %v1488_v7, %v6038_v61  ;;  %v1512_v17 = vrot.slane %v1504_v8, %v6038_v61  ;;  %v1564_v0 = vrot.slane %v1556_v9, %v6038_v61  ;;  %v1580_v18 = vrot.slane %v1572_v10, %v6038_v61 }
 0x21a   : > { %v6155_v22 = vrot.slane %v972_v12, %v6038_v61  ;;  %v6158_v23 = vrot.slane %v988_v13, %v6038_v61  ;;  %v1404_v24 = vcombine.low %v6092_v19, %v1179_v6  ;;  %v1405_v25 = vcombine.high %v6092_v19, %v1179_v6  ;;  %v581_v40 = vpop.permute.xlu1 %580  ;;  %v6176_v56 = vpop.permute.xlu0 %568 }
 0x21b   : > { %v1520_v26 = vcombine.low %v1496_v16, %v1512_v17  ;;  %v1588_v27 = vcombine.low %v1564_v0, %v1580_v18  ;;  %v1521_v38 = vcombine.high %v1496_v16, %v1512_v17  ;;  %v1589_v39 = vcombine.high %v1564_v0, %v1580_v18 }
 0x21c   : > { %v1412_v46 = vrot.slane %v1404_v24, %v6033_v54  ;;  %v1419_v47 = vrot.slane %v1405_v25, %v6033_v54  ;;  %v1336_v48 = vcombine.low %v6094_v20, %v1177_v11  ;;  %v1337_v49 = vcombine.high %v6094_v20, %v1177_v11 }
 0x21d   : > { %v5164_v19 = vpack.c.bf16 %v1588_v27, %v1520_v26  ;;  %v5170_v50 = vpack.c.bf16 %v1589_v39, %v1521_v38  ;;  %v904_v51 = vcombine.low %v6103_v28, %v6106_v29  ;;  %v920_v55 = vcombine.low %v6117_v63, %v6120_v1 }
 0x21e   : > { %v1420_v57 = vcombine.low %v1396_v2, %v1412_v46  ;;  %v1421_v58 = vcombine.high %v1396_v2, %v1412_v46  ;;  %v1436_v59 = vcombine.low %v1403_v3, %v1419_v47  ;;  %v1437_v60 = vcombine.high %v1403_v3, %v1419_v47  ;;  %v571_v17 = vpop.permute.xlu1 %570  ;;  %v593_v46 = vpop.permute.xlu0 %592 }
 0x21f   : > { %5166 = vmatprep.subr.msk.bf16.mxu1 %vm6164_vm1, %v5164_v19  ;;  %v1344_v6 = vrot.slane %v1336_v48, %v6033_v54  ;;  %v1351_v20 = vrot.slane %v1337_v49, %v6033_v54  ;;  %v912_v7 = vrot.slane %v904_v51, %v6038_v61  ;;  %v928_v8 = vrot.slane %v920_v55, %v6038_v61 }
 0x220   : > { %5169 = vmatpush3.bf16.xpose.msk.msra.mxu1 %vm6164_vm1, %v5164_v19  ;;  %v1428_v9 = vrot.slane %v1420_v57, %v6038_v61  ;;  %v1435_v2 = vrot.slane %v1421_v58, %v6038_v61  ;;  %v1444_v3 = vrot.slane %v1436_v59, %v6038_v61  ;;  %v1451_v10 = vrot.slane %v1437_v60, %v6038_v61 }
 0x221   : > { %5172 = vmatprep.subr.msk.bf16.mxu1 %vm6164_vm1, %v5170_v50  ;;  %v1352_v11 = vcombine.low %v1328_v14, %v1344_v6  ;;  %v1353_v12 = vcombine.high %v1328_v14, %v1344_v6  ;;  %v1368_v13 = vcombine.low %v1335_v15, %v1351_v20  ;;  %v1369_v16 = vcombine.high %v1335_v15, %v1351_v20 }
 0x222   : > { %v1660_v0 = vcombine.low %v1428_v9, %v1435_v2  ;;  %v4731_v18 = vcombine.high %v1428_v9, %v1435_v2  ;;  %v1676_v24 = vcombine.low %v1444_v3, %v1451_v10  ;;  %v4732_v25 = vcombine.high %v1444_v3, %v1451_v10  ;;  %v595_v9 = vpop.permute.xlu1 %594 }
 0x223   : > { %v1360_v26 = vrot.slane %v1352_v11, %v6038_v61  ;;  %v1367_v27 = vrot.slane %v1353_v12, %v6038_v61  ;;  %v6195_v38 = vrot.slane %v1368_v13, %v6038_v61  ;;  %v6198_v39 = vrot.slane %v1369_v16, %v6038_v61  ;;  %v583_v16 = vpop.permute.xlu0 %582 }
 0x224   : > { %v973_v14 = vcombine.high %v6125_v32, %v6128_v4  ;;  %v989_v15 = vcombine.high %v6131_v33, %v6134_v5  ;;  %v6205_v47 = vrot.slane %v1660_v0, %v6033_v54  ;;  %v6208_v48 = vrot.slane %v4731_v18, %v6033_v54 }
 0x225   : > { %v6211_v49 = vrot.slane %v1676_v24, %v6033_v54  ;;  %v6214_v19 = vrot.slane %v4732_v25, %v6033_v54  ;;  %v936_v51 = vcombine.low %v912_v7, %v928_v8  ;;  %v736_v55 = vcombine.low %v5987_v34, %v581_v40 }
 0x226   : > { %v737_v57 = vcombine.high %v5987_v34, %v581_v40  ;;  %v1004_v58 = vcombine.low %v6155_v22, %v6158_v23  ;;  %v1592_v59 = vcombine.low %v1360_v26, %v1367_v27  ;;  %v4729_v60 = vcombine.high %v1360_v26, %v1367_v27 }
 0x227   : > { %v1608_v6 = vcombine.low %v6195_v38, %v6198_v39  ;;  %v4730_v20 = vcombine.high %v6195_v38, %v6198_v39  ;;  %4954 = vmatprep.mubr.msk.f32.mxu1 %vm2312_vm0, %v936_v51  ;;  %v744_v2 = vrot.slane %v736_v55, %v6033_v54  ;;  %v937_v10 = vcombine.high %v912_v7, %v928_v8 }
 0x228   : > { %v751_v3 = vrot.slane %v737_v57, %v6033_v54  ;;  %v1489_v34 = vcombine.high %v6055_v36, %v6058_v37  ;;  %4955 = vmatmul.mubr.msk.f32.vlgmr.msra.gmra.mrb[4].mxu1 %vm2312_vm0, %v1004_v58  ;;  %v1505_v40 = vcombine.high %v6067_v52, %v6070_v53  ;;  %v1557_v11 = vcombine.high %v6077_v30, %v6080_v62 }
 0x229   : > { %v1573_v12 = vcombine.high %v6097_v31, %v6100_v21  ;;  %v752_v13 = vcombine.low %v6176_v56, %v593_v46  ;;  %5175 = vmatpush3.bf16.xpose.msk.msra.mxu1 %vm6164_vm1, %v5170_v50  ;;  %4961 = vmatprep.mubr.msk.f32.mxu1 %vm2312_vm0, %v937_v10  ;;  %v753_v37 = vcombine.high %v6176_v56, %v593_v46 }
 0x22a   : > { %v1503_v36 = vrot.slane %v1489_v34, %v6038_v61  ;;  %v820_v7 = vcombine.low %v571_v17, %v595_v9  ;;  %v1519_v52 = vrot.slane %v1505_v40, %v6038_v61  ;;  %v1571_v53 = vrot.slane %v1557_v11, %v6038_v61 }
 0x22b   : > { %v1587_v30 = vrot.slane %v1573_v12, %v6038_v61  ;;  %v760_v62 = vrot.slane %v752_v13, %v6033_v54  ;;  %v767_v31 = vrot.slane %v753_v37, %v6033_v54  ;;  %v821_v21 = vcombine.high %v571_v17, %v595_v9 }
 0x22c   : > { %v828_v50 = vrot.slane %v820_v7, %v6033_v54  ;;  %v804_v8 = vcombine.low %v5993_v35, %v583_v16  ;;  %v1522_v0 = vcombine.low %v1503_v36, %v1519_v52  ;;  %v805_v38 = vcombine.high %v5993_v35, %v583_v16 }
 0x22d   : > { %v1590_v18 = vcombine.low %v1571_v53, %v1587_v30  ;;  %v768_v24 = vcombine.low %v744_v2, %v760_v62  ;;  %v769_v56 = vcombine.high %v744_v2, %v760_v62  ;;  %v784_v25 = vcombine.low %v751_v3, %v767_v31 }
 0x22e   : > { %v785_v26 = vcombine.high %v751_v3, %v767_v31  ;;  %v835_v27 = vrot.slane %v821_v21, %v6033_v54  ;;  %v812_v17 = vrot.slane %v804_v8, %v6033_v54  ;;  %v819_v58 = vrot.slane %v805_v38, %v6033_v54 }
 0x22f   : > { %v5176_v39 = vpack.c.bf16 %v1590_v18, %v1522_v0  ;;  %v776_v46 = vrot.slane %v768_v24, %v6038_v61  ;;  %v783_v51 = vrot.slane %v769_v56, %v6038_v61  ;;  %v792_v55 = vrot.slane %v784_v25, %v6038_v61 }
 0x230   : > { %v799_v57 = vrot.slane %v785_v26, %v6038_v61  ;;  %v1005_v9 = vcombine.high %v6155_v22, %v6158_v23  ;;  %v6260_v2 = vrot.slane %v1592_v59, %v6033_v54  ;;  %v1607_v35 = vrot.slane %v4729_v60, %v6033_v54 }
 0x231   : > { %5178 = vmatprep.subr.msk.bf16.mxu1 %vm6164_vm1, %v5176_v39  ;;  %v836_v3 = vcombine.low %v812_v17, %v828_v50  ;;  %v837_v10 = vcombine.high %v812_v17, %v828_v50  ;;  %v1615_v34 = vrot.slane %v1608_v6, %v6033_v54  ;;  %v1623_v40 = vrot.slane %v4730_v20, %v6033_v54 }
 0x232   : > { %v852_v11 = vcombine.low %v819_v58, %v835_v27  ;;  %v853_v12 = vcombine.high %v819_v58, %v835_v27  ;;  %4962 = vmatmul.mubr.msk.f32.vlgmr.msra.gmra.mrb[6].mxu1 %vm2312_vm0, %v1005_v9  ;;  %v1008_v13 = vcombine.low %v776_v46, %v783_v51  ;;  %v4721_v22 = vcombine.high %v776_v46, %v783_v51 }
 0x233   : > { %v844_v23 = vrot.slane %v836_v3, %v6038_v61  ;;  %v851_v59 = vrot.slane %v837_v10, %v6038_v61  ;;  %5181 = vmatpush3.bf16.xpose.msk.msra.mxu1 %vm6164_vm1, %v5176_v39  ;;  %v1024_v60 = vcombine.low %v792_v55, %v799_v57  ;;  %v4722_v16 = vcombine.high %v792_v55, %v799_v57 }
 0x234   : > { %v860_v37 = vrot.slane %v852_v11, %v6038_v61  ;;  %v867_v6 = vrot.slane %v853_v12, %v6038_v61  ;;  %v905_v62 = vcombine.high %v6103_v28, %v6106_v29  ;;  %v921_v31 = vcombine.high %v6117_v63, %v6120_v1 }
 0x235   : > { %v1076_v20 = vcombine.low %v844_v23, %v851_v59  ;;  %v4723_v7 = vcombine.high %v844_v23, %v851_v59  ;;  %v1523_v8 = vcombine.high %v1503_v36, %v1519_v52  ;;  %v1591_v0 = vcombine.high %v1571_v53, %v1587_v30 }
 0x236   : > { %v1092_v21 = vcombine.low %v860_v37, %v867_v6  ;;  %v4724_v50 = vcombine.high %v860_v37, %v867_v6  ;;  %v919_v56 = vrot.slane %v905_v62, %v6038_v61  ;;  %v935_v25 = vrot.slane %v921_v31, %v6038_v61 }
 0x237   : > { %v6279_v18 = vrot.slane %v1076_v20, %v6033_v54  ;;  %v6282_v24 = vrot.slane %v4723_v7, %v6033_v54  ;;  %v5182_v29 = vpack.c.bf16 %v1591_v0, %v1523_v8  ;;  %v1624_v63 = vcombine.low %v6260_v2, %v1607_v35 }
 0x238   : > { %v6287_v26 = vrot.slane %v1092_v21, %v6033_v54  ;;  %v6290_v28 = vrot.slane %v4724_v50, %v6033_v54  ;;  %v1015_v1 = vrot.slane %v1008_v13, %v6033_v54  ;;  %v1023_v36 = vrot.slane %v4721_v22, %v6033_v54 }
 0x239   : > { %v938_v52 = vcombine.low %v919_v56, %v935_v25  ;;  %v1640_v53 = vcombine.low %v1615_v34, %v1623_v40  ;;  %v1031_v30 = vrot.slane %v1024_v60, %v6033_v54  ;;  %v1039_v27 = vrot.slane %v4722_v16, %v6033_v54  ;;  %5184 = vmatprep.subr.msk.bf16.mxu1 %vm6164_vm1, %v5182_v29 }
 0x23a   : > { %v1632_v38 = vrot.slane %v1624_v63, %v6038_v61  ;;  %v1692_v39 = vcombine.low %v6205_v47, %v6208_v48  ;;  %v1108_v46 = vcombine.low %v6279_v18, %v6282_v24  ;;  %v1708_v17 = vcombine.low %v6211_v49, %v6214_v19 }
 0x23b   : > { %4968 = vmatprep.mubr.msk.f32.mxu1 %vm2312_vm0, %v938_v52  ;;  %v1648_v51 = vrot.slane %v1640_v53, %v6038_v61  ;;  %v987_v55 = vrot.slane %v973_v14, %v6038_v61  ;;  %v1124_v57 = vcombine.low %v6287_v26, %v6290_v28  ;;  %v1003_v9 = vrot.slane %v989_v15, %v6038_v61  ;;  %v1733_v52 = vpop.permute.xlu1 %1732  ;;  %v1735_v53 = vpop.permute.xlu0 %1734 }
 0x23c   : > { %v1700_v58 = vrot.slane %v1692_v39, %v6038_v61  ;;  %v939_v3 = vcombine.high %v919_v56, %v935_v25  ;;  %v1716_v11 = vrot.slane %v1708_v17, %v6038_v61  ;;  %v1625_v12 = vcombine.high %v6260_v2, %v1607_v35 }
 0x23d   : > { %v1657_v10 = vcombine.high %v1632_v38, %v1648_v51  ;;  %v1641_v13 = vcombine.high %v1615_v34, %v1623_v40  ;;  %v1006_v22 = vcombine.low %v987_v55, %v1003_v9  ;;  %v1693_v32 = vcombine.high %v6205_v47, %v6208_v48 }
 0x23e   : > { %v1709_v4 = vcombine.high %v6211_v49, %v6214_v19  ;;  %v1656_v14 = vcombine.low %v1632_v38, %v1648_v51  ;;  %v1725_v23 = vcombine.high %v1700_v58, %v1716_v11  ;;  %v1639_v59 = vrot.slane %v1625_v12, %v6038_v61 }
 0x23f   : > { %v1655_v33 = vrot.slane %v1641_v13, %v6038_v61  ;;  %v1724_v5 = vcombine.low %v1700_v58, %v1716_v11  ;;  %4969 = vmatmul.mubr.msk.f32.vlgmr.msra.gmra.mrb[8].mxu1 %vm2312_vm0, %v1006_v22  ;;  %v1707_v15 = vrot.slane %v1693_v32, %v6038_v61  ;;  %v1040_v35 = vcombine.low %v1015_v1, %v1023_v36  ;;  %v1757_v38 = vpop.permute.xlu0 %1756 }
 0x240   : > { %v1723_v2 = vrot.slane %v1709_v4, %v6038_v61  ;;  %v1056_v34 = vcombine.low %v1031_v30, %v1039_v27  ;;  %v5194_v40 = vpack.c.bf16 %v1725_v23, %v1657_v10  ;;  %5187 = vmatpush3.bf16.xpose.msk.msra.mxu1 %vm6164_vm1, %v5182_v29  ;;  %4975 = vmatprep.mubr.msk.f32.mxu1 %vm2312_vm0, %v939_v3 }
 0x241   : > { %v1659_v47 = vcombine.high %v1639_v59, %v1655_v33  ;;  %v5188_v48 = vpack.c.bf16 %v1724_v5, %v1656_v14  ;;  %v1048_v19 = vrot.slane %v1040_v35, %v6038_v61  ;;  %v1116_v16 = vrot.slane %v1108_v46, %v6038_v61 }
 0x242   : > { %v1727_v49 = vcombine.high %v1707_v15, %v1723_v2  ;;  %v1064_v60 = vrot.slane %v1056_v34, %v6038_v61  ;;  %v1132_v37 = vrot.slane %v1124_v57, %v6038_v61  ;;  %5196 = vmatprep.subr.msk.bf16.mxu0 %vm6164_vm1, %v5194_v40  ;;  %v1658_v6 = vcombine.low %v1639_v59, %v1655_v33 }
 0x243   : > { %5190 = vmatprep.subr.msk.bf16.mxu1 %vm6164_vm1, %v5188_v48  ;;  %5199 = vmatpush3.bf16.xpose.msk.msra.mxu0 %vm6164_vm1, %v5194_v40  ;;  %v1726_v62 = vcombine.low %v1707_v15, %v1723_v2  ;;  %v1041_v31 = vcombine.high %v1015_v1, %v1023_v36  ;;  %v1057_v21 = vcombine.high %v1031_v30, %v1039_v27  ;;  %v1745_v27 = vpop.permute.xlu1 %1744 }
 0x244   : > { %v5206_v20 = vpack.c.bf16 %v1727_v49, %v1659_v47  ;;  %v1073_v7 = vcombine.high %v1048_v19, %v1064_v60  ;;  %v1007_v50 = vcombine.high %v987_v55, %v1003_v9  ;;  %v1072_v0 = vcombine.low %v1048_v19, %v1064_v60 }
 0x245   : > { %v1055_v8 = vrot.slane %v1041_v31, %v6038_v61  ;;  %v1141_v56 = vcombine.high %v1116_v16, %v1132_v37  ;;  %v1071_v25 = vrot.slane %v1057_v21, %v6038_v61  ;;  %v5200_v29 = vpack.c.bf16 %v1726_v62, %v1658_v6 }
 0x246   : > { %5208 = vmatprep.subr.msk.bf16.mxu0 %vm6164_vm1, %v5206_v20  ;;  %4989 = vmatprep.mubr.msk.f32.mxu0 %vm2312_vm0, %v1073_v7  ;;  %v1109_v63 = vcombine.high %v6279_v18, %v6282_v24  ;;  %v1125_v1 = vcombine.high %v6287_v26, %v6290_v28  ;;  %v1140_v26 = vcombine.low %v1116_v16, %v1132_v37 }
 0x247   : > { %4976 = vmatmul.mubr.msk.f32.vlgmr.msra.gmra.mrb[10].mxu1 %vm2312_vm0, %v1007_v50  ;;  %v1075_v36 = vcombine.high %v1055_v8, %v1071_v25  ;;  %v1074_v28 = vcombine.low %v1055_v8, %v1071_v25  ;;  %v1768_v39 = vcombine.low %v6006_v43, %v1745_v27  ;;  %v1769_v46 = vcombine.high %v6006_v43, %v1745_v27  ;;  %v1747_v3 = vpop.permute.xlu1 %1746 }
 0x248   : > { %5193 = vmatpush3.bf16.xpose.msk.msra.mxu1 %vm6164_vm1, %v5188_v48  ;;  %4982 = vmatprep.mubr.msk.f32.mxu1 %vm2312_vm0, %v1072_v0  ;;  %v1123_v18 = vrot.slane %v1109_v63, %v6038_v61  ;;  %v1139_v24 = vrot.slane %v1125_v1, %v6038_v61  ;;  %v1784_v51 = vcombine.low %v1733_v52, %v1757_v38 }
 0x249   : > { %5202 = vmatprep.subr.msk.bf16.mxu1 %vm6164_vm1, %v5200_v29  ;;  %v1785_v17 = vcombine.high %v1733_v52, %v1757_v38  ;;  %v1776_v57 = vrot.slane %v1768_v39, %v6033_v54  ;;  %v1783_v58 = vrot.slane %v1769_v46, %v6033_v54  ;;  %v1836_v10 = vcombine.low %v6004_v42, %v1747_v3 }
 0x24a   : > { %4990 = vmatmul.mubr.msk.f32.vlgmr.msra.gmra.mrb[8].mxu0 %vm2312_vm0, %v1141_v56  ;;  %v1143_v30 = vcombine.high %v1123_v18, %v1139_v24  ;;  %v1142_v55 = vcombine.low %v1123_v18, %v1139_v24  ;;  %v1792_v41 = vrot.slane %v1784_v51, %v6033_v54  ;;  %v1837_v11 = vcombine.high %v6004_v42, %v1747_v3 }
 0x24b   : > { %5211 = vmatpush3.bf16.xpose.msk.msra.mxu0 %vm6164_vm1, %v5206_v20  ;;  %5003 = vmatprep.mubr.msk.f32.mxu0 %vm2312_vm0, %v1075_v36  ;;  %v1799_v9 = vrot.slane %v1785_v17, %v6033_v54  ;;  %v1844_v14 = vrot.slane %v1836_v10, %v6033_v54  ;;  %v1759_v59 = vpop.permute.xlu1 %1758 }
 0x24c   : > { %v1800_v12 = vcombine.low %v1776_v57, %v1792_v41  ;;  %v1801_v43 = vcombine.high %v1776_v57, %v1792_v41  ;;  %v1851_v23 = vrot.slane %v1837_v11, %v6033_v54  ;;  %v1852_v15 = vcombine.low %v1735_v53, %v1759_v59 }
 0x24d   : > { %v1816_v13 = vcombine.low %v1783_v58, %v1799_v9  ;;  %v1817_v22 = vcombine.high %v1783_v58, %v1799_v9  ;;  %v1853_v2 = vcombine.high %v1735_v53, %v1759_v59  ;;  %v3009_v59 = vld [vmem:[#allocation7] sm:$0xff] }
 0x24e   : > { %v1808_v32 = vrot.slane %v1800_v12, %v6038_v61  ;;  %v1815_v4 = vrot.slane %v1801_v43, %v6038_v61  ;;  %v1860_v47 = vrot.slane %v1852_v15, %v6033_v54 }
 0x24f   : > { %4983 = vmatmul.mubr.msk.f32.vlgmr.msra.gmra.mrb[12].mxu1 %vm2312_vm0, %v1140_v26  ;;  %v1824_v33 = vrot.slane %v1816_v13, %v6038_v61  ;;  %v1831_v5 = vrot.slane %v1817_v22, %v6038_v61  ;;  %v1867_v48 = vrot.slane %v1853_v2, %v6033_v54 }
 0x250   : > { %5205 = vmatpush3.bf16.xpose.msk.msra.mxu1 %vm6164_vm1, %v5200_v29  ;;  %4996 = vmatprep.mubr.msk.f32.mxu1 %vm2312_vm0, %v1074_v28  ;;  %v2040_v42 = vcombine.low %v1808_v32, %v1815_v4  ;;  %v4733_v35 = vcombine.high %v1808_v32, %v1815_v4  ;;  %v1868_v37 = vcombine.low %v1844_v14, %v1860_v47 }
 0x251   : > { %v2056_v34 = vcombine.low %v1824_v33, %v1831_v5  ;;  %v4734_v40 = vcombine.high %v1824_v33, %v1831_v5  ;;  %v1869_v6 = vcombine.high %v1844_v14, %v1860_v47  ;;  %v1884_v20 = vcombine.low %v1851_v23, %v1867_v48 }
 0x252   : > { %5004 = vmatmul.mubr.msk.f32.vlgmr.msra.gmra.mrb[10].mxu0 %vm2312_vm0, %v1143_v30  ;;  %v2047_v49 = vrot.slane %v2040_v42, %v6033_v54  ;;  %v2055_v19 = vrot.slane %v4733_v35, %v6033_v54  ;;  %v1885_v7 = vcombine.high %v1851_v23, %v1867_v48  ;;  %v1876_v21 = vrot.slane %v1868_v37, %v6038_v61  ;;  %v3010_v23 = vld [vmem:[#allocation7 + $0x8] sm:$0xff] }
 0x253   : > { %v2063_v60 = vrot.slane %v2056_v34, %v6033_v54  ;;  %v2071_v16 = vrot.slane %v4734_v40, %v6033_v54  ;;  %v1883_v50 = vrot.slane %v1869_v6, %v6038_v61  ;;  %v1892_v8 = vrot.slane %v1884_v20, %v6038_v61  ;;  %v3012_v34 = vld [vmem:[#allocation7 + $0x18] sm:$0xff] }
 0x254   : > { %v2072_v62 = vcombine.low %v2047_v49, %v2055_v19  ;;  %v1899_v0 = vrot.slane %v1885_v7, %v6038_v61  ;;  %v2073_v51 = vcombine.high %v2047_v49, %v2055_v19  ;;  %v3020_v20 = vld [vmem:[#allocation7 + $0x58] sm:$0xff] }
 0x255   : > { %v2088_v31 = vcombine.low %v2063_v60, %v2071_v16  ;;  %v2108_v56 = vcombine.low %v1876_v21, %v1883_v50  ;;  %v4735_v25 = vcombine.high %v1876_v21, %v1883_v50  ;;  %v2089_v17 = vcombine.high %v2063_v60, %v2071_v16  ;;  %v3015_v16 = vld [vmem:[#allocation7 + $0x30] sm:$0xff] }
 0x256   : > { %v2124_v29 = vcombine.low %v1892_v8, %v1899_v0  ;;  %v4736_v63 = vcombine.high %v1892_v8, %v1899_v0  ;;  %v2080_v1 = vrot.slane %v2072_v62, %v6038_v61  ;;  %v2087_v9 = vrot.slane %v2073_v51, %v6038_v61  ;;  %v3011_v62 = vld [vmem:[#allocation7 + $0x10] sm:$0xff]  ;;  %v3024_v51 = vld [vmem:[#allocation7 + $0x78] sm:$0xff] }
 0x257   : > { %4997 = vmatmul.mubr.msk.f32.vlgmr.msra.gmra.mrb[14].mxu1 %vm2312_vm0, %v1142_v55  ;;  %v2096_v36 = vrot.slane %v2088_v31, %v6038_v61  ;;  %v2115_v18 = vrot.slane %v2108_v56, %v6033_v54  ;;  %v2123_v24 = vrot.slane %v4735_v25, %v6033_v54  ;;  %v2103_v3 = vrot.slane %v2089_v17, %v6038_v61  ;;  %v3018_v25 = vld [vmem:[#allocation7 + $0x48] sm:$0xff] }
 0x258   : > { %v2131_v26 = vrot.slane %v2124_v29, %v6033_v54  ;;  %v2139_v28 = vrot.slane %v4736_v63, %v6033_v54  ;;  %v3019_v29 = vld [vmem:[#allocation7 + $0x50] sm:$0xff] }
 0x259   : > { %v2140_v52 = vcombine.low %v2115_v18, %v2123_v24  ;;  %v2104_v30 = vcombine.low %v2080_v1, %v2096_v36  ;;  %v2141_v55 = vcombine.high %v2115_v18, %v2123_v24  ;;  %v2105_v58 = vcombine.high %v2080_v1, %v2096_v36  ;;  %v3017_v1 = vld [vmem:[#allocation7 + $0x40] sm:$0xff] }
 0x25a   : > { %v2156_v53 = vcombine.low %v2131_v26, %v2139_v28  ;;  %v2157_v57 = vcombine.high %v2131_v26, %v2139_v28  ;;  %v2106_v43 = vcombine.low %v2087_v9, %v2103_v3  ;;  %v2107_v32 = vcombine.high %v2087_v9, %v2103_v3  ;;  %v3014_v28 = vld [vmem:[#allocation7 + $0x28] sm:$0xff] }
 0x25b   : > { %v2148_v27 = vrot.slane %v2140_v52, %v6038_v61  ;;  %v2155_v10 = vrot.slane %v2141_v55, %v6038_v61 }
 0x25c   : > { %v2164_v38 = vrot.slane %v2156_v53, %v6038_v61  ;;  %v2171_v11 = vrot.slane %v2157_v57, %v6038_v61  ;;  %v3021_v57 = vld [vmem:[#allocation7 + $0x60] sm:$0xff] }
 0x25e   : > { %v2172_v39 = vcombine.low %v2148_v27, %v2164_v38  ;;  %v2173_v41 = vcombine.high %v2148_v27, %v2164_v38  ;;  %v2174_v13 = vcombine.low %v2155_v10, %v2171_v11  ;;  %v2175_v4 = vcombine.high %v2155_v10, %v2171_v11  ;;  %v3013_v10 = vld [vmem:[#allocation7 + $0x20] sm:$0xff] }
 0x260   : > { %v5212_v46 = vpack.c.bf16 %v2172_v39, %v2104_v30  ;;  %v6406_v12 = vpack.c.bf16 %v2173_v41, %v2105_v58  ;;  %v5220_v22 = vpack.c.bf16 %v2174_v13, %v2106_v43  ;;  %v6409_v14 = vpack.c.bf16 %v2175_v4, %v2107_v32  ;;  %v3023_v32 = vld [vmem:[#allocation7 + $0x70] sm:$0xff] }
 0x262   : > { %5213 = vmatprep.subr.bf16.mxu1 %v5212_v46  ;;  %5221 = vmatprep.subr.bf16.mxu0 %v5220_v22 }
 0x263   : > { %5215 = vmatpush3.bf16.msra.mxu1 %v5212_v46  ;;  %5223 = vmatpush3.bf16.msra.mxu0 %v5220_v22  ;;  %v3022_v46 = vld [vmem:[#allocation7 + $0x68] sm:$0xff] }
 0x264   : > { %5217 = vmatprep.subr.bf16.mxu1 %v6406_v12 }
 0x2fb   : > { %v4956_v33 = vpop.f32.mrb[4].mxu1 }
 0x2fc   : > { %v6411_v5 = vadd.f32 %v4956_v33, %v3010_v23  ;;  %v2391_v15 = vpop.f32.mrb[5].mxu1  ;;  %v3016_v33 = vld [vmem:[#allocation7 + $0x38] sm:$0xff] }
 0x2fd   : > { %v6413_v2 = vadd.f32 %v3009_v59, %v2391_v15 }
 0x2fe   : > { %v3045_v42 = vsel %vm3041_vm2, %v6411_v5, -inf }
 0x2ff   : > { %3046 = vmax.xlane.f32.xlu1 %v3045_v42  ;;  %v3042_v35 = vsel %vm3041_vm2, %v6413_v2, -inf }
 0x300   : > { %3043 = vmax.xlane.f32.xlu0 %v3042_v35 }
 0x305   : > { %v4963_v40 = vpop.f32.mrb[6].mxu1 }
 0x306   : > { %v6419_v47 = vadd.f32 %v4963_v40, %v3012_v34  ;;  %v2478_v48 = vpop.f32.mrb[7].mxu1  ;;  %v6479_v34 = vpop.permute.xlu1 %1736 }
 0x307   : > { %v6429_v0 = vadd.f32 %v3011_v62, %v2478_v48 }
 0x308   : > { %v3051_v49 = vsel %vm3041_vm2, %v6419_v47, -inf }
 0x309   : > { %3052 = vmax.xlane.f32.xlu0 %v3051_v49  ;;  %v3048_v26 = vsel %vm3041_vm2, %v6429_v0, -inf  ;;  %v6485_v49 = vpop.permute.xlu0 %1738 }
 0x30a   : > { %v6481_v40 = vpop.permute.xlu1 %1748 }
 0x30e   : > { %v6483_v48 = vpop.permute.xlu1 %1750 }
 0x312   : > { %v4970_v19 = vpop.f32.mrb[8].mxu1 }
 0x313   : > { %v2565_v60 = vpop.f32.mrb[9].mxu1  ;;  %v6443_v38 = vadd.f32 %v4970_v19, %v3014_v28 }
 0x314   : > { %v6459_v13 = vadd.f32 %v3013_v10, %v2565_v60 }
 0x315   : > { %v3057_v3 = vsel %vm3041_vm2, %v6443_v38, -inf }
 0x316   : > { %v3054_v59 = vsel %vm3041_vm2, %v6459_v13, -inf }
 0x31a   : > { %v4977_v37 = vpop.f32.mrb[10].mxu1 }
 0x31b   : > { %v2652_v6 = vpop.f32.mrb[11].mxu1  ;;  %v6469_v15 = vadd.f32 %v4977_v37, %v3016_v33 }
 0x31c   : > { %v6423_v7 = vadd.f32 %v3015_v16, %v2652_v6 }
 0x31d   : > { %v4991_v31 = vpop.f32.mrb[8].mxu0  ;;  %v3063_v35 = vsel %vm3041_vm2, %v6469_v15, -inf }
 0x31e   : > { %v6425_v21 = vadd.f32 %v4991_v31, %v3020_v20  ;;  %v2826_v50 = vpop.f32.mrb[9].mxu0  ;;  %v3060_v8 = vsel %vm3041_vm2, %v6423_v7, -inf }
 0x31f   : > { %3061 = vmax.xlane.f32.xlu1 %v3060_v8  ;;  %v6435_v24 = vadd.f32 %v3019_v29, %v2826_v50 }
 0x320   : > { %v3075_v56 = vsel %vm3041_vm2, %v6425_v21, -inf }
 0x321   : > { %3076 = vmax.xlane.f32.xlu0 %v3075_v56  ;;  %v3072_v39 = vsel %vm3041_vm2, %v6435_v24, -inf }
 0x322   : > { %v4984_v63 = vpop.f32.mrb[12].mxu1 }
 0x323   : > { %v6433_v36 = vadd.f32 %v4984_v63, %v3018_v25  ;;  %v2739_v18 = vpop.f32.mrb[13].mxu1 }
 0x324   : > { %v6439_v53 = vadd.f32 %v3017_v1, %v2739_v18 }
 0x325   : > { %v5005_v52 = vpop.f32.mrb[10].mxu0  ;;  %3049 = vmax.xlane.f32.xlu0 %v3048_v26  ;;  %v3069_v30 = vsel %vm3041_vm2, %v6433_v36, -inf }
 0x326   : > { %v3000_v27 = vpop.f32.mrb[11].mxu0  ;;  %3070 = vmax.xlane.f32.xlu1 %v3069_v30  ;;  %v3066_v17 = vsel %vm3041_vm2, %v6439_v53, -inf  ;;  %v6451_v9 = vadd.f32 %v5005_v52, %v3024_v51 }
 0x327   : > { %v6465_v23 = vadd.f32 %v3023_v32, %v3000_v27 }
 0x328   : > { %v3087_v22 = vsel %vm3041_vm2, %v6451_v9, -inf }
 0x329   : > { %3073 = vmax.xlane.f32.xlu0 %v3072_v39  ;;  %v3084_v42 = vsel %vm3041_vm2, %v6465_v23, -inf }
 0x32a   : > { %3067 = vmax.xlane.f32.xlu1 %v3066_v17  ;;  %v4998_v55 = vpop.f32.mrb[14].mxu1 }
 0x32b   : > { %v6449_v58 = vadd.f32 %v4998_v55, %v3022_v46  ;;  %v2913_v41 = vpop.f32.mrb[15].mxu1 }
 0x32c   : > { %v6455_v11 = vadd.f32 %v3021_v57, %v2913_v41 }
 0x32d   : > { %3058 = vmax.xlane.f32.xlu0 %v3057_v3  ;;  %v3081_v43 = vsel %vm3041_vm2, %v6449_v58, -inf }
 0x32e   : > { %3082 = vmax.xlane.f32.xlu1 %v3081_v43  ;;  %v3078_v4 = vsel %vm3041_vm2, %v6455_v11, -inf }
 0x331   : > { %3088 = vmax.xlane.f32.xlu0 %v3087_v22 }
 0x332   : > { %3079 = vmax.xlane.f32.xlu1 %v3078_v4 }
 0x335   : > { %3055 = vmax.xlane.f32.xlu0 %v3054_v59 }
 0x339   : > { %3085 = vmax.xlane.f32.xlu0 %v3084_v42 }
 0x33d   : > { %3064 = vmax.xlane.f32.xlu0 %v3063_v35 }
 0x343   : > { %1762 = vrot.lane.b32.xlu1 %v6016_v44, %s5660_s11 }
 0x353   : > { %1760 = vrot.lane.b32.xlu0 %v6024_v45, %s5660_s11 }
 0x38c   : > { %v3047_v19 = vpop.xlane.xlu1 %3046 }
 0x38d   : > { %v3091_v60 = vsub.f32 %v6411_v5, %v3047_v19  ;;  %v3044_v16 = vpop.xlane.xlu0 %3043 }
 0x38e   : > { %v3090_v37 = vsub.f32 %v6413_v2, %v3044_v16 }
 0x38f   : > { %v3108_v6 = vmul.f32 1.442695, %v3091_v60 }
 0x390   : > { %v3106_v20 = vmul.f32 1.442695, %v3090_v37 }
 0x391   : > { %5395 = vpow2.f32 %v3108_v6 }
 0x392   : > { %5397 = vpow2.f32 %v3106_v20 }
 0x396   : > { %v3053_v62 = vpop.xlane.xlu0 %3052 }
 0x397   : > { %v3093_v31 = vsub.f32 %v6419_v47, %v3053_v62 }
 0x399   : > { %v3112_v50 = vmul.f32 1.442695, %v3093_v31 }
 0x39b   : > { %5399 = vpow2.f32 %v3112_v50  ;;  %v5396_v8 = vpop.eup %5395 }
 0x39c   : > { %v5398_v56 = vpop.eup %5397  ;;  %v3141_v25 = vsel %vm3041_vm2, %v5396_v8, 0.0 }
 0x39d   : > { %3142 = vadd.xlane.f32.xlu1 %v3141_v25  ;;  %5010 = vmatprep.mubr.msk.f32.mxu1 %vm3041_vm2, %v5398_v56  ;;  %v3138_v5 = vsel %vm3041_vm2, %v5398_v56, 0.0 }
 0x39e   : > { %5011 = vmatmul.mubr.msk.f32.vlgmr.msra.gmra.mrb[16].mxu1 %vm3041_vm2, %v5396_v8  ;;  %3139 = vadd.xlane.f32.xlu0 %v3138_v5 }
 0x39f   : > { %5219 = vmatpush3.bf16.msra.mxu1 %v6406_v12 }
 0x3a0   : > { %5225 = vmatprep.subr.bf16.mxu1 %v6409_v14 }
 0x3a5   : > { %v5400_v2 = vpop.eup %5399 }
 0x3a6   : > { %v3147_v47 = vsel %vm3041_vm2, %v5400_v2, 0.0 }
 0x3a7   : > { %3148 = vadd.xlane.f32.xlu0 %v3147_v47 }
 0x3ac   : > { %v3062_v29 = vpop.xlane.xlu1 %3061 }
 0x3ad   : > { %v3096_v1 = vsub.f32 %v6423_v7, %v3062_v29 }
 0x3ae   : > { %v6497_v63 = vpop.xlane.xlu0 %3076 }
 0x3af   : > { %v3118_v52 = vmul.f32 1.442695, %v3096_v1 }
 0x3b2   : > { %v3050_v18 = vpop.xlane.xlu0 %3049 }
 0x3b3   : > { %v3092_v26 = vsub.f32 %v6429_v0, %v3050_v18  ;;  %v3071_v28 = vpop.xlane.xlu1 %3070 }
 0x3b4   : > { %v3099_v51 = vsub.f32 %v6433_v36, %v3071_v28  ;;  %v1973_v36 = vcombine.high %v6016_v44, %v6483_v48 }
 0x3b5   : > { %v3110_v30 = vmul.f32 1.442695, %v3092_v26  ;;  %v3101_v26 = vsub.f32 %v6425_v21, %v6497_v63 }
 0x3b6   : > { %v3074_v27 = vpop.xlane.xlu0 %3073  ;;  %v3124_v41 = vmul.f32 1.442695, %v3099_v51  ;;  %v1987_v19 = vrot.slane %v1973_v36, %v6033_v54 }
 0x3b7   : > { %5401 = vpow2.f32 %v3110_v30  ;;  %v3100_v12 = vsub.f32 %v6435_v24, %v3074_v27  ;;  %v3068_v39 = vpop.xlane.xlu1 %3067  ;;  %v1972_v24 = vcombine.low %v6016_v44, %v6483_v48  ;;  %v1904_v30 = vcombine.low %v6024_v45, %v6481_v40 }
 0x3b8   : > { %5403 = vpow2.f32 %v3118_v52  ;;  %v3098_v57 = vsub.f32 %v6439_v53, %v3068_v39  ;;  %v1905_v27 = vcombine.high %v6024_v45, %v6481_v40 }
 0x3b9   : > { %v3126_v46 = vmul.f32 1.442695, %v3100_v12  ;;  %v1980_v44 = vrot.slane %v1972_v24, %v6033_v54 }
 0x3ba   : > { %v3059_v17 = vpop.xlane.xlu0 %3058  ;;  %v3122_v32 = vmul.f32 1.442695, %v3098_v57 }
 0x3bb   : > { %5405 = vpow2.f32 %v3126_v46  ;;  %v3095_v55 = vsub.f32 %v6443_v38, %v3059_v17  ;;  %v3083_v7 = vpop.xlane.xlu1 %3082 }
 0x3bc   : > { %v3103_v38 = vsub.f32 %v6449_v58, %v3083_v7  ;;  %v3128_v7 = vmul.f32 1.442695, %v3101_v26 }
 0x3bd   : > { %v3116_v0 = vmul.f32 1.442695, %v3095_v55 }
 0x3be   : > { %v6505_v3 = vpop.xlane.xlu0 %3088 }
 0x3bf   : > { %5407 = vpow2.f32 %v3116_v0  ;;  %v3080_v10 = vpop.xlane.xlu1 %3079  ;;  %v3105_v57 = vsub.f32 %v6451_v9, %v6505_v3 }
 0x3c0   : > { %v3102_v43 = vsub.f32 %v6455_v11, %v3080_v10  ;;  %5409 = vpow2.f32 %v3124_v41  ;;  %v1912_v41 = vrot.slane %v1904_v30, %v6033_v54  ;;  %v1919_v10 = vrot.slane %v1905_v27, %v6033_v54 }
 0x3c1   : > { %v5402_v22 = vpop.eup %5401  ;;  %5411 = vpow2.f32 %v3122_v32 }
 0x3c2   : > { %v3130_v53 = vmul.f32 1.442695, %v3102_v43  ;;  %5017 = vmatprep.mubr.msk.f32.mxu1 %vm3041_vm2, %v5402_v22  ;;  %v3056_v4 = vpop.xlane.xlu0 %3055  ;;  %v3144_v59 = vsel %vm3041_vm2, %v5402_v22, 0.0  ;;  %v6515_v33 = vpop.eup %5403 }
 0x3c3   : > { %v3094_v42 = vsub.f32 %v6459_v13, %v3056_v4  ;;  %5018 = vmatmul.mubr.msk.f32.vlgmr.msra.gmra.mrb[18].mxu1 %vm3041_vm2, %v5400_v2  ;;  %3145 = vadd.xlane.f32.xlu1 %v3144_v59  ;;  %v1763_v11 = vpop.permute.xlu1 %1762  ;;  %v3132_v13 = vmul.f32 1.442695, %v3103_v38  ;;  %v3136_v59 = vmul.f32 1.442695, %v3105_v57  ;;  %v3156_v27 = vsel %vm3041_vm2, %v6515_v33, 0.0 }
 0x3c4   : > { %5227 = vmatpush3.bf16.msra.mxu1 %v6409_v14  ;;  %5031 = vmatprep.mubr.msk.f32.mxu1 %vm3041_vm2, %v6515_v33  ;;  %v1988_v58 = vcombine.low %v6485_v49, %v1763_v11  ;;  %v1989_v35 = vcombine.high %v6485_v49, %v1763_v11  ;;  %5413 = vpow2.f32 %v3130_v53 }
 0x3c5   : > { %v6525_v48 = vpop.eup %5405  ;;  %v3114_v60 = vmul.f32 1.442695, %v3094_v42 }
 0x3c6   : > { %v1996_v16 = vrot.slane %v1988_v58, %v6033_v54  ;;  %v2003_v37 = vrot.slane %v1989_v35, %v6033_v54  ;;  %v3086_v14 = vpop.xlane.xlu0 %3085  ;;  %v3168_v6 = vsel %vm3041_vm2, %v6525_v48, 0.0 }
 0x3c7   : > { %5415 = vpow2.f32 %v3114_v60  ;;  %v3104_v20 = vsub.f32 %v6465_v23, %v3086_v14  ;;  %3169 = vadd.xlane.f32.xlu0 %v3168_v6 }
 0x3c8   : > { %v2004_v49 = vcombine.low %v1980_v44, %v1996_v16  ;;  %v2005_v62 = vcombine.high %v1980_v44, %v1996_v16  ;;  %v2020_v31 = vcombine.low %v1987_v19, %v2003_v37  ;;  %v2021_v50 = vcombine.high %v1987_v19, %v2003_v37 }
 0x3c9   : > { %v5408_v8 = vpop.eup %5407  ;;  %5417 = vpow2.f32 %v3132_v13  ;;  %v3134_v56 = vmul.f32 1.442695, %v3104_v20 }
 0x3ca   : > { %v2012_v25 = vrot.slane %v2004_v49, %v6038_v61  ;;  %v2019_v5 = vrot.slane %v2005_v62, %v6038_v61  ;;  %v2028_v2 = vrot.slane %v2020_v31, %v6038_v61  ;;  %v2035_v47 = vrot.slane %v2021_v50, %v6038_v61  ;;  %v3065_v29 = vpop.xlane.xlu0 %3064  ;;  %v6539_v18 = vpop.eup %5409 }
 0x3cb   : > { %5419 = vpow2.f32 %v3134_v56  ;;  %v3097_v23 = vsub.f32 %v6469_v15, %v3065_v29  ;;  %v3153_v1 = vsel %vm3041_vm2, %v5408_v8, 0.0  ;;  %v5412_v51 = vpop.eup %5411  ;;  %v3165_v21 = vsel %vm3041_vm2, %v6539_v18, 0.0 }
 0x3cc   : > { %v2244_v28 = vcombine.low %v2012_v25, %v2019_v5  ;;  %v4739_v52 = vcombine.high %v2012_v25, %v2019_v5  ;;  %3154 = vadd.xlane.f32.xlu1 %v3153_v1  ;;  %v2260_v39 = vcombine.low %v2028_v2, %v2035_v47  ;;  %v4740_v46 = vcombine.high %v2028_v2, %v2035_v47 }
 0x3cd   : > { %v3120_v12 = vmul.f32 1.442695, %v3097_v23  ;;  %v3162_v9 = vsel %vm3041_vm2, %v5412_v51, 0.0 }
 0x3ce   : > { %v1761_v15 = vpop.permute.xlu0 %1760  ;;  %v6551_v63 = vpop.eup %5413  ;;  %v2251_v45 = vrot.slane %v2244_v28, %v6033_v54  ;;  %v2259_v40 = vrot.slane %v4739_v52, %v6033_v54  ;;  %v2267_v43 = vrot.slane %v2260_v39, %v6033_v54  ;;  %v2275_v22 = vrot.slane %v4740_v46, %v6033_v54 }
 0x3cf   : > { %5421 = vpow2.f32 %v3120_v12  ;;  %v1920_v17 = vcombine.low %v6479_v34, %v1761_v15  ;;  %v1921_v55 = vcombine.high %v6479_v34, %v1761_v15  ;;  %v3174_v42 = vsel %vm3041_vm2, %v6551_v63, 0.0 }
 0x3d0   : > { %3166 = vadd.xlane.f32.xlu1 %v3165_v21  ;;  %5423 = vpow2.f32 %v3128_v7  ;;  %v2276_v11 = vcombine.low %v2251_v45, %v2259_v40  ;;  %v2292_v16 = vcombine.low %v2267_v43, %v2275_v22  ;;  %v2277_v37 = vcombine.high %v2251_v45, %v2259_v40 }
 0x3d1   : > { %v5416_v0 = vpop.eup %5415  ;;  %v1928_v34 = vrot.slane %v1920_v17, %v6033_v54  ;;  %v1935_v24 = vrot.slane %v1921_v55, %v6033_v54  ;;  %v2293_v14 = vcombine.high %v2267_v43, %v2275_v22  ;;  %5425 = vpow2.f32 %v3136_v59  ;;  %v4472_v22 = vld [vmem:[#allocation8] sm:$0xff]  ;;  %v4478_v59 = vld [vmem:[#allocation8 + $0x30] sm:$0xff] }
 0x3d2   : > { %5024 = vmatprep.mubr.msk.f32.mxu0 %vm3041_vm2, %v5416_v0  ;;  %v3150_v3 = vsel %vm3041_vm2, %v5416_v0, 0.0  ;;  %v2284_v50 = vrot.slane %v2276_v11, %v6038_v61  ;;  %v2300_v29 = vrot.slane %v2292_v16, %v6038_v61  ;;  %v2291_v23 = vrot.slane %v2277_v37, %v6038_v61 }
 0x3d3   : > { %v6566_v36 = vpop.eup %5417  ;;  %v1936_v32 = vcombine.low %v1912_v41, %v1928_v34  ;;  %v1937_v38 = vcombine.high %v1912_v41, %v1928_v34  ;;  %v1952_v53 = vcombine.low %v1919_v10, %v1935_v24  ;;  %v1953_v4 = vcombine.high %v1919_v10, %v1935_v24  ;;  %5025 = vmatmul.mubr.msk.f32.vlgmr.msra.gmra.mrb[12].mxu0 %vm3041_vm2, %v5408_v8 }
 0x3d4   : > { %3163 = vadd.xlane.f32.xlu1 %v3162_v9  ;;  %3151 = vadd.xlane.f32.xlu0 %v3150_v3  ;;  %v3177_v31 = vsel %vm3041_vm2, %v6566_v36, 0.0  ;;  %v2307_v1 = vrot.slane %v2293_v14, %v6038_v61  ;;  %v2308_v17 = vcombine.low %v2284_v50, %v2300_v29  ;;  %v4473_v9 = vld [vmem:[#allocation8 + $0x8] sm:$0xff]  ;;  %v4474_v3 = vld [vmem:[#allocation8 + $0x10] sm:$0xff] }
 0x3d5   : > { %v6571_v44 = vpop.eup %5419  ;;  %v1944_v58 = vrot.slane %v1936_v32, %v6038_v61  ;;  %v1951_v35 = vrot.slane %v1937_v38, %v6038_v61  ;;  %v1960_v19 = vrot.slane %v1952_v53, %v6038_v61  ;;  %v1967_v13 = vrot.slane %v1953_v4, %v6038_v61  ;;  %5038 = vmatprep.mubr.msk.f32.mxu0 %vm3041_vm2, %v5412_v51  ;;  %v4475_v32 = vld [vmem:[#allocation8 + $0x18] sm:$0xff]  ;;  %v4476_v53 = vld [vmem:[#allocation8 + $0x20] sm:$0xff]  ;;  %v4477_v4 = vld [vmem:[#allocation8 + $0x28] sm:$0xff] }
 0x3d6   : > { %v3180_v60 = vsel %vm3041_vm2, %v6571_v44, 0.0  ;;  %v2310_v55 = vcombine.low %v2291_v23, %v2307_v1  ;;  %v2311_v21 = vcombine.high %v2291_v23, %v2307_v1  ;;  %v5248_v38 = vpack.c.bf16 %v4475_v32, %v4474_v3 }
 0x3d7   : > { %v2176_v6 = vcombine.low %v1944_v58, %v1951_v35  ;;  %v4737_v20 = vcombine.high %v1944_v58, %v1951_v35  ;;  %v2192_v49 = vcombine.low %v1960_v19, %v1967_v13  ;;  %v4738_v62 = vcombine.high %v1960_v19, %v1967_v13  ;;  %v4482_v35 = vld [vmem:[#allocation8 + $0x50] sm:$0xff]  ;;  %v4483_v19 = vld [vmem:[#allocation8 + $0x58] sm:$0xff] }
 0x3d8   : > { %3175 = vadd.xlane.f32.xlu1 %v3174_v42  ;;  %3181 = vadd.xlane.f32.xlu0 %v3180_v60  ;;  %v4479_v42 = vld [vmem:[#allocation8 + $0x38] sm:$0xff]  ;;  %v5264_v13 = vpack.c.bf16 %v4483_v19, %v4482_v35 }
 0x3d9   : > { %v5422_v8 = vpop.eup %5421  ;;  %v2183_v56 = vrot.slane %v2176_v6, %v6033_v54  ;;  %v2191_v25 = vrot.slane %v4737_v20, %v6033_v54  ;;  %v2199_v5 = vrot.slane %v2192_v49, %v6033_v54  ;;  %v2207_v2 = vrot.slane %v4738_v62, %v6033_v54 }
 0x3da   : > { %5032 = vmatmul.mubr.msk.f32.vlgmr.msra.gmra.mrb[20].mxu1 %vm3041_vm2, %v5422_v8  ;;  %v3159_v47 = vsel %vm3041_vm2, %v5422_v8, 0.0  ;;  %v5424_v51 = vpop.eup %5423  ;;  %v5256_v11 = vpack.c.bf16 %v4479_v42, %v4478_v59 }
 0x3db   : > { %5045 = vmatprep.mubr.msk.f32.mxu1 %vm3041_vm2, %v6525_v48  ;;  %v2208_v26 = vcombine.low %v2183_v56, %v2191_v25  ;;  %v2224_v28 = vcombine.low %v2199_v5, %v2207_v2  ;;  %v2209_v52 = vcombine.high %v2183_v56, %v2191_v25  ;;  %v2225_v30 = vcombine.high %v2199_v5, %v2207_v2  ;;  %v5426_v34 = vpop.eup %5425 }
 0x3dc   : > { %3178 = vadd.xlane.f32.xlu1 %v3177_v31  ;;  %3160 = vadd.xlane.f32.xlu0 %v3159_v47  ;;  %v2309_v48 = vcombine.high %v2284_v50, %v2300_v29  ;;  %v3171_v24 = vsel %vm3041_vm2, %v5424_v51, 0.0  ;;  %v3183_v43 = vsel %vm3041_vm2, %v5426_v34, 0.0 }
 0x3dd   : > { %v2216_v12 = vrot.slane %v2208_v26, %v6038_v61  ;;  %v2232_v39 = vrot.slane %v2224_v28, %v6038_v61  ;;  %v2223_v46 = vrot.slane %v2209_v52, %v6038_v61  ;;  %v2239_v15 = vrot.slane %v2225_v30, %v6038_v61 }
 0x3df   : > { %v2240_v7 = vcombine.low %v2216_v12, %v2232_v39  ;;  %v2241_v57 = vcombine.high %v2216_v12, %v2232_v39  ;;  %v2242_v45 = vcombine.low %v2223_v46, %v2239_v15  ;;  %v2243_v40 = vcombine.high %v2223_v46, %v2239_v15 }
 0x3e0   : > { %3157 = vadd.xlane.f32.xlu0 %v3156_v27 }
 0x3e1   : > { %v5228_v0 = vpack.c.bf16 %v2308_v17, %v2240_v7  ;;  %v5232_v33 = vpack.c.bf16 %v2309_v48, %v2241_v57  ;;  %v5236_v41 = vpack.c.bf16 %v2310_v55, %v2242_v45  ;;  %v5240_v10 = vpack.c.bf16 %v2311_v21, %v2243_v40 }
 0x3e3   : > { %5229 = vmatprep.subr.bf16.mxu0 %v5228_v0  ;;  %5233 = vmatprep.subr.bf16.mxu1 %v5232_v33 }
 0x3e4   : > { %3172 = vadd.xlane.f32.xlu0 %v3171_v24  ;;  %5231 = vmatpush3.bf16.msra.mxu0 %v5228_v0 }
 0x3e5   : > { %5235 = vmatpush3.bf16.msra.mxu1 %v5232_v33  ;;  %5237 = vmatprep.subr.bf16.mxu0 %v5236_v41 }
 0x3e6   : > { %5241 = vmatprep.subr.bf16.mxu1 %v5240_v10 }
 0x3e7   : > { %5039 = vmatmul.mubr.msk.f32.vlgmr.msra.gmra.mrb[14].mxu0 %vm3041_vm2, %v6539_v18  ;;  %v5244_v18 = vpack.c.bf16 %v4473_v9, %v4472_v22 }
 0x3e8   : > { %3184 = vadd.xlane.f32.xlu0 %v3183_v43  ;;  %5046 = vmatmul.mubr.msk.f32.vlgmr.msra.gmra.mrb[22].mxu1 %vm3041_vm2, %v5424_v51 }
 0x3e9   : > { %5239 = vmatpush3.bf16.msra.mxu0 %v5236_v41  ;;  %5052 = vmatprep.mubr.msk.f32.mxu0 %vm3041_vm2, %v6551_v63  ;;  %v5252_v63 = vpack.c.bf16 %v4477_v4, %v4476_v53 }
 0x3ea   : > { %5243 = vmatpush3.bf16.msra.mxu1 %v5240_v10  ;;  %5059 = vmatprep.mubr.msk.f32.mxu1 %vm3041_vm2, %v6571_v44  ;;  %v4481_v44 = vld [vmem:[#allocation8 + $0x48] sm:$0xff] }
 0x3eb   : > { %5245 = vmatprep.subr.bf16.mxu0 %v5244_v18 }
 0x3ec   : > { %5053 = vmatmul.mubr.msk.f32.vlgmr.msra.gmra.mrb[16].mxu0 %vm3041_vm2, %v6566_v36  ;;  %v4480_v36 = vld [vmem:[#allocation8 + $0x40] sm:$0xff] }
 0x3ed   : > { %5060 = vmatmul.mubr.msk.f32.vlgmr.msra.gmra.mrb[24].mxu1 %vm3041_vm2, %v5426_v34  ;;  %5247 = vmatpush3.bf16.msra.mxu0 %v5244_v18  ;;  %v5260_v58 = vpack.c.bf16 %v4481_v44, %v4480_v36 }
 0x3ee   : > { %5249 = vmatprep.subr.bf16.mxu0 %v5248_v38 }
 0x3f1   : > { %5251 = vmatpush3.bf16.msra.mxu0 %v5248_v38 }
 0x3f2   : > { %5253 = vmatprep.subr.bf16.mxu0 %v5252_v63 }
 0x3f5   : > { %5255 = vmatpush3.bf16.msra.mxu0 %v5252_v63 }
 0x3f6   : > { %5257 = vmatprep.subr.bf16.mxu0 %v5256_v11 }
 0x3f9   : > { %5259 = vmatpush3.bf16.msra.mxu0 %v5256_v11 }
 0x3fa   : > { %5261 = vmatprep.subr.bf16.mxu0 %v5260_v58 }
 0x3fd   : > { %5263 = vmatpush3.bf16.msra.mxu0 %v5260_v58 }
 0x3fe   : > { %5265 = vmatprep.subr.bf16.mxu0 %v5264_v13 }
 0x401   : > { %5267 = vmatpush3.bf16.msra.mxu0 %v5264_v13 }
 0x42a   : > { %v3143_v20 = vpop.xlane.xlu1 %3142 }
 0x42b   : > { %v3140_v37 = vpop.xlane.xlu0 %3139  ;;  %5427 = vrcp.f32 %v3143_v20 }
 0x42c   : > { %5429 = vrcp.f32 %v3140_v37 }
 0x434   : > { %v3149_v14 = vpop.xlane.xlu0 %3148 }
 0x435   : > { %v5428_v29 = vpop.eup %5427 }
 0x436   : > { %v5430_v23 = vpop.eup %5429 }
 0x450   : > { %v3146_v62 = vpop.xlane.xlu1 %3145 }
 0x454   : > { %v3170_v6 = vpop.xlane.xlu0 %3169 }
 0x459   : > { %v3155_v31 = vpop.xlane.xlu1 %3154 }
 0x45a   : > { %5431 = vrcp.f32 %v3155_v31 }
 0x45d   : > { %v3167_v25 = vpop.xlane.xlu1 %3166 }
 0x461   : > { %v3152_v49 = vpop.xlane.xlu0 %3151  ;;  %v3164_v2 = vpop.xlane.xlu1 %3163 }
 0x462   : > { %5433 = vrcp.f32 %v3152_v49 }
 0x463   : > { %5435 = vrcp.f32 %v3149_v14 }
 0x464   : > { %5437 = vrcp.f32 %v3146_v62  ;;  %v5432_v1 = vpop.eup %5431 }
 0x465   : > { %v3182_v50 = vpop.xlane.xlu0 %3181  ;;  %v3176_v26 = vpop.xlane.xlu1 %3175 }
 0x469   : > { %v3161_v5 = vpop.xlane.xlu0 %3160  ;;  %v3179_v57 = vpop.xlane.xlu1 %3178 }
 0x46a   : > { %5439 = vrcp.f32 %v3161_v5 }
 0x46c   : > { %v5434_v52 = vpop.eup %5433 }
 0x46d   : > { %v3158_v47 = vpop.xlane.xlu0 %3157  ;;  %v5436_v21 = vpop.eup %5435 }
 0x46e   : > { %5441 = vrcp.f32 %v3158_v47  ;;  %v5438_v7 = vpop.eup %5437 }
 0x46f   : > { %5443 = vrcp.f32 %v3170_v6 }
 0x470   : > { %5445 = vrcp.f32 %v3167_v25 }
 0x471   : > { %v5012_v60 = vpop.f32.mrb[16].mxu1  ;;  %v3173_v39 = vpop.xlane.xlu0 %3172  ;;  %5447 = vrcp.f32 %v3164_v2 }
 0x472   : > { %v3258_v16 = vpop.f32.mrb[17].mxu1  ;;  %v3851_v30 = vmul.f32 %v5428_v29, %v5012_v60  ;;  %5449 = vrcp.f32 %v3176_v26 }
 0x473   : > { %v3850_v46 = vmul.f32 %v5430_v23, %v3258_v16  ;;  %5451 = vrcp.f32 %v3182_v50 }
 0x474   : > { %v5440_v45 = vpop.eup %5439  ;;  %5453 = vrcp.f32 %v3179_v57 }
 0x475   : > { %v3185_v33 = vpop.xlane.xlu0 %3184  ;;  %5455 = vrcp.f32 %v3173_v39 }
 0x476   : > { %5457 = vrcp.f32 %v3185_v33 }
 0x478   : > { %v5442_v0 = vpop.eup %5441 }
 0x479   : > { %v5444_v36 = vpop.eup %5443 }
 0x47a   : > { %v5446_v13 = vpop.eup %5445 }
 0x47b   : > { %v5448_v6 = vpop.eup %5447 }
 0x47c   : > { %v5450_v50 = vpop.eup %5449 }
 0x47d   : > { %v5452_v2 = vpop.eup %5451 }
 0x47e   : > { %v5454_v26 = vpop.eup %5453 }
 0x496   : > { %v5019_v8 = vpop.f32.mrb[18].mxu1 }
 0x497   : > { %v3339_v56 = vpop.f32.mrb[19].mxu1  ;;  %v3853_v41 = vmul.f32 %v5436_v21, %v5019_v8 }
 0x498   : > { %v3852_v24 = vmul.f32 %v5438_v7, %v3339_v56 }
 0x4a6   : > { %v5026_v28 = vpop.f32.mrb[12].mxu0 }
 0x4a7   : > { %v3855_v27 = vmul.f32 %v5432_v1, %v5026_v28  ;;  %v3420_v12 = vpop.f32.mrb[13].mxu0 }
 0x4a8   : > { %v3854_v15 = vmul.f32 %v5434_v52, %v3420_v12  ;;  %v5456_v12 = vpop.eup %5455 }
 0x4a9   : > { %v3934_v51 = vcombine.low %v3851_v30, %v3855_v27  ;;  %v3935_v17 = vcombine.high %v3851_v30, %v3855_v27 }
 0x4aa   : > { %v3866_v48 = vcombine.low %v3850_v46, %v3854_v15  ;;  %v3867_v55 = vcombine.high %v3850_v46, %v3854_v15 }
 0x4ab   : > { %v3942_v32 = vrot.slane %v3934_v51, %v6033_v54  ;;  %v3949_v38 = vrot.slane %v3935_v17, %v6033_v54 }
 0x4ac   : > { %v3874_v63 = vrot.slane %v3866_v48, %v6033_v54  ;;  %v3881_v59 = vrot.slane %v3867_v55, %v6033_v54  ;;  %v5458_v48 = vpop.eup %5457 }
 0x4ad   : > { %v5033_v40 = vpop.f32.mrb[20].mxu1 }
 0x4ae   : > { %v3857_v10 = vmul.f32 %v5440_v45, %v5033_v40  ;;  %v3501_v34 = vpop.f32.mrb[21].mxu1 }
 0x4af   : > { %v3856_v43 = vmul.f32 %v5442_v0, %v3501_v34 }
 0x4b0   : > { %v3950_v22 = vcombine.low %v3853_v41, %v3857_v10  ;;  %v3951_v9 = vcombine.high %v3853_v41, %v3857_v10 }
 0x4b1   : > { %v3882_v3 = vcombine.low %v3852_v24, %v3856_v43  ;;  %v3883_v18 = vcombine.high %v3852_v24, %v3856_v43 }
 0x4b2   : > { %v3958_v53 = vrot.slane %v3950_v22, %v6033_v54  ;;  %v3965_v4 = vrot.slane %v3951_v9, %v6033_v54 }
 0x4b3   : > { %v3890_v42 = vrot.slane %v3882_v3, %v6033_v54  ;;  %v3897_v11 = vrot.slane %v3883_v18, %v6033_v54 }
 0x4b4   : > { %v3966_v44 = vcombine.low %v3942_v32, %v3958_v53  ;;  %v3967_v58 = vcombine.high %v3942_v32, %v3958_v53  ;;  %v3982_v35 = vcombine.low %v3949_v38, %v3965_v4  ;;  %v3983_v19 = vcombine.high %v3949_v38, %v3965_v4 }
 0x4b5   : > { %v3898_v60 = vcombine.low %v3874_v63, %v3890_v42  ;;  %v3899_v16 = vcombine.high %v3874_v63, %v3890_v42  ;;  %v3914_v37 = vcombine.low %v3881_v59, %v3897_v11  ;;  %v3915_v14 = vcombine.high %v3881_v59, %v3897_v11 }
 0x4b6   : > { %v3974_v20 = vrot.slane %v3966_v44, %v6038_v61  ;;  %v3981_v49 = vrot.slane %v3967_v58, %v6038_v61  ;;  %v3990_v62 = vrot.slane %v3982_v35, %v6038_v61  ;;  %v3997_v31 = vrot.slane %v3983_v19, %v6038_v61 }
 0x4b7   : > { %v3906_v8 = vrot.slane %v3898_v60, %v6038_v61  ;;  %v3913_v56 = vrot.slane %v3899_v16, %v6038_v61  ;;  %v3922_v25 = vrot.slane %v3914_v37, %v6038_v61  ;;  %v3929_v5 = vrot.slane %v3915_v14, %v6038_v61 }
 0x4b8   : > { %v4206_v47 = vcombine.low %v3974_v20, %v3981_v49  ;;  %v4791_v29 = vcombine.high %v3974_v20, %v3981_v49  ;;  %v4222_v23 = vcombine.low %v3990_v62, %v3997_v31  ;;  %v4792_v1 = vcombine.high %v3990_v62, %v3997_v31 }
 0x4b9   : > { %v4138_v28 = vcombine.low %v3906_v8, %v3913_v56  ;;  %v4789_v52 = vcombine.high %v3906_v8, %v3913_v56  ;;  %v4154_v30 = vcombine.low %v3922_v25, %v3929_v5  ;;  %v4790_v27 = vcombine.high %v3922_v25, %v3929_v5 }
 0x4ba   : > { %v5040_v39 = vpop.f32.mrb[14].mxu0  ;;  %v4213_v46 = vrot.slane %v4206_v47, %v6033_v54  ;;  %v4221_v15 = vrot.slane %v4791_v29, %v6033_v54  ;;  %v4229_v51 = vrot.slane %v4222_v23, %v6033_v54  ;;  %v4237_v17 = vrot.slane %v4792_v1, %v6033_v54 }
 0x4bb   : > { %v3859_v55 = vmul.f32 %v5446_v13, %v5040_v39  ;;  %v5047_v21 = vpop.f32.mrb[22].mxu1  ;;  %v3582_v7 = vpop.f32.mrb[15].mxu0  ;;  %v4145_v57 = vrot.slane %v4138_v28, %v6033_v54  ;;  %v4153_v45 = vrot.slane %v4789_v52, %v6033_v54  ;;  %v4161_v40 = vrot.slane %v4154_v30, %v6033_v54 }
 0x4bc   : > { %v3861_v0 = vmul.f32 %v5456_v12, %v5047_v21  ;;  %v3858_v33 = vmul.f32 %v5448_v6, %v3582_v7  ;;  %v3663_v41 = vpop.f32.mrb[23].mxu1  ;;  %v4169_v10 = vrot.slane %v4790_v27, %v6033_v54  ;;  %v4239_v34 = vcombine.high %v4213_v46, %v4221_v15 }
 0x4bd   : > { %v3860_v24 = vmul.f32 %v5444_v36, %v3663_v41  ;;  %v4171_v43 = vcombine.high %v4145_v57, %v4153_v45  ;;  %v4255_v22 = vcombine.high %v4229_v51, %v4237_v17  ;;  %v4170_v9 = vcombine.low %v4145_v57, %v4153_v45 }
 0x4be   : > { %v4187_v3 = vcombine.high %v4161_v40, %v4169_v10  ;;  %v6637_v18 = vrot.slane %v4239_v34, %v6038_v61  ;;  %v4186_v32 = vcombine.low %v4161_v40, %v4169_v10  ;;  %v4238_v38 = vcombine.low %v4213_v46, %v4221_v15 }
 0x4bf   : > { %v5054_v53 = vpop.f32.mrb[16].mxu0  ;;  %v6640_v4 = vrot.slane %v4171_v43, %v6038_v61  ;;  %v6643_v63 = vrot.slane %v4255_v22, %v6038_v61  ;;  %v6646_v59 = vrot.slane %v4170_v9, %v6038_v61  ;;  %v4254_v42 = vcombine.low %v4229_v51, %v4237_v17 }
 0x4c0   : > { %v3863_v11 = vmul.f32 %v5454_v26, %v5054_v53  ;;  %v5061_v36 = vpop.f32.mrb[24].mxu1  ;;  %v3744_v44 = vpop.f32.mrb[17].mxu0  ;;  %v6649_v58 = vrot.slane %v4187_v3, %v6038_v61  ;;  %v6652_v35 = vrot.slane %v4186_v32, %v6038_v61  ;;  %v6655_v19 = vrot.slane %v4238_v38, %v6038_v61 }
 0x4c1   : > { %v3865_v13 = vmul.f32 %v5458_v48, %v5061_v36  ;;  %v3862_v60 = vmul.f32 %v5450_v50, %v3744_v44  ;;  %v3825_v16 = vpop.f32.mrb[25].mxu1  ;;  %v4272_v37 = vcombine.low %v6637_v18, %v6643_v63  ;;  %v6660_v14 = vrot.slane %v4254_v42, %v6038_v61 }
 0x4c2   : > { %v4070_v6 = vcombine.low %v3859_v55, %v3863_v11  ;;  %v4071_v20 = vcombine.high %v3859_v55, %v3863_v11  ;;  %v3864_v49 = vmul.f32 %v5452_v2, %v3825_v16  ;;  %v4204_v62 = vcombine.low %v6640_v4, %v6649_v58 }
 0x4c3   : > { %v4086_v31 = vcombine.low %v3861_v0, %v3865_v13  ;;  %v4087_v8 = vcombine.high %v3861_v0, %v3865_v13  ;;  %v4002_v56 = vcombine.low %v3858_v33, %v3862_v60  ;;  %v4003_v25 = vcombine.high %v3858_v33, %v3862_v60 }
 0x4c4   : > { %v4078_v5 = vrot.slane %v4070_v6, %v6033_v54  ;;  %v4085_v50 = vrot.slane %v4071_v20, %v6033_v54  ;;  %v4018_v47 = vcombine.low %v3860_v24, %v3864_v49  ;;  %v4019_v29 = vcombine.high %v3860_v24, %v3864_v49 }
 0x4c5   : > { %v4094_v23 = vrot.slane %v4086_v31, %v6033_v54  ;;  %v4101_v1 = vrot.slane %v4087_v8, %v6033_v54  ;;  %v4010_v26 = vrot.slane %v4002_v56, %v6033_v54  ;;  %v4017_v2 = vrot.slane %v4003_v25, %v6033_v54  ;;  %v4484_v56 = vld [vmem:[#allocation8 + $0x60] sm:$0xff]  ;;  %v4485_v25 = vld [vmem:[#allocation8 + $0x68] sm:$0xff] }
 0x4c6   : > { %v4026_v28 = vrot.slane %v4018_v47, %v6033_v54  ;;  %v4033_v52 = vrot.slane %v4019_v29, %v6033_v54  ;;  %v5370_v30 = vpack.i.bf16 %v4272_v37, %v4204_v62  ;;  %v4203_v27 = vcombine.high %v6646_v59, %v6652_v35 }
 0x4c7   : > { %v4102_v12 = vcombine.low %v4078_v5, %v4094_v23  ;;  %v4103_v39 = vcombine.high %v4078_v5, %v4094_v23  ;;  %v4118_v46 = vcombine.low %v4085_v50, %v4101_v1  ;;  %v4119_v15 = vcombine.high %v4085_v50, %v4101_v1 }
 0x4c8   : > { %v4034_v51 = vcombine.low %v4010_v26, %v4026_v28  ;;  %v4035_v17 = vcombine.high %v4010_v26, %v4026_v28  ;;  %v4050_v48 = vcombine.low %v4017_v2, %v4033_v52  ;;  %v4051_v55 = vcombine.high %v4017_v2, %v4033_v52  ;;  %5371 = vrot.lane.b32.xlu0 %v5370_v30, %s5658_s19 }
 0x4c9   : > { %v4110_v21 = vrot.slane %v4102_v12, %v6038_v61  ;;  %v4117_v7 = vrot.slane %v4103_v39, %v6038_v61  ;;  %v4126_v57 = vrot.slane %v4118_v46, %v6038_v61  ;;  %v4133_v45 = vrot.slane %v4119_v15, %v6038_v61  ;;  %v4487_v12 = vld [vmem:[#allocation8 + $0x78] sm:$0xff] }
 0x4ca   : > { %v4042_v40 = vrot.slane %v4034_v51, %v6038_v61  ;;  %v4049_v0 = vrot.slane %v4035_v17, %v6038_v61  ;;  %v4058_v33 = vrot.slane %v4050_v48, %v6038_v61  ;;  %v4065_v41 = vrot.slane %v4051_v55, %v6038_v61 }
 0x4cb   : > { %v4342_v10 = vcombine.low %v4110_v21, %v4117_v7  ;;  %v4795_v34 = vcombine.high %v4110_v21, %v4117_v7  ;;  %v4358_v24 = vcombine.low %v4126_v57, %v4133_v45  ;;  %v4796_v43 = vcombine.high %v4126_v57, %v4133_v45 }
 0x4cc   : > { %v4274_v22 = vcombine.low %v4042_v40, %v4049_v0  ;;  %v4793_v9 = vcombine.high %v4042_v40, %v4049_v0  ;;  %v4290_v3 = vcombine.low %v4058_v33, %v4065_v41  ;;  %v4794_v32 = vcombine.high %v4058_v33, %v4065_v41 }
 0x4cd   : > { %v4270_v38 = vcombine.low %v6655_v19, %v6660_v14  ;;  %v4271_v53 = vcombine.high %v6655_v19, %v6660_v14  ;;  %v4202_v42 = vcombine.low %v6646_v59, %v6652_v35  ;;  %v4205_v11 = vcombine.high %v6640_v4, %v6649_v58 }
 0x4ce   : > { %v4273_v36 = vcombine.high %v6637_v18, %v6643_v63  ;;  %v4281_v44 = vrot.slane %v4274_v22, %v6033_v54  ;;  %v4289_v13 = vrot.slane %v4793_v9, %v6033_v54  ;;  %v4297_v60 = vrot.slane %v4290_v3, %v6033_v54 }
 0x4cf   : > { %v5365_v16 = vpack.i.bf16 %v4271_v53, %v4203_v27  ;;  %v4305_v37 = vrot.slane %v4794_v32, %v6033_v54  ;;  %v4349_v6 = vrot.slane %v4342_v10, %v6033_v54  ;;  %v4357_v20 = vrot.slane %v4795_v34, %v6033_v54  ;;  %v4486_v27 = vld [vmem:[#allocation8 + $0x70] sm:$0xff] }
 0x4d0   : > { %v5375_v49 = vpack.i.bf16 %v4273_v36, %v4205_v11  ;;  %v4307_v62 = vcombine.high %v4281_v44, %v4289_v13  ;;  %v4365_v4 = vrot.slane %v4358_v24, %v6033_v54  ;;  %v4373_v58 = vrot.slane %v4796_v43, %v6033_v54 }
 0x4d1   : > { %5366 = vrot.lane.b32.xlu1 %v5365_v16, %s5660_s11  ;;  %v4323_v18 = vcombine.high %v4297_v60, %v4305_v37  ;;  %v4375_v63 = vcombine.high %v4349_v6, %v4357_v20  ;;  %v4306_v31 = vcombine.low %v4281_v44, %v4289_v13  ;;  %v4322_v8 = vcombine.low %v4297_v60, %v4305_v37 }
 0x4d2   : > { %v4321_v5 = vrot.slane %v4307_v62, %v6038_v61  ;;  %v4391_v50 = vcombine.high %v4365_v4, %v4373_v58  ;;  %v4374_v47 = vcombine.low %v4349_v6, %v4357_v20  ;;  %v4390_v29 = vcombine.low %v4365_v4, %v4373_v58  ;;  %v4797_v4 = vld [vmem:[%s6792_s5] ss:$0 sm:$0xff] }
 0x4d3   : > { %v4337_v23 = vrot.slane %v4323_v18, %v6038_v61  ;;  %v4389_v1 = vrot.slane %v4375_v63, %v6038_v61  ;;  %v4314_v26 = vrot.slane %v4306_v31, %v6038_v61  ;;  %v4330_v54 = vrot.slane %v4322_v8, %v6038_v61 }
 0x4d4   : > { %v4405_v2 = vrot.slane %v4391_v50, %v6038_v61  ;;  %v4382_v28 = vrot.slane %v4374_v47, %v6038_v61  ;;  %v4398_v52 = vrot.slane %v4390_v29, %v6038_v61  ;;  %v5268_v30 = vpack.c.bf16 %v4485_v25, %v4484_v56 }
 0x4d5   : > { %5376 = vrot.lane.b32.xlu1 %v5375_v49, %s5659_s20  ;;  %v4340_v39 = vcombine.low %v4321_v5, %v4337_v23  ;;  %v4338_v46 = vcombine.low %v4314_v26, %v4330_v54  ;;  %v4339_v15 = vcombine.high %v4314_v26, %v4330_v54  ;;  %v4341_v51 = vcombine.high %v4321_v5, %v4337_v23 }
 0x4d6   : > { %v4408_v17 = vcombine.low %v4389_v1, %v4405_v2  ;;  %v4407_v48 = vcombine.high %v4382_v28, %v4398_v52  ;;  %v4406_v55 = vcombine.low %v4382_v28, %v4398_v52  ;;  %v4409_v21 = vcombine.high %v4389_v1, %v4405_v2  ;;  %5269 = vmatprep.subr.bf16.mxu0 %v5268_v30 }
 0x4d7   : > { %5271 = vmatpush3.bf16.msra.mxu0 %v5268_v30  ;;  %v5272_v7 = vpack.c.bf16 %v4487_v12, %v4486_v27 }
 0x4d8   : > { %v5385_v57 = vpack.i.bf16 %v4408_v17, %v4340_v39  ;;  %v5380_v45 = vpack.i.bf16 %v4407_v48, %v4339_v15  ;;  %v5390_v40 = vpack.i.bf16 %v4409_v21, %v4341_v51 }
 0x4d9   : > { %5273 = vmatprep.subr.bf16.mxu0 %v5272_v7 }
 0x4da   : > { %5386 = vrot.lane.b32.xlu0 %v5385_v57, %s5658_s19  ;;  %5381 = vrot.lane.b32.xlu1 %v5380_v45, %s5660_s11 }
 0x4db   : > { %5275 = vmatpush3.bf16.msra.mxu0 %v5272_v7 }
 0x4de   : > { %5391 = vrot.lane.b32.xlu1 %v5390_v40, %s5659_s20 }
 0x53a   : > { %v5372_v61 = vpop.permute.xlu0 %5371 }
 0x53b   : > { %v5374_v10 = vunpack.i.h.bf16 %v5372_v61  ;;  %v5373_v34 = vunpack.i.l.bf16 %v5372_v61 }
 0x543   : > { %v5367_v0 = vpop.permute.xlu1 %5366 }
 0x544   : > { %v5369_v33 = vunpack.i.h.bf16 %v5367_v0  ;;  %v5368_v41 = vunpack.i.l.bf16 %v5367_v0 }
 0x546   : > { %v4459_v24 = vsel %vm2312_vm0, %v4270_v38, %v5369_v33  ;;  %v4458_v43 = vsel %vm2312_vm0, %v4202_v42, %v5368_v41 }
 0x547   : > { %v5377_v22 = vpop.permute.xlu1 %5376  ;;  %v4463_v32 = vsel %vm4462_vm3, %v4458_v43, %v5373_v34  ;;  %v4464_v53 = vsel %vm4462_vm3, %v4459_v24, %v5374_v10 }
 0x548   : > { %v5379_v9 = vunpack.i.h.bf16 %v5377_v22  ;;  %v5378_v3 = vunpack.i.l.bf16 %v5377_v22 }
 0x54a   : > { %v4468_v11 = vsel %vm4467_vm4, %v4463_v32, %v5378_v3  ;;  %v4469_v19 = vsel %vm4467_vm4, %v4464_v53, %v5379_v9 }
 0x54b   : > { %5094 = vmatprep.mubr.f32.mxu0 %v4468_v11 }
 0x54c   : > { %5095 = vmatmul.mubr.f32.vlgmr.msra.gmra.mrb[18].mxu0 %v4469_v19  ;;  %v5382_v14 = vpop.permute.xlu1 %5381  ;;  %v5387_v38 = vpop.permute.xlu0 %5386 }
 0x54d   : > { %v5384_v59 = vunpack.i.h.bf16 %v5382_v14  ;;  %v5383_v35 = vunpack.i.l.bf16 %v5382_v14  ;;  %v5389_v42 = vunpack.i.h.bf16 %v5387_v38  ;;  %v5388_v36 = vunpack.i.l.bf16 %v5387_v38 }
 0x54f   : > { %v4460_v44 = vsel %vm2312_vm0, %v4338_v46, %v5383_v35  ;;  %v4461_v13 = vsel %vm2312_vm0, %v4406_v55, %v5384_v59 }
 0x550   : > { %v5392_v60 = vpop.permute.xlu1 %5391  ;;  %v4465_v6 = vsel %vm4462_vm3, %v4460_v44, %v5388_v36  ;;  %v4466_v20 = vsel %vm4462_vm3, %v4461_v13, %v5389_v42 }
 0x551   : > { %v5394_v16 = vunpack.i.h.bf16 %v5392_v60  ;;  %v5393_v37 = vunpack.i.l.bf16 %v5392_v60 }
 0x553   : > { %v4470_v49 = vsel %vm4467_vm4, %v4465_v6, %v5393_v37  ;;  %v4471_v62 = vsel %vm4467_vm4, %v4466_v20, %v5394_v16 }
 0x554   : > { %5097 = vmatprep.mubr.f32.mxu0 %v4470_v49 }
 0x555   : > { %5098 = vmatmul.mubr.f32.gmra.mrb[20].mxu0 %v4471_v62 }
 0x61f   : > { %v5096_v58 = vpop.f32.mrb[18].mxu0 }
 0x620   : > { %v4567_v18 = vadd.f32 %v5096_v58, %v4797_v4  ;;  %v4561_v63 = vpop.f32.mrb[19].mxu0 }
 0x621   : > { %v4562_v31 = vadd.f32 %v4797_v4, %v4561_v63 }
 0x622   : > { %4581 = vst [vmem:[%s314_s18 + $0x8] sm:$0xff] %v4567_v18 }
 0x623   : > { %4580 = vst [vmem:[%s314_s18] sm:$0xff] %v4562_v31 }
 0x628   : > { %v5099_v8 = vpop.f32.mrb[20].mxu0 }
 0x629   : > { %v4577_v56 = vadd.f32 %v5099_v8, %v4797_v4  ;;  %v4571_v25 = vpop.f32.mrb[21].mxu0 }
 0x62a   : > { %v4572_v5 = vadd.f32 %v4797_v4, %v4571_v25 }
 0x62b   : > { %4583 = vst [vmem:[%s314_s18 + $0x18] sm:$0xff] %v4577_v56 }
 0x62c   : > { %4582 = vst [vmem:[%s314_s18 + $0x10] sm:$0xff] %v4572_v5 }
 0x62d   : > { %5586 = shalt.err (!%p5583_p4)
}
 0x62e   : > { %s5587_s19 = scalar_lea.hbm %s6743_s17, 512  ;;  %s5591_s10 = scalar_lea.hbm %s6793_s6, 1024 }
 0x62f   : > { %p5588_p9 = scmp.ne.s32.totalorder %s6743_s17, %s5587_s19  ;;  %p5592_p8 = scmp.lt.u32.totalorder %s6743_s17, %s6793_s6 }
 0x630   : > { %p5593_p13 = scmp.lt.u32.totalorder %s5591_s10, %s5587_s19  ;;  %p5595_p10 = scmp.lt.u32.totalorder %s5587_s19, %s6743_s17 }
 0x631   : > { %p5589_p0 = pnand %p5588_p9, %p5849_p5 }
 0x632   : > { %p5594_p6 = por %p5593_p13, %p5592_p8 }
 0x633   : > { %p5590_p11 = pneg %p5589_p0 }
 0x634   : > { %p5596_p3 = por %p5595_p10, %p5594_p6 }
 0x636   : > { %p5597_p7 = pnand %p5596_p3, %p5590_p11 }
 0x638   : > { %5600 = shalt.err (!%p5597_p7)
}
 0x639   : > { %s5664_s7 = smov 128   ;;  %s5665_s8 = smov 8  }
 0x63a   : > { %5290 = dma.vmem_to_hbm [thread:$0]  (%p5849_p5), %s6738_s13, 512, %s6743_s17, %s4585_s15, %s5664_s7, %s5664_s7, %s5665_s8  }
 0x63b PF: > { %s4614_s14 = sand.u32 1, %s5635_s21   ;;  %p6815_p12 = scmp.ne.s32.totalorder %s6799_s28, 0 }
 0x63c   : > { %p6816_p2 = scmp.ge.s32.totalorder %s5647_s24, 2  ;;  %s4615_s1 = scalar_lea.sflag [#allocation4], %s4614_s14 }
 0x63e   : > { %p5307_p1 = pnand %p6816_p2, %p6815_p12 }
 0x640   : > { %5630 = dma.done.wait (!%p5307_p1), %s4615_s1, 512  }
 0x641   : > { %5632 = vsyncadd (!%p5307_p1), %s4615_s1, 4294966784  ;;  %p21_p4 = scmp.ge.s32.totalorder %s5814_s12, 4   ;;  %s6817_s21 = smov %s5639_s22 }
 0x642   : > { %s6818_s22 = smov %s5643_s23  ;;  %s6819_s23 = smov %s5845_s30 }
 0x643   : > { %s6820_s24 = smov %s5814_s12  ;;  %23 = sbr.rel (!%p21_p4) target bundleno = 9 (0x9), region = 101 }
 0x64a   :  { %4620 = vsyncpa [#allocation3], 1 }
 0x64b   :  { %4622 = vsyncpa [#allocation3 + $0x1], 1 }
 0x64c   :  { %4623 = vsyncpa [#allocation6], 1 }
 0x64d   :  { %4624 = vsyncpa [#allocation9], 1 }
 0x64e   :  { %4625 = vsyncpa [#allocation4], 1 }
 0x64f   :  { %4627 = vsyncpa [#allocation4 + $0x1], 1 }

</bundles_post_ra>
